<compile_context>
chip_gen: v6e
topology: v6e:2x2x1
jax: 0.10.0
libtpu: 0.0.40
codegen_flags: <defaults>
</compile_context>

<pallas_src>
import jax
import jax.numpy as jnp
from jax import lax
from jax.experimental import pallas as pl
from jax.experimental.pallas import tpu as pltpu


def _round_up(x, m):
    return ((x + m - 1) // m) * m


# ---------------------------------------------------------------------------
# Bidirectional GRU final-hidden kernel (one batch chunk per grid point)
#   x_ref   : (T, NB, E)   bf16, time-major chunk
#   wih_ref : (E, 6HP)     bf16, columns [f_r | f_z | f_n | b_r | b_z | b_n]
#   whh_ref : (2HP, 6HP)   bf16, blockdiag(whh_f(HP,3HP), whh_b(HP,3HP))
#   bx_ref  : (1, 6HP)     f32,  [bih_r+bhh_r | bih_z+bhh_z | bih_n] per dir
#   bhn_ref : (1, 2HP)     f32,  [bhh_n_f | bhh_n_b]
#   out_ref : (2, NB, HP)  f32,  out[0]=h_fwd, out[1]=h_bwd (lane-dense planes)
#   xp_ref  : (T*NB, 6HP)  f32 scratch (hoisted input projection)
# ---------------------------------------------------------------------------
def bigru_kernel(x_ref, wih_ref, whh_ref, bx_ref, bhn_ref, out_ref, xp_ref):
    T, NB, E = x_ref.shape
    HP = whh_ref.shape[0] // 2

    # Hoisted input projection for all timesteps and BOTH directions in one
    # streaming bf16 MXU matmul (off the serial critical path).  NB is a
    # multiple of 16 so the (T,NB,E)->(T*NB,E) collapse is layout-preserving.
    x_flat = x_ref[...].reshape(T * NB, E)
    xp_ref[...] = (jnp.dot(x_flat, wih_ref[...],
                           preferred_element_type=jnp.float32) + bx_ref[...])

    # Hoist weight loads and bias broadcasts out of the recurrence.
    whh = whh_ref[...]
    bhn_f = jnp.broadcast_to(bhn_ref[0:1, 0:HP], (NB, HP))
    bhn_b = jnp.broadcast_to(bhn_ref[0:1, HP:2 * HP], (NB, HP))

    def body(t, h_cat):
        # Single block-diagonal recurrence matmul for both directions:
        # [hf|hb](NB,2HP) @ blockdiag(whh_f,whh_b)(2HP,6HP) -> (NB,6HP).
        hp = jnp.dot(h_cat.astype(jnp.bfloat16), whh,
                     preferred_element_type=jnp.float32)

        rf = pl.multiple_of(t * NB, NB)
        rb = pl.multiple_of((T - 1 - t) * NB, NB)
        xf = xp_ref[pl.ds(rf, NB), 0:3 * HP]          # fwd gates at time t
        xb = xp_ref[pl.ds(rb, NB), 3 * HP:6 * HP]     # bwd gates at time T-1-t

        hf = h_cat[:, 0:HP]
        hb = h_cat[:, HP:2 * HP]

        # All gate slices are 128-lane aligned (HP is a multiple of 128).
        r_f = jax.nn.sigmoid(xf[:, 0:HP] + hp[:, 0:HP])
        z_f = jax.nn.sigmoid(xf[:, HP:2 * HP] + hp[:, HP:2 * HP])
        n_f = jnp.tanh(xf[:, 2 * HP:3 * HP] + r_f * (hp[:, 2 * HP:3 * HP] + bhn_f))
        hf = (1.0 - z_f) * n_f + z_f * hf

        r_b = jax.nn.sigmoid(xb[:, 0:HP] + hp[:, 3 * HP:4 * HP])
        z_b = jax.nn.sigmoid(xb[:, HP:2 * HP] + hp[:, 4 * HP:5 * HP])
        n_b = jnp.tanh(xb[:, 2 * HP:3 * HP] + r_b * (hp[:, 5 * HP:6 * HP] + bhn_b))
        hb = (1.0 - z_b) * n_b + z_b * hb

        return jnp.concatenate([hf, hb], axis=1)

    h0 = jnp.zeros((NB, 2 * HP), jnp.float32)
    h = lax.fori_loop(0, T, body, h0)
    out_ref[0] = h[:, 0:HP]            # lane-dense full-plane stores
    out_ref[1] = h[:, HP:2 * HP]


def bigru_final_hidden(x_nte, prm, H, batch_chunk=128):
    """x_nte: (N, T, E) batch-first f32.  Returns (N, 2H) = [h_fwd | h_bwd]."""
    N, T, E = x_nte.shape
    HP = prm["whh"].shape[0] // 2

    # Batch chunk: multiple of 16 sublanes (bf16 operands); VMEM-budget knob.
    NB = min(batch_chunk, _round_up(N, 16))
    Np = _round_up(N, NB)
    num_chunks = Np // NB

    x_tm = jnp.transpose(x_nte, (1, 0, 2))            # (T, N, E) time-major
    if Np != N:
        x_tm = jnp.pad(x_tm, ((0, 0), (0, Np - N), (0, 0)))
    x_tm = x_tm.astype(jnp.bfloat16)

    out = pl.pallas_call(
        bigru_kernel,
        out_shape=jax.ShapeDtypeStruct((2, Np, HP), jnp.float32),
        grid=(num_chunks,),
        in_specs=[
            pl.BlockSpec((T, NB, E), lambda n: (0, n, 0)),        # x chunk
            pl.BlockSpec((E, 6 * HP), lambda n: (0, 0)),          # wih (fused)
            pl.BlockSpec((2 * HP, 6 * HP), lambda n: (0, 0)),     # whh blockdiag
            pl.BlockSpec((1, 6 * HP), lambda n: (0, 0)),          # bx
            pl.BlockSpec((1, 2 * HP), lambda n: (0, 0)),          # bhn
        ],
        out_specs=pl.BlockSpec((2, NB, HP), lambda n: (0, n, 0)),
        # TODO(synk): store xp in bf16 (halves scratch) for very long T on v7x.
        scratch_shapes=[pltpu.VMEM((T * NB, 6 * HP), jnp.float32)],
        compiler_params=pltpu.CompilerParams(
            dimension_semantics=("parallel",),        # megacore over batch chunks
            vmem_limit_bytes=48 * 1024 * 1024),       # explicit, v7x-safe budget
    )(x_tm, prm["wih"], prm["whh"], prm["bx"], prm["bhn"])

    # Drop padded rows / padded hidden lanes (padded lanes are exactly zero).
    return jnp.concatenate([out[0, :N, :H], out[1, :N, :H]], axis=1)


# ---------------------------------------------------------------------------
# Scoring kernel (one sentence per grid point), transposed (D, B) layout:
#   merge @ W1 = p@(W1a+W1d+W1e) + q@(W1b-W1d) + (p*q)@W1c + p_global@(-W1e)
# computed as W^T @ x^T so every op is 2-D and the store is a lane-dense row.
# ---------------------------------------------------------------------------
def score_kernel(pT_ref, qT_ref, pgT_ref, wpT_ref, wqT_ref, wpqT_ref, wpgT_ref,
                 b1T_ref, w2_ref, b2_ref, out_ref):
    pT = pT_ref[0]                                                # (D, B)
    qT = qT_ref[...]                                              # (D, B)
    # q / p_global terms are recomputed per sentence so the S axis can stay
    # "parallel" (megacore-safe); for large B/D hoist them into a prologue pass.
    hT = (jnp.dot(wpT_ref[...], pT, preferred_element_type=jnp.float32)
          + jnp.dot(wpqT_ref[...], pT * qT, preferred_element_type=jnp.float32)
          + jnp.dot(wqT_ref[...], qT, preferred_element_type=jnp.float32)
          + jnp.dot(wpgT_ref[...], pgT_ref[...], preferred_element_type=jnp.float32)
          + b1T_ref[...])                                         # (D, B)
    hT = jnp.maximum(hT, 0.0)                                     # relu (dropouts = id)
    logit = jnp.dot(w2_ref[...], hT,
                    preferred_element_type=jnp.float32) + b2_ref[...]   # (1, B)
    out_ref[0] = jax.nn.sigmoid(logit)                            # loss == 'bce'
    # TODO(synk): loss == 'merge' (softmax over sentences) branch not implemented.


# ---------------------------------------------------------------------------
# Full forward (glue in plain JAX: embedding gather, reshapes, mean, transposes)
# ---------------------------------------------------------------------------
def mil_answer_trigger_forward(params, s_tokens, q_tokens):
    """s_tokens: (B, S, Ts) int32; q_tokens: (B, Tq) int32. Returns (B, S)."""
    B, S, Ts = s_tokens.shape
    H = params["b1T"].shape[0] // 2
    D = 2 * H
    emb = params["embedding"]
    s_emb = jnp.take(emb, s_tokens, axis=0)                       # (B, S, Ts, E)
    q_emb = jnp.take(emb, q_tokens, axis=0)                       # (B, Tq, E)
    # s.transpose(0, 1): sentences across the batch, flattened to (S*B, Ts, E)
    s_emb = jnp.transpose(s_emb, (1, 0, 2, 3)).reshape(S * B, Ts, -1)

    q_hidden = bigru_final_hidden(q_emb, params["q_rnn"], H)      # (B, 2H)
    p_flat = bigru_final_hidden(s_emb, params["p_rnn"], H)        # (S*B, 2H)
    p_hiddens = p_flat.reshape(S, B, D)                           # (S, B, 2H)

    pT = jnp.transpose(p_hiddens, (0, 2, 1))                      # (S, D, B)
    qT = q_hidden.T                                               # (D, B)
    pgT = jnp.mean(pT, axis=0)                                    # (D, B) p_global^T

    scores = pl.pallas_call(
        score_kernel,
        out_shape=jax.ShapeDtypeStruct((S, 1, B), jnp.float32),
        grid=(S,),
        in_specs=[
            pl.BlockSpec((1, D, B), lambda i: (i, 0, 0)),         # p^T (per sentence)
            pl.BlockSpec((D, B), lambda i: (0, 0)),               # q^T
            pl.BlockSpec((D, B), lambda i: (0, 0)),               # p_global^T
            pl.BlockSpec((D, D), lambda i: (0, 0)),               # W_p^T
            pl.BlockSpec((D, D), lambda i: (0, 0)),               # W_q^T
            pl.BlockSpec((D, D), lambda i: (0, 0)),               # W_pq^T
            pl.BlockSpec((D, D), lambda i: (0, 0)),               # W_pg^T
            pl.BlockSpec((D, 1), lambda i: (0, 0)),               # b1^T
            pl.BlockSpec((1, D), lambda i: (0, 0)),               # w2 row
            pl.BlockSpec((1, 1), lambda i: (0, 0)),               # b2
        ],
        out_specs=pl.BlockSpec((1, 1, B), lambda i: (i, 0, 0)),
        compiler_params=pltpu.CompilerParams(
            dimension_semantics=("parallel",)),
    )(pT, qT, pgT, params["wpT"], params["wqT"], params["wpqT"], params["wpgT"],
      params["b1T"], params["w2_row"], params["b2"])
    return scores[:, 0, :].T                                      # (B, S)


# ---------------------------------------------------------------------------
# Deterministic synthetic parameters (raw, PyTorch-style per-gate layout)
# ---------------------------------------------------------------------------
def init_raw_params(key, vocab_size, emb_dim, hidden_size):
    keys = jax.random.split(key, 8)

    def rnd(k, shape, scale=0.1):
        return scale * jax.random.normal(k, shape, jnp.float32)

    emb = rnd(keys[0], (vocab_size, emb_dim))
    emb = emb.at[0].set(0.0)  # padding_idx=0

    def gru(k):
        ks = jax.random.split(k, 8)
        H, E = hidden_size, emb_dim
        return {
            "wih_f": rnd(ks[0], (3, E, H)), "whh_f": rnd(ks[1], (3, H, H)),
            "bih_f": rnd(ks[2], (3, 1, H)), "bhh_f": rnd(ks[3], (3, 1, H)),
            "wih_b": rnd(ks[4], (3, E, H)), "whh_b": rnd(ks[5], (3, H, H)),
            "bih_b": rnd(ks[6], (3, 1, H)), "bhh_b": rnd(ks[7], (3, 1, H)),
        }

    D = 2 * hidden_size
    return {
        "embedding": emb,
        "q_rnn": gru(keys[1]),
        "p_rnn": gru(keys[2]),
        "w1t": rnd(keys[3], (5 * D, D)),   # linear1.weight.T  (in=5*2H, out=2H)
        "b1": rnd(keys[4], (1, D)),
        "w2t": rnd(keys[5], (D, 1)),       # linear2.weight.T
        "b2": rnd(keys[6], (1, 1)),
    }


def prepare_params(raw, lane=128):
    """Raw per-gate weights -> kernel layout (fused+padded gates, block-diag whh,
    folded biases, folded merge concat, transposed score weights, bf16 MXU ops)."""
    H = raw["q_rnn"]["whh_f"].shape[2]
    HP = _round_up(H, lane)              # lane-aligned hidden size (>= 128)
    D = 2 * H

    def pad_h(a, axis):
        pad = [(0, 0)] * a.ndim
        pad[axis] = (0, HP - H)
        return jnp.pad(a, pad)

    def fuse_dir(wih, whh, bih, bhh):
        wih3 = jnp.concatenate([pad_h(wih[g], 1) for g in range(3)], axis=1)   # (E, 3HP)
        whh3 = jnp.concatenate([pad_h(pad_h(whh[g], 1), 0) for g in range(3)],
                               axis=1)                                          # (HP, 3HP)
        bx3 = jnp.concatenate([pad_h(bih[0] + bhh[0], 1),
                               pad_h(bih[1] + bhh[1], 1),
                               pad_h(bih[2], 1)], axis=1)                       # (1, 3HP)
        bhn = pad_h(bhh[2], 1)                                                  # (1, HP)
        return wih3, whh3, bx3, bhn

    def fuse_gru(g):
        wf, hf, bxf, bnf = fuse_dir(g["wih_f"], g["whh_f"], g["bih_f"], g["bhh_f"])
        wb, hb, bxb, bnb = fuse_dir(g["wih_b"], g["whh_b"], g["bih_b"], g["bhh_b"])
        wih_cat = jnp.concatenate([wf, wb], axis=1).astype(jnp.bfloat16)        # (E, 6HP)
        whh_blk = jnp.zeros((2 * HP, 6 * HP), jnp.float32)
        whh_blk = whh_blk.at[0:HP, 0:3 * HP].set(hf)
        whh_blk = whh_blk.at[HP:2 * HP, 3 * HP:6 * HP].set(hb)
        return {"wih": wih_cat,
                "whh": whh_blk.astype(jnp.bfloat16),                            # (2HP, 6HP)
                "bx": jnp.concatenate([bxf, bxb], axis=1),                      # (1, 6HP)
                "bhn": jnp.concatenate([bnf, bnb], axis=1)}                     # (1, 2HP)

    W1 = raw["w1t"]                       # (5D, D), blocks [p|q|p*q|p-q|p-pg]
    w_p = W1[0:D] + W1[3 * D:4 * D] + W1[4 * D:5 * D]
    w_q = W1[D:2 * D] - W1[3 * D:4 * D]
    w_pq = W1[2 * D:3 * D]
    w_pg = -W1[4 * D:5 * D]

    return {
        "embedding": raw["embedding"],
        "q_rnn": fuse_gru(raw["q_rnn"]),
        "p_rnn": fuse_gru(raw["p_rnn"]),
        "wpT": w_p.T, "wqT": w_q.T, "wpqT": w_pq.T, "wpgT": w_pg.T,
        "b1T": raw["b1"].T,                       # (D, 1)
        "w2_row": raw["w2t"].reshape(1, D),       # (1, D)
        "b2": raw["b2"],                          # (1, 1)
    }


# ---------------------------------------------------------------------------
# Pure-JAX f32 reference on the RAW weights (validates all the weight folding)
# ---------------------------------------------------------------------------
def _ref_gru_hidden(x, prm):
    N, T, _ = x.shape
    H = prm["whh_f"].shape[1]

    def cell(x_t, h, wih, whh, bih, bhh):
        r = jax.nn.sigmoid(x_t @ wih[0] + bih[0] + h @ whh[0] + bhh[0])
        z = jax.nn.sigmoid(x_t @ wih[1] + bih[1] + h @ whh[1] + bhh[1])
        n = jnp.tanh(x_t @ wih[2] + bih[2] + r * (h @ whh[2] + bhh[2]))
        return (1.0 - z) * n + z * h

    hf = jnp.zeros((N, H), jnp.float32)
    hb = jnp.zeros((N, H), jnp.float32)
    for t in range(T):
        hf = cell(x[:, t], hf, prm["wih_f"], prm["whh_f"], prm["bih_f"], prm["bhh_f"])
        hb = cell(x[:, T - 1 - t], hb, prm["wih_b"], prm["whh_b"], prm["bih_b"], prm["bhh_b"])
    return jnp.concatenate([hf, hb], axis=1)


def _ref_forward(raw, s_tokens, q_tokens):
    B, S, Ts = s_tokens.shape
    emb = raw["embedding"]
    s_emb = jnp.transpose(jnp.take(emb, s_tokens, axis=0), (1, 0, 2, 3))  # (S,B,Ts,E)
    q_emb = jnp.take(emb, q_tokens, axis=0)
    q_hidden = _ref_gru_hidden(q_emb, raw["q_rnn"])
    p_hiddens = jnp.stack([_ref_gru_hidden(s_emb[i], raw["p_rnn"]) for i in range(S)])
    p_global = jnp.mean(p_hiddens, axis=0)
    scores = []
    for i in range(S):
        ph = p_hiddens[i]
        merge = jnp.concatenate(
            [ph, q_hidden, ph * q_hidden, ph - q_hidden, ph - p_global], axis=1)
        h = jnp.maximum(merge @ raw["w1t"] + raw["b1"], 0.0)
        scores.append(h @ raw["w2t"] + raw["b2"])
    return jax.nn.sigmoid(jnp.concatenate(scores, axis=1))


if __name__ == "__main__":
    vocab_size, emb_dim, hidden_size = 50, 16, 16
    B, S, Ts, Tq = 2, 3, 8, 8

    key = jax.random.PRNGKey(0)
    kp, ks, kq = jax.random.split(key, 3)
    raw = init_raw_params(kp, vocab_size, emb_dim, hidden_size)
    params = prepare_params(raw)
    s_tokens = jax.random.randint(ks, (B, S, Ts), 0, vocab_size, dtype=jnp.int32)
    q_tokens = jax.random.randint(kq, (B, Tq), 0, vocab_size, dtype=jnp.int32)

    out = jax.jit(mil_answer_trigger_forward)(params, s_tokens, q_tokens)
    out = jax.block_until_ready(out)

    ref = _ref_forward(raw, s_tokens, q_tokens)
    assert out.shape == (B, S), out.shape
    # bf16 MXU operands in the GRU => loosened tolerance vs the f32 reference.
    assert jnp.allclose(out, ref, atol=2e-2, rtol=2e-2), (out, ref)
    print("KERNEL_OK")
</pallas_src>

<mosaic_0001>
module attributes {stable_mosaic.version = 11 : i64} {
  func.func @bigru_kernel(%arg0: i32, %arg1: memref<8x16x16xbf16, #tpu.memory_space<vmem>>, %arg2: memref<16x768xbf16, #tpu.memory_space<vmem>>, %arg3: memref<256x768xbf16, #tpu.memory_space<vmem>>, %arg4: memref<1x768xf32, #tpu.memory_space<vmem>>, %arg5: memref<1x256xf32, #tpu.memory_space<vmem>>, %arg6: memref<2x16x128xf32, #tpu.memory_space<vmem>>, %arg7: memref<128x768xf32, #tpu.memory_space<vmem>>) attributes {dimension_semantics = [#tpu.dimension_semantics<parallel>], iteration_bounds = array<i64: 1>, scalar_prefetch = 0 : i64, scratch_operands = 1 : i64, tpu.core_type = #tpu.core_type<tc>, window_params = [{transform_indices = @transform_0, window_bounds = array<i64: 8, 16, 16>}, {pipeline_mode = #tpu.pipeline_mode<synchronous>, transform_indices = @transform_1, window_bounds = array<i64: 16, 768>}, {pipeline_mode = #tpu.pipeline_mode<synchronous>, transform_indices = @transform_2, window_bounds = array<i64: 256, 768>}, {pipeline_mode = #tpu.pipeline_mode<synchronous>, transform_indices = @transform_3, window_bounds = array<i64: 1, 768>}, {pipeline_mode = #tpu.pipeline_mode<synchronous>, transform_indices = @transform_4, window_bounds = array<i64: 1, 256>}, {transform_indices = @transform_5, window_bounds = array<i64: 2, 16, 128>}]} {
    %c0 = arith.constant 0 : index
    %c0_0 = arith.constant 0 : index
    %c0_1 = arith.constant 0 : index
    %0 = vector.load %arg1[%c0, %c0_0, %c0_1] : memref<8x16x16xbf16, #tpu.memory_space<vmem>>, vector<8x16x16xbf16>
    %1 = vector.shape_cast %0 : vector<8x16x16xbf16> to vector<128x16xbf16>
    %c0_2 = arith.constant 0 : index
    %c0_3 = arith.constant 0 : index
    %2 = vector.load %arg2[%c0_2, %c0_3] : memref<16x768xbf16, #tpu.memory_space<vmem>>, vector<16x768xbf16>
    %cst = arith.constant dense<0.000000e+00> : vector<128x768xf32>
    %3 = tpu.matmul %1, %2, %cst {dimension_numbers = #tpu.dot_dimension_numbers<[1], [0], [0], [1], [0, 0, 1, 1], [], []>} : vector<128x16xbf16>, vector<16x768xbf16>, vector<128x768xf32> -> vector<128x768xf32>
    %c0_4 = arith.constant 0 : index
    %c0_5 = arith.constant 0 : index
    %4 = vector.load %arg4[%c0_4, %c0_5] : memref<1x768xf32, #tpu.memory_space<vmem>>, vector<1x768xf32>
    %5 = vector.broadcast %4 : vector<1x768xf32> to vector<128x768xf32>
    %6 = arith.addf %3, %5 : vector<128x768xf32>
    %c0_6 = arith.constant 0 : index
    %c0_7 = arith.constant 0 : index
    %7 = vector.load %arg7[%c0_6, %c0_7] : memref<128x768xf32, #tpu.memory_space<vmem>>, vector<128x768xf32>
    tpu.vector_store %arg7[%c0_6, %c0_7], %6 {strides = array<i32>} : memref<128x768xf32, #tpu.memory_space<vmem>>, vector<128x768xf32>,
    %c0_8 = arith.constant 0 : index
    %c0_9 = arith.constant 0 : index
    %8 = vector.load %arg3[%c0_8, %c0_9] : memref<256x768xbf16, #tpu.memory_space<vmem>>, vector<256x768xbf16>
    %c0_10 = arith.constant 0 : index
    %c0_11 = arith.constant 0 : index
    %9 = vector.load %arg5[%c0_10, %c0_11] : memref<1x256xf32, #tpu.memory_space<vmem>>, vector<1x128xf32>
    %10 = vector.shape_cast %9 : vector<1x128xf32> to vector<1x128xf32>
    %11 = vector.broadcast %10 : vector<1x128xf32> to vector<16x128xf32>
    %c0_12 = arith.constant 0 : index
    %c128 = arith.constant 128 : index
    %12 = vector.load %arg5[%c0_12, %c128] : memref<1x256xf32, #tpu.memory_space<vmem>>, vector<1x128xf32>
    %13 = vector.shape_cast %12 : vector<1x128xf32> to vector<1x128xf32>
    %14 = vector.broadcast %13 : vector<1x128xf32> to vector<16x128xf32>
    %cst_13 = arith.constant 0.000000e+00 : f32
    %15 = vector.broadcast %cst_13 : f32 to vector<16x256xf32>
    %c0_i32 = arith.constant 0 : i32
    %c8_i32 = arith.constant 8 : i32
    %16 = arith.addi %c0_i32, %c8_i32 : i32
    %c1_i32 = arith.constant 1 : i32
    %17 = scf.for %arg8 = %c0_i32 to %16 step %c1_i32 iter_args(%arg9 = %15) -> (vector<16x256xf32>)  : i32 {
      %26 = arith.truncf %arg9 : vector<16x256xf32> to vector<16x256xbf16>
      %cst_20 = arith.constant dense<0.000000e+00> : vector<16x768xf32>
      %27 = tpu.matmul %26, %8, %cst_20 {dimension_numbers = #tpu.dot_dimension_numbers<[1], [0], [0], [1], [0, 0, 1, 1], [], []>} : vector<16x256xbf16>, vector<256x768xbf16>, vector<16x768xf32> -> vector<16x768xf32>
      %c16_i32 = arith.constant 16 : i32
      %28 = arith.muli %arg8, %c16_i32 : i32
      %29 = tpu.assume_multiple %28, 16 : i32
      %c7_i32 = arith.constant 7 : i32
      %30 = arith.subi %c7_i32, %arg8 : i32
      %c16_i32_21 = arith.constant 16 : i32
      %31 = arith.muli %30, %c16_i32_21 : i32
      %32 = tpu.assume_multiple %31, 16 : i32
      %33 = arith.index_cast %29 : i32 to index
      %c0_22 = arith.constant 0 : index
      %34 = vector.load %arg7[%33, %c0_22] : memref<128x768xf32, #tpu.memory_space<vmem>>, vector<16x384xf32>
      %35 = arith.index_cast %32 : i32 to index
      %c384 = arith.constant 384 : index
      %36 = vector.load %arg7[%35, %c384] : memref<128x768xf32, #tpu.memory_space<vmem>>, vector<16x384xf32>
      %37 = vector.extract_strided_slice %arg9 {offsets = [0, 0], sizes = [16, 128], strides = [1, 1]} : vector<16x256xf32> to vector<16x128xf32>
      %38 = vector.extract_strided_slice %arg9 {offsets = [0, 128], sizes = [16, 128], strides = [1, 1]} : vector<16x256xf32> to vector<16x128xf32>
      %39 = vector.extract_strided_slice %34 {offsets = [0, 0], sizes = [16, 128], strides = [1, 1]} : vector<16x384xf32> to vector<16x128xf32>
      %40 = vector.extract_strided_slice %27 {offsets = [0, 0], sizes = [16, 128], strides = [1, 1]} : vector<16x768xf32> to vector<16x128xf32>
      %41 = arith.addf %39, %40 : vector<16x128xf32>
      %42 = arith.negf %41 : vector<16x128xf32>
      %43 = math.exp %42 : vector<16x128xf32>
      %cst_23 = arith.constant 1.000000e+00 : f32
      %44 = vector.broadcast %cst_23 : f32 to vector<16x128xf32>
      %45 = arith.addf %44, %43 : vector<16x128xf32>
      %46 = arith.divf %44, %45 : vector<16x128xf32>
      %47 = vector.extract_strided_slice %34 {offsets = [0, 128], sizes = [16, 128], strides = [1, 1]} : vector<16x384xf32> to vector<16x128xf32>
      %48 = vector.extract_strided_slice %27 {offsets = [0, 128], sizes = [16, 128], strides = [1, 1]} : vector<16x768xf32> to vector<16x128xf32>
      %49 = arith.addf %47, %48 : vector<16x128xf32>
      %50 = arith.negf %49 : vector<16x128xf32>
      %51 = math.exp %50 : vector<16x128xf32>
      %cst_24 = arith.constant 1.000000e+00 : f32
      %52 = vector.broadcast %cst_24 : f32 to vector<16x128xf32>
      %53 = arith.addf %52, %51 : vector<16x128xf32>
      %54 = arith.divf %52, %53 : vector<16x128xf32>
      %55 = vector.extract_strided_slice %34 {offsets = [0, 256], sizes = [16, 128], strides = [1, 1]} : vector<16x384xf32> to vector<16x128xf32>
      %56 = vector.extract_strided_slice %27 {offsets = [0, 256], sizes = [16, 128], strides = [1, 1]} : vector<16x768xf32> to vector<16x128xf32>
      %57 = arith.addf %56, %11 : vector<16x128xf32>
      %58 = arith.mulf %46, %57 : vector<16x128xf32>
      %59 = arith.addf %55, %58 : vector<16x128xf32>
      %60 = math.tanh %59 : vector<16x128xf32>
      %cst_25 = arith.constant 1.000000e+00 : f32
      %61 = vector.broadcast %cst_25 : f32 to vector<16x128xf32>
      %62 = arith.subf %61, %54 : vector<16x128xf32>
      %63 = arith.mulf %62, %60 : vector<16x128xf32>
      %64 = arith.mulf %54, %37 : vector<16x128xf32>
      %65 = arith.addf %63, %64 : vector<16x128xf32>
      %66 = vector.extract_strided_slice %36 {offsets = [0, 0], sizes = [16, 128], strides = [1, 1]} : vector<16x384xf32> to vector<16x128xf32>
      %67 = vector.extract_strided_slice %27 {offsets = [0, 384], sizes = [16, 128], strides = [1, 1]} : vector<16x768xf32> to vector<16x128xf32>
      %68 = arith.addf %66, %67 : vector<16x128xf32>
      %69 = arith.negf %68 : vector<16x128xf32>
      %70 = math.exp %69 : vector<16x128xf32>
      %cst_26 = arith.constant 1.000000e+00 : f32
      %71 = vector.broadcast %cst_26 : f32 to vector<16x128xf32>
      %72 = arith.addf %71, %70 : vector<16x128xf32>
      %73 = arith.divf %71, %72 : vector<16x128xf32>
      %74 = vector.extract_strided_slice %36 {offsets = [0, 128], sizes = [16, 128], strides = [1, 1]} : vector<16x384xf32> to vector<16x128xf32>
      %75 = vector.extract_strided_slice %27 {offsets = [0, 512], sizes = [16, 128], strides = [1, 1]} : vector<16x768xf32> to vector<16x128xf32>
      %76 = arith.addf %74, %75 : vector<16x128xf32>
      %77 = arith.negf %76 : vector<16x128xf32>
      %78 = math.exp %77 : vector<16x128xf32>
      %cst_27 = arith.constant 1.000000e+00 : f32
      %79 = vector.broadcast %cst_27 : f32 to vector<16x128xf32>
      %80 = arith.addf %79, %78 : vector<16x128xf32>
      %81 = arith.divf %79, %80 : vector<16x128xf32>
      %82 = vector.extract_strided_slice %36 {offsets = [0, 256], sizes = [16, 128], strides = [1, 1]} : vector<16x384xf32> to vector<16x128xf32>
      %83 = vector.extract_strided_slice %27 {offsets = [0, 640], sizes = [16, 128], strides = [1, 1]} : vector<16x768xf32> to vector<16x128xf32>
      %84 = arith.addf %83, %14 : vector<16x128xf32>
      %85 = arith.mulf %73, %84 : vector<16x128xf32>
      %86 = arith.addf %82, %85 : vector<16x128xf32>
      %87 = math.tanh %86 : vector<16x128xf32>
      %cst_28 = arith.constant 1.000000e+00 : f32
      %88 = vector.broadcast %cst_28 : f32 to vector<16x128xf32>
      %89 = arith.subf %88, %81 : vector<16x128xf32>
      %90 = arith.mulf %89, %87 : vector<16x128xf32>
      %91 = arith.mulf %81, %38 : vector<16x128xf32>
      %92 = arith.addf %90, %91 : vector<16x128xf32>
      %93 = tpu.concatenate %65, %92 in 1 : vector<16x128xf32>, vector<16x128xf32> -> vector<16x256xf32>
      scf.yield %93 : vector<16x256xf32>
    }
    %c8_i32_14 = arith.constant 8 : i32
    %18 = vector.extract_strided_slice %17 {offsets = [0, 0], sizes = [16, 128], strides = [1, 1]} : vector<16x256xf32> to vector<16x128xf32>
    %c0_15 = arith.constant 0 : index
    %c0_16 = arith.constant 0 : index
    %c0_17 = arith.constant 0 : index
    %19 = vector.load %arg6[%c0_15, %c0_16, %c0_17] : memref<2x16x128xf32, #tpu.memory_space<vmem>>, vector<1x16x128xf32>
    %20 = vector.shape_cast %19 : vector<1x16x128xf32> to vector<16x128xf32>
    %21 = vector.shape_cast %18 : vector<16x128xf32> to vector<1x16x128xf32>
    tpu.vector_store %arg6[%c0_15, %c0_16, %c0_17], %21 {strides = array<i32>} : memref<2x16x128xf32, #tpu.memory_space<vmem>>, vector<1x16x128xf32>,
    %22 = vector.extract_strided_slice %17 {offsets = [0, 128], sizes = [16, 128], strides = [1, 1]} : vector<16x256xf32> to vector<16x128xf32>
    %c1 = arith.constant 1 : index
    %c0_18 = arith.constant 0 : index
    %c0_19 = arith.constant 0 : index
    %23 = vector.load %arg6[%c1, %c0_18, %c0_19] : memref<2x16x128xf32, #tpu.memory_space<vmem>>, vector<1x16x128xf32>
    %24 = vector.shape_cast %23 : vector<1x16x128xf32> to vector<16x128xf32>
    %25 = vector.shape_cast %22 : vector<16x128xf32> to vector<1x16x128xf32>
    tpu.vector_store %arg6[%c1, %c0_18, %c0_19], %25 {strides = array<i32>} : memref<2x16x128xf32, #tpu.memory_space<vmem>>, vector<1x16x128xf32>,
    return
  }
  func.func @transform_0(%arg0: i32) -> (i32, i32, i32) {
    %c0_i32 = arith.constant 0 : i32
    %c0_i32_0 = arith.constant 0 : i32
    %c0_i32_1 = arith.constant 0 : i32
    return %c0_i32, %arg0, %c0_i32_0 : i32, i32, i32
  }
  func.func @transform_1(%arg0: i32) -> (i32, i32) {
    %c0_i32 = arith.constant 0 : i32
    %c0_i32_0 = arith.constant 0 : i32
    %c0_i32_1 = arith.constant 0 : i32
    return %c0_i32, %c0_i32_0 : i32, i32
  }
  func.func @transform_2(%arg0: i32) -> (i32, i32) {
    %c0_i32 = arith.constant 0 : i32
    %c0_i32_0 = arith.constant 0 : i32
    %c0_i32_1 = arith.constant 0 : i32
    return %c0_i32, %c0_i32_0 : i32, i32
  }
  func.func @transform_3(%arg0: i32) -> (i32, i32) {
    %c0_i32 = arith.constant 0 : i32
    %c0_i32_0 = arith.constant 0 : i32
    %c0_i32_1 = arith.constant 0 : i32
    return %c0_i32, %c0_i32_0 : i32, i32
  }
  func.func @transform_4(%arg0: i32) -> (i32, i32) {
    %c0_i32 = arith.constant 0 : i32
    %c0_i32_0 = arith.constant 0 : i32
    %c0_i32_1 = arith.constant 0 : i32
    return %c0_i32, %c0_i32_0 : i32, i32
  }
  func.func @transform_5(%arg0: i32) -> (i32, i32, i32) {
    %c0_i32 = arith.constant 0 : i32
    %c0_i32_0 = arith.constant 0 : i32
    %c0_i32_1 = arith.constant 0 : i32
    return %c0_i32, %arg0, %c0_i32_0 : i32, i32, i32
  }
}

module attributes {stable_mosaic.version = 11 : i64} {
  func.func @bigru_kernel(%arg0: i32, %arg1: memref<8x16x16xbf16, #tpu.memory_space<vmem>>, %arg2: memref<16x768xbf16, #tpu.memory_space<vmem>>, %arg3: memref<256x768xbf16, #tpu.memory_space<vmem>>, %arg4: memref<1x768xf32, #tpu.memory_space<vmem>>, %arg5: memref<1x256xf32, #tpu.memory_space<vmem>>, %arg6: memref<2x16x128xf32, #tpu.memory_space<vmem>>, %arg7: memref<128x768xf32, #tpu.memory_space<vmem>>) attributes {dimension_semantics = [#tpu.dimension_semantics<parallel>], iteration_bounds = array<i64: 1>, scalar_prefetch = 0 : i64, scratch_operands = 1 : i64, tpu.core_type = #tpu.core_type<tc>, window_params = [{transform_indices = @transform_0, window_bounds = array<i64: 8, 16, 16>}, {pipeline_mode = #tpu.pipeline_mode<synchronous>, transform_indices = @transform_1, window_bounds = array<i64: 16, 768>}, {pipeline_mode = #tpu.pipeline_mode<synchronous>, transform_indices = @transform_2, window_bounds = array<i64: 256, 768>}, {pipeline_mode = #tpu.pipeline_mode<synchronous>, transform_indices = @transform_3, window_bounds = array<i64: 1, 768>}, {pipeline_mode = #tpu.pipeline_mode<synchronous>, transform_indices = @transform_4, window_bounds = array<i64: 1, 256>}, {transform_indices = @transform_5, window_bounds = array<i64: 2, 16, 128>}]} {
    %c0 = arith.constant 0 : index
    %c0_0 = arith.constant 0 : index
    %c0_1 = arith.constant 0 : index
    %0 = vector.load %arg1[%c0, %c0_0, %c0_1] : memref<8x16x16xbf16, #tpu.memory_space<vmem>>, vector<8x16x16xbf16>
    %1 = vector.shape_cast %0 : vector<8x16x16xbf16> to vector<128x16xbf16>
    %c0_2 = arith.constant 0 : index
    %c0_3 = arith.constant 0 : index
    %2 = vector.load %arg2[%c0_2, %c0_3] : memref<16x768xbf16, #tpu.memory_space<vmem>>, vector<16x768xbf16>
    %cst = arith.constant dense<0.000000e+00> : vector<128x768xf32>
    %3 = tpu.matmul %1, %2, %cst {dimension_numbers = #tpu.dot_dimension_numbers<[1], [0], [0], [1], [0, 0, 1, 1], [], []>} : vector<128x16xbf16>, vector<16x768xbf16>, vector<128x768xf32> -> vector<128x768xf32>
    %c0_4 = arith.constant 0 : index
    %c0_5 = arith.constant 0 : index
    %4 = vector.load %arg4[%c0_4, %c0_5] : memref<1x768xf32, #tpu.memory_space<vmem>>, vector<1x768xf32>
    %5 = vector.broadcast %4 : vector<1x768xf32> to vector<128x768xf32>
    %6 = arith.addf %3, %5 : vector<128x768xf32>
    %c0_6 = arith.constant 0 : index
    %c0_7 = arith.constant 0 : index
    %7 = vector.load %arg7[%c0_6, %c0_7] : memref<128x768xf32, #tpu.memory_space<vmem>>, vector<128x768xf32>
    tpu.vector_store %arg7[%c0_6, %c0_7], %6 {strides = array<i32>} : memref<128x768xf32, #tpu.memory_space<vmem>>, vector<128x768xf32>,
    %c0_8 = arith.constant 0 : index
    %c0_9 = arith.constant 0 : index
    %8 = vector.load %arg3[%c0_8, %c0_9] : memref<256x768xbf16, #tpu.memory_space<vmem>>, vector<256x768xbf16>
    %c0_10 = arith.constant 0 : index
    %c0_11 = arith.constant 0 : index
    %9 = vector.load %arg5[%c0_10, %c0_11] : memref<1x256xf32, #tpu.memory_space<vmem>>, vector<1x128xf32>
    %10 = vector.shape_cast %9 : vector<1x128xf32> to vector<1x128xf32>
    %11 = vector.broadcast %10 : vector<1x128xf32> to vector<16x128xf32>
    %c0_12 = arith.constant 0 : index
    %c128 = arith.constant 128 : index
    %12 = vector.load %arg5[%c0_12, %c128] : memref<1x256xf32, #tpu.memory_space<vmem>>, vector<1x128xf32>
    %13 = vector.shape_cast %12 : vector<1x128xf32> to vector<1x128xf32>
    %14 = vector.broadcast %13 : vector<1x128xf32> to vector<16x128xf32>
    %cst_13 = arith.constant 0.000000e+00 : f32
    %15 = vector.broadcast %cst_13 : f32 to vector<16x256xf32>
    %c0_i32 = arith.constant 0 : i32
    %c8_i32 = arith.constant 8 : i32
    %16 = arith.addi %c0_i32, %c8_i32 : i32
    %c1_i32 = arith.constant 1 : i32
    %17 = scf.for %arg8 = %c0_i32 to %16 step %c1_i32 iter_args(%arg9 = %15) -> (vector<16x256xf32>)  : i32 {
      %26 = arith.truncf %arg9 : vector<16x256xf32> to vector<16x256xbf16>
      %cst_20 = arith.constant dense<0.000000e+00> : vector<16x768xf32>
      %27 = tpu.matmul %26, %8, %cst_20 {dimension_numbers = #tpu.dot_dimension_numbers<[1], [0], [0], [1], [0, 0, 1, 1], [], []>} : vector<16x256xbf16>, vector<256x768xbf16>, vector<16x768xf32> -> vector<16x768xf32>
      %c16_i32 = arith.constant 16 : i32
      %28 = arith.muli %arg8, %c16_i32 : i32
      %29 = tpu.assume_multiple %28, 16 : i32
      %c7_i32 = arith.constant 7 : i32
      %30 = arith.subi %c7_i32, %arg8 : i32
      %c16_i32_21 = arith.constant 16 : i32
      %31 = arith.muli %30, %c16_i32_21 : i32
      %32 = tpu.assume_multiple %31, 16 : i32
      %33 = arith.index_cast %29 : i32 to index
      %c0_22 = arith.constant 0 : index
      %34 = vector.load %arg7[%33, %c0_22] : memref<128x768xf32, #tpu.memory_space<vmem>>, vector<16x384xf32>
      %35 = arith.index_cast %32 : i32 to index
      %c384 = arith.constant 384 : index
      %36 = vector.load %arg7[%35, %c384] : memref<128x768xf32, #tpu.memory_space<vmem>>, vector<16x384xf32>
      %37 = vector.extract_strided_slice %arg9 {offsets = [0, 0], sizes = [16, 128], strides = [1, 1]} : vector<16x256xf32> to vector<16x128xf32>
      %38 = vector.extract_strided_slice %arg9 {offsets = [0, 128], sizes = [16, 128], strides = [1, 1]} : vector<16x256xf32> to vector<16x128xf32>
      %39 = vector.extract_strided_slice %34 {offsets = [0, 0], sizes = [16, 128], strides = [1, 1]} : vector<16x384xf32> to vector<16x128xf32>
      %40 = vector.extract_strided_slice %27 {offsets = [0, 0], sizes = [16, 128], strides = [1, 1]} : vector<16x768xf32> to vector<16x128xf32>
      %41 = arith.addf %39, %40 : vector<16x128xf32>
      %42 = arith.negf %41 : vector<16x128xf32>
      %43 = math.exp %42 : vector<16x128xf32>
      %cst_23 = arith.constant 1.000000e+00 : f32
      %44 = vector.broadcast %cst_23 : f32 to vector<16x128xf32>
      %45 = arith.addf %44, %43 : vector<16x128xf32>
      %46 = arith.divf %44, %45 : vector<16x128xf32>
      %47 = vector.extract_strided_slice %34 {offsets = [0, 128], sizes = [16, 128], strides = [1, 1]} : vector<16x384xf32> to vector<16x128xf32>
      %48 = vector.extract_strided_slice %27 {offsets = [0, 128], sizes = [16, 128], strides = [1, 1]} : vector<16x768xf32> to vector<16x128xf32>
      %49 = arith.addf %47, %48 : vector<16x128xf32>
      %50 = arith.negf %49 : vector<16x128xf32>
      %51 = math.exp %50 : vector<16x128xf32>
      %cst_24 = arith.constant 1.000000e+00 : f32
      %52 = vector.broadcast %cst_24 : f32 to vector<16x128xf32>
      %53 = arith.addf %52, %51 : vector<16x128xf32>
      %54 = arith.divf %52, %53 : vector<16x128xf32>
      %55 = vector.extract_strided_slice %34 {offsets = [0, 256], sizes = [16, 128], strides = [1, 1]} : vector<16x384xf32> to vector<16x128xf32>
      %56 = vector.extract_strided_slice %27 {offsets = [0, 256], sizes = [16, 128], strides = [1, 1]} : vector<16x768xf32> to vector<16x128xf32>
      %57 = arith.addf %56, %11 : vector<16x128xf32>
      %58 = arith.mulf %46, %57 : vector<16x128xf32>
      %59 = arith.addf %55, %58 : vector<16x128xf32>
      %60 = math.tanh %59 : vector<16x128xf32>
      %cst_25 = arith.constant 1.000000e+00 : f32
      %61 = vector.broadcast %cst_25 : f32 to vector<16x128xf32>
      %62 = arith.subf %61, %54 : vector<16x128xf32>
      %63 = arith.mulf %62, %60 : vector<16x128xf32>
      %64 = arith.mulf %54, %37 : vector<16x128xf32>
      %65 = arith.addf %63, %64 : vector<16x128xf32>
      %66 = vector.extract_strided_slice %36 {offsets = [0, 0], sizes = [16, 128], strides = [1, 1]} : vector<16x384xf32> to vector<16x128xf32>
      %67 = vector.extract_strided_slice %27 {offsets = [0, 384], sizes = [16, 128], strides = [1, 1]} : vector<16x768xf32> to vector<16x128xf32>
      %68 = arith.addf %66, %67 : vector<16x128xf32>
      %69 = arith.negf %68 : vector<16x128xf32>
      %70 = math.exp %69 : vector<16x128xf32>
      %cst_26 = arith.constant 1.000000e+00 : f32
      %71 = vector.broadcast %cst_26 : f32 to vector<16x128xf32>
      %72 = arith.addf %71, %70 : vector<16x128xf32>
      %73 = arith.divf %71, %72 : vector<16x128xf32>
      %74 = vector.extract_strided_slice %36 {offsets = [0, 128], sizes = [16, 128], strides = [1, 1]} : vector<16x384xf32> to vector<16x128xf32>
      %75 = vector.extract_strided_slice %27 {offsets = [0, 512], sizes = [16, 128], strides = [1, 1]} : vector<16x768xf32> to vector<16x128xf32>
      %76 = arith.addf %74, %75 : vector<16x128xf32>
      %77 = arith.negf %76 : vector<16x128xf32>
      %78 = math.exp %77 : vector<16x128xf32>
      %cst_27 = arith.constant 1.000000e+00 : f32
      %79 = vector.broadcast %cst_27 : f32 to vector<16x128xf32>
      %80 = arith.addf %79, %78 : vector<16x128xf32>
      %81 = arith.divf %79, %80 : vector<16x128xf32>
      %82 = vector.extract_strided_slice %36 {offsets = [0, 256], sizes = [16, 128], strides = [1, 1]} : vector<16x384xf32> to vector<16x128xf32>
      %83 = vector.extract_strided_slice %27 {offsets = [0, 640], sizes = [16, 128], strides = [1, 1]} : vector<16x768xf32> to vector<16x128xf32>
      %84 = arith.addf %83, %14 : vector<16x128xf32>
      %85 = arith.mulf %73, %84 : vector<16x128xf32>
      %86 = arith.addf %82, %85 : vector<16x128xf32>
      %87 = math.tanh %86 : vector<16x128xf32>
      %cst_28 = arith.constant 1.000000e+00 : f32
      %88 = vector.broadcast %cst_28 : f32 to vector<16x128xf32>
      %89 = arith.subf %88, %81 : vector<16x128xf32>
      %90 = arith.mulf %89, %87 : vector<16x128xf32>
      %91 = arith.mulf %81, %38 : vector<16x128xf32>
      %92 = arith.addf %90, %91 : vector<16x128xf32>
      %93 = tpu.concatenate %65, %92 in 1 : vector<16x128xf32>, vector<16x128xf32> -> vector<16x256xf32>
      scf.yield %93 : vector<16x256xf32>
    }
    %c8_i32_14 = arith.constant 8 : i32
    %18 = vector.extract_strided_slice %17 {offsets = [0, 0], sizes = [16, 128], strides = [1, 1]} : vector<16x256xf32> to vector<16x128xf32>
    %c0_15 = arith.constant 0 : index
    %c0_16 = arith.constant 0 : index
    %c0_17 = arith.constant 0 : index
    %19 = vector.load %arg6[%c0_15, %c0_16, %c0_17] : memref<2x16x128xf32, #tpu.memory_space<vmem>>, vector<1x16x128xf32>
    %20 = vector.shape_cast %19 : vector<1x16x128xf32> to vector<16x128xf32>
    %21 = vector.shape_cast %18 : vector<16x128xf32> to vector<1x16x128xf32>
    tpu.vector_store %arg6[%c0_15, %c0_16, %c0_17], %21 {strides = array<i32>} : memref<2x16x128xf32, #tpu.memory_space<vmem>>, vector<1x16x128xf32>,
    %22 = vector.extract_strided_slice %17 {offsets = [0, 128], sizes = [16, 128], strides = [1, 1]} : vector<16x256xf32> to vector<16x128xf32>
    %c1 = arith.constant 1 : index
    %c0_18 = arith.constant 0 : index
    %c0_19 = arith.constant 0 : index
    %23 = vector.load %arg6[%c1, %c0_18, %c0_19] : memref<2x16x128xf32, #tpu.memory_space<vmem>>, vector<1x16x128xf32>
    %24 = vector.shape_cast %23 : vector<1x16x128xf32> to vector<16x128xf32>
    %25 = vector.shape_cast %22 : vector<16x128xf32> to vector<1x16x128xf32>
    tpu.vector_store %arg6[%c1, %c0_18, %c0_19], %25 {strides = array<i32>} : memref<2x16x128xf32, #tpu.memory_space<vmem>>, vector<1x16x128xf32>,
    return
  }
  func.func @transform_0(%arg0: i32) -> (i32, i32, i32) {
    %c0_i32 = arith.constant 0 : i32
    %c0_i32_0 = arith.constant 0 : i32
    %c0_i32_1 = arith.constant 0 : i32
    return %c0_i32, %arg0, %c0_i32_0 : i32, i32, i32
  }
  func.func @transform_1(%arg0: i32) -> (i32, i32) {
    %c0_i32 = arith.constant 0 : i32
    %c0_i32_0 = arith.constant 0 : i32
    %c0_i32_1 = arith.constant 0 : i32
    return %c0_i32, %c0_i32_0 : i32, i32
  }
  func.func @transform_2(%arg0: i32) -> (i32, i32) {
    %c0_i32 = arith.constant 0 : i32
    %c0_i32_0 = arith.constant 0 : i32
    %c0_i32_1 = arith.constant 0 : i32
    return %c0_i32, %c0_i32_0 : i32, i32
  }
  func.func @transform_3(%arg0: i32) -> (i32, i32) {
    %c0_i32 = arith.constant 0 : i32
    %c0_i32_0 = arith.constant 0 : i32
    %c0_i32_1 = arith.constant 0 : i32
    return %c0_i32, %c0_i32_0 : i32, i32
  }
  func.func @transform_4(%arg0: i32) -> (i32, i32) {
    %c0_i32 = arith.constant 0 : i32
    %c0_i32_0 = arith.constant 0 : i32
    %c0_i32_1 = arith.constant 0 : i32
    return %c0_i32, %c0_i32_0 : i32, i32
  }
  func.func @transform_5(%arg0: i32) -> (i32, i32, i32) {
    %c0_i32 = arith.constant 0 : i32
    %c0_i32_0 = arith.constant 0 : i32
    %c0_i32_1 = arith.constant 0 : i32
    return %c0_i32, %arg0, %c0_i32_0 : i32, i32, i32
  }
}

module attributes {stable_mosaic.version = 11 : i64} {
  func.func @score_kernel(%arg0: i32, %arg1: memref<1x32x2xf32, #tpu.memory_space<vmem>>, %arg2: memref<32x2xf32, #tpu.memory_space<vmem>>, %arg3: memref<32x2xf32, #tpu.memory_space<vmem>>, %arg4: memref<32x32xf32, #tpu.memory_space<vmem>>, %arg5: memref<32x32xf32, #tpu.memory_space<vmem>>, %arg6: memref<32x32xf32, #tpu.memory_space<vmem>>, %arg7: memref<32x32xf32, #tpu.memory_space<vmem>>, %arg8: memref<32x1xf32, #tpu.memory_space<vmem>>, %arg9: memref<1x32xf32, #tpu.memory_space<vmem>>, %arg10: memref<1x1xf32, #tpu.memory_space<vmem>>, %arg11: memref<1x1x2xf32, #tpu.memory_space<vmem>>) attributes {dimension_semantics = [#tpu.dimension_semantics<parallel>], iteration_bounds = array<i64: 3>, scalar_prefetch = 0 : i64, scratch_operands = 0 : i64, tpu.core_type = #tpu.core_type<tc>, window_params = [{transform_indices = @transform_0, window_bounds = array<i64: 1, 32, 2>}, {pipeline_mode = #tpu.pipeline_mode<synchronous>, transform_indices = @transform_1, window_bounds = array<i64: 32, 2>}, {pipeline_mode = #tpu.pipeline_mode<synchronous>, transform_indices = @transform_2, window_bounds = array<i64: 32, 2>}, {pipeline_mode = #tpu.pipeline_mode<synchronous>, transform_indices = @transform_3, window_bounds = array<i64: 32, 32>}, {pipeline_mode = #tpu.pipeline_mode<synchronous>, transform_indices = @transform_4, window_bounds = array<i64: 32, 32>}, {pipeline_mode = #tpu.pipeline_mode<synchronous>, transform_indices = @transform_5, window_bounds = array<i64: 32, 32>}, {pipeline_mode = #tpu.pipeline_mode<synchronous>, transform_indices = @transform_6, window_bounds = array<i64: 32, 32>}, {pipeline_mode = #tpu.pipeline_mode<synchronous>, transform_indices = @transform_7, window_bounds = array<i64: 32, 1>}, {pipeline_mode = #tpu.pipeline_mode<synchronous>, transform_indices = @transform_8, window_bounds = array<i64: 1, 32>}, {pipeline_mode = #tpu.pipeline_mode<synchronous>, transform_indices = @transform_9, window_bounds = array<i64: 1, 1>}, {transform_indices = @transform_10, window_bounds = array<i64: 1, 1, 2>}]} {
    %c0 = arith.constant 0 : index
    %c0_0 = arith.constant 0 : index
    %c0_1 = arith.constant 0 : index
    %0 = vector.load %arg1[%c0, %c0_0, %c0_1] : memref<1x32x2xf32, #tpu.memory_space<vmem>>, vector<1x32x2xf32>
    %1 = vector.shape_cast %0 : vector<1x32x2xf32> to vector<32x2xf32>
    %c0_2 = arith.constant 0 : index
    %c0_3 = arith.constant 0 : index
    %2 = vector.load %arg2[%c0_2, %c0_3] : memref<32x2xf32, #tpu.memory_space<vmem>>, vector<32x2xf32>
    %c0_4 = arith.constant 0 : index
    %c0_5 = arith.constant 0 : index
    %3 = vector.load %arg4[%c0_4, %c0_5] : memref<32x32xf32, #tpu.memory_space<vmem>>, vector<32x32xf32>
    %cst = arith.constant dense<0.000000e+00> : vector<32x2xf32>
    %4 = tpu.matmul %3, %1, %cst {dimension_numbers = #tpu.dot_dimension_numbers<[1], [0], [0], [1], [0, 0, 1, 1], [], []>} : vector<32x32xf32>, vector<32x2xf32>, vector<32x2xf32> -> vector<32x2xf32>
    %c0_6 = arith.constant 0 : index
    %c0_7 = arith.constant 0 : index
    %5 = vector.load %arg6[%c0_6, %c0_7] : memref<32x32xf32, #tpu.memory_space<vmem>>, vector<32x32xf32>
    %6 = arith.mulf %1, %2 : vector<32x2xf32>
    %cst_8 = arith.constant dense<0.000000e+00> : vector<32x2xf32>
    %7 = tpu.matmul %5, %6, %cst_8 {dimension_numbers = #tpu.dot_dimension_numbers<[1], [0], [0], [1], [0, 0, 1, 1], [], []>} : vector<32x32xf32>, vector<32x2xf32>, vector<32x2xf32> -> vector<32x2xf32>
    %8 = arith.addf %4, %7 : vector<32x2xf32>
    %c0_9 = arith.constant 0 : index
    %c0_10 = arith.constant 0 : index
    %9 = vector.load %arg5[%c0_9, %c0_10] : memref<32x32xf32, #tpu.memory_space<vmem>>, vector<32x32xf32>
    %cst_11 = arith.constant dense<0.000000e+00> : vector<32x2xf32>
    %10 = tpu.matmul %9, %2, %cst_11 {dimension_numbers = #tpu.dot_dimension_numbers<[1], [0], [0], [1], [0, 0, 1, 1], [], []>} : vector<32x32xf32>, vector<32x2xf32>, vector<32x2xf32> -> vector<32x2xf32>
    %11 = arith.addf %8, %10 : vector<32x2xf32>
    %c0_12 = arith.constant 0 : index
    %c0_13 = arith.constant 0 : index
    %12 = vector.load %arg7[%c0_12, %c0_13] : memref<32x32xf32, #tpu.memory_space<vmem>>, vector<32x32xf32>
    %c0_14 = arith.constant 0 : index
    %c0_15 = arith.constant 0 : index
    %13 = vector.load %arg3[%c0_14, %c0_15] : memref<32x2xf32, #tpu.memory_space<vmem>>, vector<32x2xf32>
    %cst_16 = arith.constant dense<0.000000e+00> : vector<32x2xf32>
    %14 = tpu.matmul %12, %13, %cst_16 {dimension_numbers = #tpu.dot_dimension_numbers<[1], [0], [0], [1], [0, 0, 1, 1], [], []>} : vector<32x32xf32>, vector<32x2xf32>, vector<32x2xf32> -> vector<32x2xf32>
    %15 = arith.addf %11, %14 : vector<32x2xf32>
    %c0_17 = arith.constant 0 : index
    %c0_18 = arith.constant 0 : index
    %16 = vector.load %arg8[%c0_17, %c0_18] : memref<32x1xf32, #tpu.memory_space<vmem>>, vector<32x1xf32>
    %17 = vector.broadcast %16 : vector<32x1xf32> to vector<32x2xf32>
    %18 = arith.addf %15, %17 : vector<32x2xf32>
    %cst_19 = arith.constant 0.000000e+00 : f32
    %19 = vector.broadcast %cst_19 : f32 to vector<32x2xf32>
    %20 = arith.maximumf %18, %19 : vector<32x2xf32>
    %c0_20 = arith.constant 0 : index
    %c0_21 = arith.constant 0 : index
    %21 = vector.load %arg9[%c0_20, %c0_21] : memref<1x32xf32, #tpu.memory_space<vmem>>, vector<1x32xf32>
    %cst_22 = arith.constant dense<0.000000e+00> : vector<1x2xf32>
    %22 = tpu.matmul %21, %20, %cst_22 {dimension_numbers = #tpu.dot_dimension_numbers<[1], [0], [0], [1], [0, 0, 1, 1], [], []>} : vector<1x32xf32>, vector<32x2xf32>, vector<1x2xf32> -> vector<1x2xf32>
    %c0_23 = arith.constant 0 : index
    %c0_24 = arith.constant 0 : index
    %23 = vector.load %arg10[%c0_23, %c0_24] : memref<1x1xf32, #tpu.memory_space<vmem>>, vector<1x1xf32>
    %24 = vector.broadcast %23 : vector<1x1xf32> to vector<1x2xf32>
    %25 = arith.addf %22, %24 : vector<1x2xf32>
    %26 = arith.negf %25 : vector<1x2xf32>
    %27 = math.exp %26 : vector<1x2xf32>
    %cst_25 = arith.constant 1.000000e+00 : f32
    %28 = vector.broadcast %cst_25 : f32 to vector<1x2xf32>
    %29 = arith.addf %28, %27 : vector<1x2xf32>
    %30 = arith.divf %28, %29 : vector<1x2xf32>
    %c0_26 = arith.constant 0 : index
    %c0_27 = arith.constant 0 : index
    %c0_28 = arith.constant 0 : index
    %31 = vector.load %arg11[%c0_26, %c0_27, %c0_28] : memref<1x1x2xf32, #tpu.memory_space<vmem>>, vector<1x1x2xf32>
    %32 = vector.shape_cast %31 : vector<1x1x2xf32> to vector<1x2xf32>
    %33 = vector.shape_cast %30 : vector<1x2xf32> to vector<1x1x2xf32>
    tpu.vector_store %arg11[%c0_26, %c0_27, %c0_28], %33 {strides = array<i32>} : memref<1x1x2xf32, #tpu.memory_space<vmem>>, vector<1x1x2xf32>,
    return
  }
  func.func @transform_0(%arg0: i32) -> (i32, i32, i32) {
    %c0_i32 = arith.constant 0 : i32
    %c0_i32_0 = arith.constant 0 : i32
    %c0_i32_1 = arith.constant 0 : i32
    return %arg0, %c0_i32, %c0_i32_0 : i32, i32, i32
  }
  func.func @transform_1(%arg0: i32) -> (i32, i32) {
    %c0_i32 = arith.constant 0 : i32
    %c0_i32_0 = arith.constant 0 : i32
    %c0_i32_1 = arith.constant 0 : i32
    return %c0_i32, %c0_i32_0 : i32, i32
  }
  func.func @transform_2(%arg0: i32) -> (i32, i32) {
    %c0_i32 = arith.constant 0 : i32
    %c0_i32_0 = arith.constant 0 : i32
    %c0_i32_1 = arith.constant 0 : i32
    return %c0_i32, %c0_i32_0 : i32, i32
  }
  func.func @transform_3(%arg0: i32) -> (i32, i32) {
    %c0_i32 = arith.constant 0 : i32
    %c0_i32_0 = arith.constant 0 : i32
    %c0_i32_1 = arith.constant 0 : i32
    return %c0_i32, %c0_i32_0 : i32, i32
  }
  func.func @transform_4(%arg0: i32) -> (i32, i32) {
    %c0_i32 = arith.constant 0 : i32
    %c0_i32_0 = arith.constant 0 : i32
    %c0_i32_1 = arith.constant 0 : i32
    return %c0_i32, %c0_i32_0 : i32, i32
  }
  func.func @transform_5(%arg0: i32) -> (i32, i32) {
    %c0_i32 = arith.constant 0 : i32
    %c0_i32_0 = arith.constant 0 : i32
    %c0_i32_1 = arith.constant 0 : i32
    return %c0_i32, %c0_i32_0 : i32, i32
  }
  func.func @transform_6(%arg0: i32) -> (i32, i32) {
    %c0_i32 = arith.constant 0 : i32
    %c0_i32_0 = arith.constant 0 : i32
    %c0_i32_1 = arith.constant 0 : i32
    return %c0_i32, %c0_i32_0 : i32, i32
  }
  func.func @transform_7(%arg0: i32) -> (i32, i32) {
    %c0_i32 = arith.constant 0 : i32
    %c0_i32_0 = arith.constant 0 : i32
    %c0_i32_1 = arith.constant 0 : i32
    return %c0_i32, %c0_i32_0 : i32, i32
  }
  func.func @transform_8(%arg0: i32) -> (i32, i32) {
    %c0_i32 = arith.constant 0 : i32
    %c0_i32_0 = arith.constant 0 : i32
    %c0_i32_1 = arith.constant 0 : i32
    return %c0_i32, %c0_i32_0 : i32, i32
  }
  func.func @transform_9(%arg0: i32) -> (i32, i32) {
    %c0_i32 = arith.constant 0 : i32
    %c0_i32_0 = arith.constant 0 : i32
    %c0_i32_1 = arith.constant 0 : i32
    return %c0_i32, %c0_i32_0 : i32, i32
  }
  func.func @transform_10(%arg0: i32) -> (i32, i32, i32) {
    %c0_i32 = arith.constant 0 : i32
    %c0_i32_0 = arith.constant 0 : i32
    %c0_i32_1 = arith.constant 0 : i32
    return %arg0, %c0_i32, %c0_i32_0 : i32, i32, i32
  }
}

</mosaic_0001>

<bundles_post_ra>
// kernel: mil_answer_trigger_forward.5
= control target key start
LH: loop header
LB: loop body
LE: loop exit
PB: predicated region body
PF: predicated region fallthrough
CT: control target
= control target key end

     0   :  { %s1176_s15 = smov 0   ;;  %s1301_s0 = inlined_call_operand.vmem [shape: f32[3,32,2], index: 0, kind: input, shape index: {}]   ;;  %s1302_s1 = inlined_call_operand.vmem [shape: f32[32,2], index: 1, kind: input, shape index: {}]   ;;  %s1303_s2 = inlined_call_operand.vmem [shape: f32[32,2], index: 2, kind: input, shape index: {}]   ;;  %s1304_s3 = inlined_call_operand.vmem [shape: f32[32,32], index: 3, kind: input, shape index: {}]   ;;  %s1305_s4 = inlined_call_operand.vmem [shape: f32[32,32], index: 4, kind: input, shape index: {}]   ;;  %s1306_s5 = inlined_call_operand.vmem [shape: f32[32,32], index: 5, kind: input, shape index: {}]   ;;  %s1307_s6 = inlined_call_operand.vmem [shape: f32[32,32], index: 6, kind: input, shape index: {}]   ;;  %s1308_s7 = inlined_call_operand.vmem [shape: f32[32,1], index: 7, kind: input, shape index: {}]   ;;  %s1309_s8 = inlined_call_operand.vmem [shape: f32[1,32], index: 8, kind: input, shape index: {}]   ;;  %s1310_s9 = inlined_call_operand.<no memory space> [shape: f32[1,1], index: 9, kind: input, shape index: {}]   ;;  %s1311_s10 = inlined_call_operand.vmem [shape: f32[3,1,2], index: 10, kind: output, shape index: {}]  }
   0x1   :  { %v15_v0 = vstv %s1310_s9 }
   0x2   :  { %16 = vst [vmem:[#allocation2] sm:$0x1] %v15_v0 }
   0x3 LB: > { %s958_s16 = sadd.s32 4294967295, %s1113_s15   ;;  %p962_p0 = scmp.ge.s32.totalorder %s1113_s15, 1  ;;  %s1113_s15 = sphi %s1176_s15, %s22_s15  }
   0x4   : > { %p314_p1 = scmp.lt.s32.totalorder %s1113_s15, 4 }
   0x6   : > { %p315_p2 = pnand %p962_p0, %p314_p1 }
   0x7   : > { %p350_p3 = scmp.lt.s32.totalorder (!%p315_p2), %s958_s16, 2 }
   0x8   : > { %318 = sbr.rel (%p315_p2) target bundleno = 478 (0x1de), region = 60 }
   0xd   : > { %vm378_vm0 = vcmask 261120   ;;  %v370_v1 = vld [vmem:[%s1306_s5] sm:$0xff]  ;;  %v1115_v3 = vmov 0   ;;  %s1313_s16 = smov (!%p350_p3, %s958_s16), 2  ;;  %v365_v4 = vld [vmem:[%s1302_s1 + $0x18] sm:$0xff]  ;;  %v364_v5 = vld [vmem:[%s1302_s1 + $0x10] sm:$0xff] }
   0xe   : > { %v366_v2 = vld [vmem:[%s1304_s3] sm:$0xff]  ;;  %1101 = vset.pattern.permute.xlu0 %v1115_v3  ;;  %1102 = vset.pattern.permute.xlu1 %v1115_v3  ;;  %s985_s20 = sshll.u32 %s1313_s16, 5  ;;  %v363_v6 = vld [vmem:[%s1302_s1 + $0x8] sm:$0xff]  ;;  %v685_v17 = vld [vmem:[%s1303_s2 + $0x18] sm:$0xff]  ;;  %v1116_v39 = vmov 0.0   ;;  %vm1117_vm1 = vmmov 0   ;;  %s357_s23 = scalar_lea.vmem %s1311_s10, %s1313_s16 }
   0xf   : > { %1031 = vmatprep.mubr.msk.f32.mxu0 %vm378_vm0, %v370_v1  ;;  %1045 = vmatprep.mubr.msk.f32.mxu1 %vm378_vm0, %v366_v2  ;;  %s354_s27 = scalar_lea.vmem %s1301_s0, %s985_s20  ;;  %v362_v13 = vld [vmem:[%s1302_s1] sm:$0xff]  ;;  %v367_v16 = vld [vmem:[%s1304_s3 + $0x8] sm:$0xff]  ;;  %v684_v19 = vld [vmem:[%s1303_s2 + $0x10] sm:$0xff]  ;;  %vm909_vm2 = vcmask 8192  }
  0x10   : > { %v361_v7 = vld [vmem:[%s354_s27 + $0x18] sm:$0xff]  ;;  %v360_v8 = vld [vmem:[%s354_s27 + $0x10] sm:$0xff]  ;;  %v359_v9 = vld [vmem:[%s354_s27 + $0x8] sm:$0xff] }
  0x11   : > { %v377_v10 = vmul.f32 %v365_v4, %v361_v7  ;;  %1037 = vmatprep.subr.mxu1 %v361_v7  ;;  %v376_v11 = vmul.f32 %v364_v5, %v360_v8  ;;  %v358_v12 = vld [vmem:[%s354_s27] sm:$0xff]  ;;  %v375_v14 = vmul.f32 %v363_v6, %v359_v9  ;;  %v371_v18 = vld [vmem:[%s1306_s5 + $0x8] sm:$0xff]  ;;  %v372_v20 = vld [vmem:[%s1306_s5 + $0x10] sm:$0xff] }
  0x12   : > { %1038 = vmatpush3.msra.mxu1 %v361_v7  ;;  %v374_v15 = vmul.f32 %v362_v13, %v358_v12  ;;  %v368_v21 = vld [vmem:[%s1304_s3 + $0x10] sm:$0xff]  ;;  %v373_v22 = vld [vmem:[%s1306_s5 + $0x18] sm:$0xff]  ;;  %v683_v24 = vld [vmem:[%s1303_s2 + $0x8] sm:$0xff] }
  0x13   : > { %1023 = vmatprep.subr.mxu0 %v377_v10  ;;  %1039 = vmatprep.subr.mxu1 %v360_v8  ;;  %v369_v23 = vld [vmem:[%s1304_s3 + $0x18] sm:$0xff]  ;;  %v682_v25 = vld [vmem:[%s1303_s2] sm:$0xff]  ;;  %v574_v28 = vld [vmem:[%s1305_s4 + $0x8] sm:$0xff] }
  0x14   : > { %1024 = vmatpush3.msra.mxu0 %v377_v10  ;;  %1040 = vmatpush3.msra.mxu1 %v360_v8  ;;  %v573_v26 = vld [vmem:[%s1305_s4] sm:$0xff]  ;;  %v679_v29 = vld [vmem:[%s1307_s6 + $0x8] sm:$0xff]  ;;  %v575_v30 = vld [vmem:[%s1305_s4 + $0x10] sm:$0xff] }
  0x15   : > { %1025 = vmatprep.subr.mxu0 %v376_v11  ;;  %1041 = vmatprep.subr.mxu1 %v359_v9  ;;  %v678_v27 = vld [vmem:[%s1307_s6] sm:$0xff]  ;;  %v680_v31 = vld [vmem:[%s1307_s6 + $0x10] sm:$0xff]  ;;  %v790_v32 = vld [vmem:[%s1308_s7 + $0x18] sm:$0xff] }
  0x16   : > { %1026 = vmatpush3.msra.mxu0 %v376_v11  ;;  %1042 = vmatpush3.msra.mxu1 %v359_v9  ;;  %v788_v33 = vld [vmem:[%s1308_s7 + $0x8] sm:$0xff]  ;;  %v576_v34 = vld [vmem:[%s1305_s4 + $0x18] sm:$0xff]  ;;  %v789_v36 = vld [vmem:[%s1308_s7 + $0x10] sm:$0xff] }
  0x17   : > { %1027 = vmatprep.subr.mxu0 %v375_v14  ;;  %1043 = vmatprep.subr.mxu1 %v358_v12  ;;  %v681_v35 = vld [vmem:[%s1307_s6 + $0x18] sm:$0xff]  ;;  %v787_v37 = vld [vmem:[%s1308_s7] sm:$0xff] }
  0x18   : > { %1028 = vmatpush3.msra.mxu0 %v375_v14  ;;  %1044 = vmatpush3.msra.mxu1 %v358_v12  ;;  %v820_v38 = vld [vmem:[#allocation2] sm:$0x1] }
  0x19   : > { %1029 = vmatprep.subr.mxu0 %v374_v15  ;;  %1046 = vmatmul.mubr.msk.f32.vlgmr.msra.gmra.mxu1 %vm378_vm0, %v367_v16  ;;  %v819_v16 = vld [vmem:[%s1309_s8] sm:$0x1] }
  0x1a   : > { %1030 = vmatpush3.msra.mxu0 %v374_v15  ;;  %1065 = vmatprep.subr.mxu1 %v685_v17 }
  0x1b   : > { %1032 = vmatmul.mubr.msk.f32.vlgmr.msra.gmra.mxu0 %vm378_vm0, %v371_v18  ;;  %1051 = vmatprep.subr.mxu0 %v365_v4 }
  0x1c   : > { %1052 = vmatpush3.msra.mxu0 %v365_v4  ;;  %1066 = vmatpush3.msra.mxu1 %v685_v17  ;;  %v826_v17 = vlaneseq }
  0x1d   : > { %1053 = vmatprep.subr.mxu0 %v364_v5  ;;  %1067 = vmatprep.subr.mxu1 %v684_v19 }
  0x1e   : > { %1034 = vmatprep.mubr.msk.f32.mxu0 %vm378_vm0, %v372_v20  ;;  %1048 = vmatprep.mubr.msk.f32.mxu1 %vm378_vm0, %v368_v21  ;;  %v827_v18 = vshrl.u32 %v826_v17, 7 }
  0x1f   : > { %1054 = vmatpush3.msra.mxu0 %v364_v5  ;;  %1068 = vmatpush3.msra.mxu1 %v684_v19 }
  0x20   : > { %1035 = vmatmul.mubr.msk.f32.gmra.mxu0 %vm378_vm0, %v373_v22  ;;  %1049 = vmatmul.mubr.msk.f32.gmra.mxu1 %vm378_vm0, %v369_v23  ;;  %v828_v19 = vsub.s32 0, %v827_v18 }
  0x21   : > { %1055 = vmatprep.subr.mxu0 %v363_v6  ;;  %1069 = vmatprep.subr.mxu1 %v683_v24 }
  0x22   : > { %1056 = vmatpush3.msra.mxu0 %v363_v6  ;;  %1070 = vmatpush3.msra.mxu1 %v683_v24 }
  0x23   : > { %1057 = vmatprep.subr.mxu0 %v362_v13  ;;  %1071 = vmatprep.subr.mxu1 %v682_v25 }
  0x24   : > { %1058 = vmatpush3.msra.mxu0 %v362_v13  ;;  %1059 = vmatprep.mubr.msk.f32.mxu0 %vm378_vm0, %v573_v26 }
  0x25   : > { %1072 = vmatpush3.msra.mxu1 %v682_v25  ;;  %1073 = vmatprep.mubr.msk.f32.mxu1 %vm378_vm0, %v678_v27 }
  0x26   : > { %1060 = vmatmul.mubr.msk.f32.vlgmr.msra.gmra.mxu0 %vm378_vm0, %v574_v28  ;;  %1074 = vmatmul.mubr.msk.f32.vlgmr.msra.gmra.mxu1 %vm378_vm0, %v679_v29 }
  0x27   : > { %1062 = vmatprep.mubr.msk.f32.mxu0 %vm378_vm0, %v575_v30  ;;  %1076 = vmatprep.mubr.msk.f32.mxu1 %vm378_vm0, %v680_v31 }
  0x28   : > { %808 = vperm.xlu0 %1101, %v790_v32   ;;  %798 = vperm.xlu1 %1102, %v788_v33  }
  0x29   : > { %1079 = vmatprep.subr.mxu0 %v1116_v39 }
  0x2a   : > { %1063 = vmatmul.mubr.msk.f32.gmra.mxu0 %vm378_vm0, %v576_v34  ;;  %1077 = vmatmul.mubr.msk.f32.gmra.mxu1 %vm378_vm0, %v681_v35 }
  0x2b   : > { %1087 = vmatprep.mubr.msk.f32.mxu0 %vm1117_vm1, %v1116_v39 }
  0x2c   : > { %803 = vperm.xlu0 %1101, %v789_v36   ;;  %793 = vperm.xlu1 %1102, %v787_v37  }
  0x30   : > { %823 = vperm.xlu0 %1101, %v820_v38  }
  0xa3   : > { %v809_v55 = vpop.permute.xlu0 %808  ;;  %v799_v57 = vpop.permute.xlu1 %798 }
  0xa7   : > { %v804_v7 = vpop.permute.xlu0 %803  ;;  %v794_v8 = vpop.permute.xlu1 %793 }
  0xab   : > { %v824_v20 = vpop.permute.xlu0 %823 }
  0xac   : > { %v829_v21 = vrot.slane %v824_v20, %v828_v19 }
  0xd9   : > { %v1047_v40 = vpop.f32.mrf.mxu1 }
  0xdb   : > { %v1033_v41 = vpop.f32.mrf.mxu0  ;;  %v554_v42 = vpop.f32.mrf.mxu1 }
  0xdc   : > { %v560_v50 = vadd.f32 %v1047_v40, %v1033_v41 }
  0xdd   : > { %v457_v43 = vpop.f32.mrf.mxu0 }
  0xde   : > { %v555_v53 = vadd.f32 %v554_v42, %v457_v43 }
  0xe0   : > { %v1036_v44 = vpop.f32.mrf.mxu0  ;;  %v1050_v45 = vpop.f32.mrf.mxu1 }
  0xe1   : > { %v570_v54 = vadd.f32 %v1050_v45, %v1036_v44 }
  0xe2   : > { %v467_v46 = vpop.f32.mrf.mxu0  ;;  %v564_v47 = vpop.f32.mrf.mxu1 }
  0xe3   : > { %v565_v60 = vadd.f32 %v564_v47, %v467_v46 }
  0xe6   : > { %v1061_v48 = vpop.f32.mrf.mxu0  ;;  %v1075_v49 = vpop.f32.mrf.mxu1 }
  0xe7   : > { %v675_v56 = vadd.f32 %v1061_v48, %v560_v50 }
  0xe8   : > { %v655_v51 = vpop.f32.mrf.mxu0  ;;  %v764_v52 = vpop.f32.mrf.mxu1 }
  0xe9   : > { %v674_v61 = vadd.f32 %v655_v51, %v555_v53  ;;  %v784_v0 = vadd.f32 %v1075_v49, %v675_v56 }
  0xea   : > { %v1064_v58 = vpop.f32.mrf.mxu0  ;;  %v1078_v59 = vpop.f32.mrf.mxu1 }
  0xeb   : > { %v677_v62 = vadd.f32 %v1064_v58, %v570_v54  ;;  %v783_v4 = vadd.f32 %v764_v52, %v674_v61  ;;  %v812_v9 = vadd.f32 %v799_v57, %v784_v0 }
  0xec   : > { %v665_v63 = vpop.f32.mrf.mxu0  ;;  %v774_v3 = vpop.f32.mrf.mxu1 }
  0xed   : > { %v786_v1 = vadd.f32 %v1078_v59, %v677_v62  ;;  %v676_v2 = vadd.f32 %v665_v63, %v565_v60  ;;  %v811_v12 = vadd.f32 %v794_v8, %v783_v4  ;;  %v816_v14 = vmax.f32 %v812_v9, 0.0 }
  0xef   : > { %v814_v5 = vadd.f32 %v809_v55, %v786_v1  ;;  %v785_v6 = vadd.f32 %v774_v3, %v676_v2  ;;  %v815_v15 = vmax.f32 %v811_v12, 0.0 }
  0xf1   : > { %v818_v10 = vmax.f32 %v814_v5, 0.0  ;;  %v813_v11 = vadd.f32 %v804_v7, %v785_v6 }
  0xf3   : > { %v817_v13 = vmax.f32 %v813_v11, 0.0  ;;  %1080 = vmatpush3.msra.mxu0 %v818_v10 }
  0xf4   : > { %1081 = vmatprep.subr.mxu0 %v1116_v39 }
  0xf5   : > { %1082 = vmatpush3.msra.mxu0 %v817_v13 }
  0xf6   : > { %1083 = vmatprep.subr.mxu0 %v1116_v39 }
  0xf7   : > { %1084 = vmatpush3.msra.mxu0 %v816_v14 }
  0xf8   : > { %1085 = vmatprep.subr.mxu0 %v1116_v39 }
  0xf9   : > { %1086 = vmatpush3.msra.mxu0 %v815_v15 }
  0xfa   : > { %1088 = vmatmul.mubr.msk.f32.vlgmr.msra.gmra.mxu0 %vm378_vm0, %v819_v16 }
 0x1ba   : > { %v899_v22 = vpop.f32.mrf.mxu0 }
 0x1bb   : > { %v900_v23 = vadd.f32 %v899_v22, %v829_v21 }
 0x1bc   : > { %v1089_v24 = vpop.f32.mrf.mxu0 }
 0x1bd   : > { %v982_v25 = vmul.f32 -1.442695, %v900_v23 }
 0x1bf   : > { %1103 = vpow2.f32 %v982_v25 }
 0x1cc   : > { %v1104_v26 = vpop.eup %1103 }
 0x1cd   : > { %v906_v27 = vadd.f32 1.0, %v1104_v26 }
 0x1cf   : > { %1105 = vrcp.f32 %v906_v27 }
 0x1dc   : > { %v1106_v28 = vpop.eup %1105 }
 0x1dd   : > { %910 = vst.msk [vmem:[%s357_s23] sm:$0x1] %vm909_vm2, %v1106_v28 }
 0x1de PF: > { %s22_s15 = sadd.s32 1, %s1113_s15  }
 0x1df   : > { %p19_p4 = scmp.ge.s32.totalorder %s22_s15, 5  }
 0x1e1   :  { %21 = sbr.rel (!%p19_p4) target bundleno = 3 (0x3), region = 90 }

// kernel: mil_answer_trigger_forward.4
= control target key start
LH: loop header
LB: loop body
LE: loop exit
PB: predicated region body
PF: predicated region fallthrough
CT: control target
= control target key end

     0   :  { %10 = vsyncpa [#allocation4], 0  ;;  %s1811_s18 = smov [#allocation3]   ;;  %s2547_s0 = inlined_call_operand.vmem [shape: bf16[8,16,16], index: 0, kind: input, shape index: {}]   ;;  %s2548_s1 = inlined_call_operand.vmem [shape: bf16[16,768], index: 1, kind: input, shape index: {}]   ;;  %s2549_s2 = inlined_call_operand.hbm [shape: bf16[256,768], index: 2, kind: input, shape index: {}]   ;;  %s2550_s3 = inlined_call_operand.vmem [shape: f32[1,768], index: 3, kind: input, shape index: {}]   ;;  %s2551_s4 = inlined_call_operand.vmem [shape: f32[1,256], index: 4, kind: input, shape index: {}]   ;;  %s2552_s5 = inlined_call_operand.vmem [shape: f32[2,16,128], index: 5, kind: output, shape index: {}]  }
   0x1   :  { %s20_s19 = sshll.u32 %s1811_s18, 4  ;;  %s21_s19 = int_to_ptr.vmem [resolvable:$true] %s20_s19 }
   0x2   :  { %s1757_s20 = scalar_lea.vmem %s21_s19, 12288  ;;  %p1762_p1 = scmp.lt.s32.totalorder %s21_s19, %s21_s19 }
   0x3   :  { %p1758_p0 = scmp.ne.s32.totalorder %s21_s19, %s1757_s20  ;;  %p1763_p2 = scmp.lt.s32.totalorder %s1757_s20, %s1757_s20 }
   0x5   :  { %p1764_p3 = por %p1763_p2, %p1762_p1 }
   0x7   :  { %p1765_p4 = pnand %p1764_p3, %p1758_p0 }
   0x9   :  { %1768 = shalt.err (!%p1765_p4)
}
   0xa   :  { %s1812_s21 = smov 384   ;;  %s1813_s22 = smov 24  }
   0xb   :  { %26 = dma.hbm_to_vmem [thread:$0]  %s2549_s2, 12288, %s21_s19, [#allocation4], %s1812_s21, %s1812_s21, %s1813_s22  }
   0xc   :  { %1789 = dma.done.wait [#allocation4], 12288  }
   0xd   :  { %1790 = vsyncadd [#allocation4], 4294955008  ;;  %v2553_v0 = vmov 0   ;;  %v1850_v1 = vld [vmem:[#allocation3] sm:$0xff]  ;;  %v1852_v2 = vld [vmem:[#allocation3 + $0x8] sm:$0xff]  ;;  %vm159_vm0 = vcmask 130048  }
   0xe   :  { %216 = vmatprep.mubr.bf16.mxu0 %v2553_v0  ;;  %256 = vmatprep.mubr.bf16.mxu1 %v2553_v0  ;;  %2667 = vst [vmem:[#allocation6_spill] sm:$0xff] %v1850_v1  ;;  %2668 = vst [vmem:[#allocation7_spill] sm:$0xff] %v1852_v2  ;;  %v1854_v3 = vld [vmem:[#allocation3 + $0x10] sm:$0xff]  ;;  %v1856_v4 = vld [vmem:[#allocation3 + $0x18] sm:$0xff] }
   0xf   :  { %2669 = vst [vmem:[#allocation8_spill] sm:$0xff] %v1854_v3  ;;  %2670 = vst [vmem:[#allocation9_spill] sm:$0xff] %v1856_v4  ;;  %v1858_v5 = vld [vmem:[#allocation3 + $0x20] sm:$0xff]  ;;  %v1860_v6 = vld [vmem:[#allocation3 + $0x28] sm:$0xff] }
  0x10   :  { %2671 = vst [vmem:[#allocation10_spill] sm:$0xff] %v1858_v5  ;;  %2672 = vst [vmem:[#allocation11_spill] sm:$0xff] %v1860_v6  ;;  %v1862_v7 = vld [vmem:[#allocation3 + $0x30] sm:$0xff]  ;;  %v1864_v8 = vld [vmem:[#allocation3 + $0x38] sm:$0xff] }
  0x11   :  { %2673 = vst [vmem:[#allocation12_spill] sm:$0xff] %v1862_v7  ;;  %2674 = vst [vmem:[#allocation13_spill] sm:$0xff] %v1864_v8  ;;  %v1866_v9 = vld [vmem:[#allocation3 + $0x40] sm:$0xff]  ;;  %v1868_v10 = vld [vmem:[#allocation3 + $0x48] sm:$0xff] }
  0x12   :  { %2675 = vst [vmem:[#allocation14_spill] sm:$0xff] %v1866_v9  ;;  %2676 = vst [vmem:[#allocation15_spill] sm:$0xff] %v1868_v10  ;;  %v1870_v11 = vld [vmem:[#allocation3 + $0x50] sm:$0xff]  ;;  %v1872_v12 = vld [vmem:[#allocation3 + $0x58] sm:$0xff] }
  0x13   :  { %2677 = vst [vmem:[#allocation16_spill] sm:$0xff] %v1870_v11  ;;  %2678 = vst [vmem:[#allocation17_spill] sm:$0xff] %v1872_v12  ;;  %v1874_v13 = vld [vmem:[#allocation3 + $0x60] sm:$0xff]  ;;  %v1876_v14 = vld [vmem:[#allocation3 + $0x68] sm:$0xff] }
  0x14   :  { %2679 = vst [vmem:[#allocation18_spill] sm:$0xff] %v1874_v13  ;;  %2680 = vst [vmem:[#allocation19_spill] sm:$0xff] %v1876_v14  ;;  %v1878_v15 = vld [vmem:[#allocation3 + $0x70] sm:$0xff]  ;;  %v1880_v16 = vld [vmem:[#allocation3 + $0x78] sm:$0xff] }
  0x15   :  { %2681 = vst [vmem:[#allocation20_spill] sm:$0xff] %v1878_v15  ;;  %2682 = vst [vmem:[#allocation21_spill] sm:$0xff] %v1880_v16  ;;  %v1882_v17 = vld [vmem:[#allocation3 + $0x80] sm:$0xff]  ;;  %v1884_v18 = vld [vmem:[#allocation3 + $0x88] sm:$0xff] }
  0x16   :  { %2683 = vst [vmem:[#allocation22_spill] sm:$0xff] %v1882_v17  ;;  %2684 = vst [vmem:[#allocation23_spill] sm:$0xff] %v1884_v18  ;;  %v1886_v19 = vld [vmem:[#allocation3 + $0x90] sm:$0xff]  ;;  %v1888_v20 = vld [vmem:[#allocation3 + $0x98] sm:$0xff] }
  0x17   :  { %2685 = vst [vmem:[#allocation24_spill] sm:$0xff] %v1886_v19  ;;  %2686 = vst [vmem:[#allocation25_spill] sm:$0xff] %v1888_v20  ;;  %v1890_v21 = vld [vmem:[#allocation3 + $0xa0] sm:$0xff]  ;;  %v1892_v22 = vld [vmem:[#allocation3 + $0xa8] sm:$0xff] }
  0x18   :  { %2687 = vst [vmem:[#allocation26_spill] sm:$0xff] %v1890_v21  ;;  %2688 = vst [vmem:[#allocation27_spill] sm:$0xff] %v1892_v22  ;;  %v1894_v23 = vld [vmem:[#allocation3 + $0xb0] sm:$0xff]  ;;  %v1896_v24 = vld [vmem:[#allocation3 + $0xb8] sm:$0xff] }
  0x19   :  { %2689 = vst [vmem:[#allocation28_spill] sm:$0xff] %v1894_v23  ;;  %2690 = vst [vmem:[#allocation29_spill] sm:$0xff] %v1896_v24  ;;  %v1898_v25 = vld [vmem:[#allocation3 + $0xc0] sm:$0xff]  ;;  %v1900_v26 = vld [vmem:[#allocation3 + $0xc8] sm:$0xff] }
  0x1a   :  { %v1902_v27 = vld [vmem:[#allocation3 + $0xd0] sm:$0xff]  ;;  %v1904_v28 = vld [vmem:[#allocation3 + $0xd8] sm:$0xff]  ;;  %v1906_v29 = vld [vmem:[#allocation3 + $0xe0] sm:$0xff] }
  0x1b   :  { %2691 = vst [vmem:[#allocation30_spill] sm:$0xff] %v1902_v27  ;;  %v1908_v30 = vld [vmem:[#allocation3 + $0xe8] sm:$0xff]  ;;  %v1910_v31 = vld [vmem:[#allocation3 + $0xf0] sm:$0xff]  ;;  %v1912_v32 = vld [vmem:[#allocation3 + $0xf8] sm:$0xff] }
  0x1c   :  { %2692 = vst [vmem:[#allocation31_spill] sm:$0xff] %v1908_v30  ;;  %v1914_v33 = vld [vmem:[#allocation3 + $0x100] sm:$0xff]  ;;  %v1916_v34 = vld [vmem:[#allocation3 + $0x108] sm:$0xff]  ;;  %v1918_v35 = vld [vmem:[#allocation3 + $0x110] sm:$0xff] }
  0x1d   :  { %2693 = vst [vmem:[#allocation32_spill] sm:$0xff] %v1914_v33  ;;  %v1920_v36 = vld [vmem:[#allocation3 + $0x118] sm:$0xff]  ;;  %v1922_v37 = vld [vmem:[#allocation3 + $0x120] sm:$0xff]  ;;  %v1924_v38 = vld [vmem:[#allocation3 + $0x128] sm:$0xff] }
  0x1e   :  { %2694 = vst [vmem:[#allocation33_spill] sm:$0xff] %v1920_v36  ;;  %v1926_v39 = vld [vmem:[#allocation3 + $0x130] sm:$0xff]  ;;  %v1928_v40 = vld [vmem:[#allocation3 + $0x138] sm:$0xff]  ;;  %v1930_v41 = vld [vmem:[#allocation3 + $0x140] sm:$0xff] }
  0x1f   :  { %2695 = vst [vmem:[#allocation34_spill] sm:$0xff] %v1926_v39  ;;  %v1932_v42 = vld [vmem:[#allocation3 + $0x148] sm:$0xff]  ;;  %v1934_v43 = vld [vmem:[#allocation3 + $0x150] sm:$0xff]  ;;  %v1936_v44 = vld [vmem:[#allocation3 + $0x158] sm:$0xff] }
  0x20   :  { %2696 = vst [vmem:[#allocation35_spill] sm:$0xff] %v1932_v42  ;;  %v1938_v45 = vld [vmem:[#allocation3 + $0x160] sm:$0xff]  ;;  %v1940_v46 = vld [vmem:[#allocation3 + $0x168] sm:$0xff]  ;;  %v1942_v47 = vld [vmem:[#allocation3 + $0x170] sm:$0xff] }
  0x21   :  { %2697 = vst [vmem:[#allocation36_spill] sm:$0xff] %v1938_v45  ;;  %v1944_v48 = vld [vmem:[#allocation3 + $0x178] sm:$0xff]  ;;  %v1946_v49 = vld [vmem:[#allocation3 + $0x180] sm:$0xff]  ;;  %v1948_v50 = vld [vmem:[#allocation3 + $0x188] sm:$0xff] }
  0x22   :  { %2698 = vst [vmem:[#allocation37_spill] sm:$0xff] %v1944_v48  ;;  %2699 = vst [vmem:[#allocation38_spill] sm:$0xff] %v1946_v49  ;;  %v1950_v51 = vld [vmem:[#allocation3 + $0x190] sm:$0xff]  ;;  %v1952_v52 = vld [vmem:[#allocation3 + $0x198] sm:$0xff] }
  0x23   :  { %2700 = vst [vmem:[#allocation39_spill] sm:$0xff] %v1948_v50  ;;  %2701 = vst [vmem:[#allocation40_spill] sm:$0xff] %v1950_v51  ;;  %v1954_v53 = vld [vmem:[#allocation3 + $0x1a0] sm:$0xff]  ;;  %v1956_v54 = vld [vmem:[#allocation3 + $0x1a8] sm:$0xff] }
  0x24   :  { %2702 = vst [vmem:[#allocation41_spill] sm:$0xff] %v1952_v52  ;;  %2703 = vst [vmem:[#allocation42_spill] sm:$0xff] %v1954_v53  ;;  %v1958_v55 = vld [vmem:[#allocation3 + $0x1b0] sm:$0xff]  ;;  %v1960_v56 = vld [vmem:[#allocation3 + $0x1b8] sm:$0xff] }
  0x25   :  { %2704 = vst [vmem:[#allocation43_spill] sm:$0xff] %v1956_v54  ;;  %2705 = vst [vmem:[#allocation44_spill] sm:$0xff] %v1958_v55  ;;  %v1962_v57 = vld [vmem:[#allocation3 + $0x1c0] sm:$0xff]  ;;  %v1964_v58 = vld [vmem:[#allocation3 + $0x1c8] sm:$0xff] }
  0x26   :  { %2706 = vst [vmem:[#allocation45_spill] sm:$0xff] %v1960_v56  ;;  %2707 = vst [vmem:[#allocation46_spill] sm:$0xff] %v1962_v57  ;;  %v1966_v59 = vld [vmem:[#allocation3 + $0x1d0] sm:$0xff]  ;;  %v1968_v60 = vld [vmem:[#allocation3 + $0x1d8] sm:$0xff] }
  0x27   :  { %2708 = vst [vmem:[#allocation47_spill] sm:$0xff] %v1964_v58  ;;  %2709 = vst [vmem:[#allocation48_spill] sm:$0xff] %v1966_v59  ;;  %v1970_v61 = vld [vmem:[#allocation3 + $0x1e0] sm:$0xff]  ;;  %v1972_v62 = vld [vmem:[#allocation3 + $0x1e8] sm:$0xff] }
  0x28   :  { %2710 = vst [vmem:[#allocation49_spill] sm:$0xff] %v1968_v60  ;;  %2711 = vst [vmem:[#allocation50_spill] sm:$0xff] %v1970_v61  ;;  %v1974_v63 = vld [vmem:[#allocation3 + $0x1f0] sm:$0xff]  ;;  %v1976_v0 = vld [vmem:[#allocation3 + $0x1f8] sm:$0xff] }
  0x29   :  { %2712 = vst [vmem:[#allocation51_spill] sm:$0xff] %v1972_v62  ;;  %2713 = vst [vmem:[#allocation52_spill] sm:$0xff] %v1974_v63  ;;  %v1978_v51 = vld [vmem:[#allocation3 + $0x200] sm:$0xff]  ;;  %v1980_v54 = vld [vmem:[#allocation3 + $0x208] sm:$0xff] }
  0x2a   :  { %2714 = vst [vmem:[#allocation53_spill] sm:$0xff] %v1976_v0  ;;  %2715 = vst [vmem:[#allocation54_spill] sm:$0xff] %v1978_v51  ;;  %v1982_v3 = vld [vmem:[#allocation3 + $0x210] sm:$0xff]  ;;  %v1984_v57 = vld [vmem:[#allocation3 + $0x218] sm:$0xff] }
  0x2b   :  { %2716 = vst [vmem:[#allocation55_spill] sm:$0xff] %v1980_v54  ;;  %2717 = vst [vmem:[#allocation56_spill] sm:$0xff] %v1982_v3  ;;  %v1986_v6 = vld [vmem:[#allocation3 + $0x220] sm:$0xff]  ;;  %v1988_v9 = vld [vmem:[#allocation3 + $0x228] sm:$0xff] }
  0x2c   :  { %2718 = vst [vmem:[#allocation57_spill] sm:$0xff] %v1984_v57  ;;  %2719 = vst [vmem:[#allocation58_spill] sm:$0xff] %v1986_v6  ;;  %v1990_v60 = vld [vmem:[#allocation3 + $0x230] sm:$0xff]  ;;  %v1992_v12 = vld [vmem:[#allocation3 + $0x238] sm:$0xff] }
  0x2d   :  { %2720 = vst [vmem:[#allocation59_spill] sm:$0xff] %v1988_v9  ;;  %2721 = vst [vmem:[#allocation60_spill] sm:$0xff] %v1990_v60  ;;  %v1994_v15 = vld [vmem:[#allocation3 + $0x240] sm:$0xff]  ;;  %v1996_v63 = vld [vmem:[#allocation3 + $0x248] sm:$0xff] }
  0x2e   :  { %2722 = vst [vmem:[#allocation61_spill] sm:$0xff] %v1992_v12  ;;  %2723 = vst [vmem:[#allocation62_spill] sm:$0xff] %v1994_v15  ;;  %v1998_v18 = vld [vmem:[#allocation3 + $0x250] sm:$0xff]  ;;  %v2000_v21 = vld [vmem:[#allocation3 + $0x258] sm:$0xff] }
  0x2f   :  { %2724 = vst [vmem:[#allocation63_spill] sm:$0xff] %v1996_v63  ;;  %2725 = vst [vmem:[#allocation64_spill] sm:$0xff] %v1998_v18  ;;  %v2002_v54 = vld [vmem:[#allocation3 + $0x260] sm:$0xff]  ;;  %v2004_v24 = vld [vmem:[#allocation3 + $0x268] sm:$0xff] }
  0x30   :  { %2726 = vst [vmem:[#allocation65_spill] sm:$0xff] %v2000_v21  ;;  %2727 = vst [vmem:[#allocation66_spill] sm:$0xff] %v2002_v54  ;;  %v2006_v27 = vld [vmem:[#allocation3 + $0x270] sm:$0xff]  ;;  %v2008_v6 = vld [vmem:[#allocation3 + $0x278] sm:$0xff] }
  0x31   :  { %2728 = vst [vmem:[#allocation67_spill] sm:$0xff] %v2004_v24  ;;  %2729 = vst [vmem:[#allocation68_spill] sm:$0xff] %v2008_v6  ;;  %v2010_v30 = vld [vmem:[#allocation3 + $0x280] sm:$0xff]  ;;  %v2012_v33 = vld [vmem:[#allocation3 + $0x288] sm:$0xff] }
  0x32   :  { %2730 = vst [vmem:[#allocation69_spill] sm:$0xff] %v2010_v30  ;;  %v2014_v12 = vld [vmem:[#allocation3 + $0x290] sm:$0xff]  ;;  %v2016_v36 = vld [vmem:[#allocation3 + $0x298] sm:$0xff]  ;;  %v2018_v39 = vld [vmem:[#allocation3 + $0x2a0] sm:$0xff] }
  0x33   :  { %2731 = vst [vmem:[#allocation70_spill] sm:$0xff] %v2014_v12  ;;  %2732 = vst [vmem:[#allocation71_spill] sm:$0xff] %v2016_v36  ;;  %v2020_v18 = vld [vmem:[#allocation3 + $0x2a8] sm:$0xff]  ;;  %v2022_v42 = vld [vmem:[#allocation3 + $0x2b0] sm:$0xff] }
  0x34   :  { %2733 = vst [vmem:[#allocation72_spill] sm:$0xff] %v2020_v18  ;;  %2734 = vst [vmem:[#allocation73_spill] sm:$0xff] %v2022_v42  ;;  %v2024_v50 = vld [vmem:[#allocation3 + $0x2b8] sm:$0xff]  ;;  %v2026_v24 = vld [vmem:[#allocation3 + $0x2c0] sm:$0xff] }
  0x35   :  { %2735 = vst [vmem:[#allocation74_spill] sm:$0xff] %v2026_v24  ;;  %v2028_v53 = vld [vmem:[#allocation3 + $0x2c8] sm:$0xff]  ;;  %v2030_v45 = vld [vmem:[#allocation3 + $0x2d0] sm:$0xff]  ;;  %v2032_v30 = vld [vmem:[#allocation3 + $0x2d8] sm:$0xff] }
  0x36   :  { %2736 = vst [vmem:[#allocation75_spill] sm:$0xff] %v2028_v53  ;;  %v2034_v48 = vld [vmem:[#allocation3 + $0x2e0] sm:$0xff]  ;;  %v2036_v56 = vld [vmem:[#allocation3 + $0x2e8] sm:$0xff]  ;;  %v2038_v36 = vld [vmem:[#allocation3 + $0x2f0] sm:$0xff] }
  0x37   :  { %2737 = vst [vmem:[#allocation76_spill] sm:$0xff] %v2034_v48  ;;  %v2040_v59 = vld [vmem:[#allocation3 + $0x2f8] sm:$0xff]  ;;  %v2045_v42 = vld [vmem:[%s2551_s4] ss:$0 sm:$0xff]  ;;  %v2050_v53 = vld [vmem:[%s2551_s4 + $0x1] ss:$0 sm:$0xff] }
  0x38   :  { %2738 = vst [vmem:[#allocation77_spill] sm:$0xff] %v2040_v59  ;;  %2739 = vst [vmem:[#allocation78_spill] sm:$0xff] %v2045_v42  ;;  %v1692_v48 = vld [vmem:[%s2548_s1 + $0x4] ss:$24 sps:$4 sm:$0xff]   ;;  %v1694_v49 = vld [vmem:[%s2548_s1] ss:$24 sps:$4 sm:$0xff]  }
  0x39   :  { %2740 = vst [vmem:[#allocation79_spill] sm:$0xff] %v2050_v53  ;;  %v1695_v59 = vld [vmem:[%s2547_s0] sm:$0xff]   ;;  %198 = vmatprep.subr.bf16.mxu0 %v1692_v48  ;;  %1646 = vmatprep.subr.bf16.mxu1 %v1692_v48  ;;  %v1700_v62 = vld [vmem:[%s2548_s1 + $0x10] ss:$24 sps:$4 sm:$0xff]   ;;  %v1702_v48 = vld [vmem:[%s2548_s1 + $0x14] ss:$24 sps:$4 sm:$0xff]  }
  0x3a   :  { %v1696_v42 = vld [vmem:[%s2547_s0 + $0x20] sm:$0xff]   ;;  %199 = vmatpush1.bf16.msra.mxu0 %v1694_v49  ;;  %1647 = vmatpush1.bf16.msra.mxu1 %v1694_v49  ;;  %v2741_v49 = vmov 0   ;;  %v1703_v51 = vld [vmem:[%s2547_s0 + $0x8] sm:$0xff]  }
  0x3b   :  { %v1697_v53 = vld [vmem:[%s2548_s1 + $0x8] ss:$24 sps:$4 sm:$0xff]   ;;  %v1699_v52 = vld [vmem:[%s2548_s1 + $0xc] ss:$24 sps:$4 sm:$0xff]   ;;  %424 = vmatprep.subr.bf16.mxu0 %v1702_v48  ;;  %v1708_v48 = vld [vmem:[%s2547_s0 + $0x38] sm:$0xff]  }
  0x3c   :  { %311 = vmatprep.subr.bf16.mxu1 %v1699_v52  ;;  %v1704_v55 = vld [vmem:[%s2547_s0 + $0x28] sm:$0xff]   ;;  %v1705_v52 = vld [vmem:[%s2547_s0 + $0x10] sm:$0xff]  }
  0x3d   :  { %1508 = vmatmul.mubr.msk.bf16.vlgmr.msra.gmra.mxu0 %vm159_vm0, %v1695_v59  ;;  %1512 = vmatmul.mubr.msk.bf16.vlgmr.msra.gmra.mxu1 %vm159_vm0, %v1696_v42 }
  0x3e   :  { %312 = vmatpush1.bf16.msra.mxu1 %v1697_v53  ;;  %425 = vmatpush1.bf16.msra.mxu0 %v1700_v62  ;;  %v1706_v53 = vld [vmem:[%s2547_s0 + $0x30] sm:$0xff]   ;;  %v1707_v62 = vld [vmem:[%s2547_s0 + $0x18] sm:$0xff]  }
  0x3f   :  { %226 = vmatprep.mubr.bf16.mxu0 %v2741_v49  ;;  %266 = vmatprep.mubr.bf16.mxu1 %v2741_v49 }
  0x45   :  { %1509 = vmatmul.mubr.msk.bf16.gmra.mxu0 %vm159_vm0, %v1703_v51  ;;  %1513 = vmatmul.mubr.msk.bf16.gmra.mxu1 %vm159_vm0, %v1704_v55 }
  0x46   :  { %236 = vmatprep.mubr.bf16.mxu0 %v2741_v49  ;;  %276 = vmatprep.mubr.bf16.mxu1 %v2741_v49 }
  0x4d   :  { %1510 = vmatmul.mubr.msk.bf16.gmra.mxu0 %vm159_vm0, %v1705_v52  ;;  %1514 = vmatmul.mubr.msk.bf16.gmra.mxu1 %vm159_vm0, %v1706_v53 }
  0x4e   :  { %246 = vmatprep.mubr.bf16.mxu0 %v2741_v49  ;;  %286 = vmatprep.mubr.bf16.mxu1 %v2741_v49 }
  0x55   :  { %1511 = vmatmul.mubr.msk.bf16.gmra.mxu0 %vm159_vm0, %v1707_v62  ;;  %1515 = vmatmul.mubr.msk.bf16.gmra.mxu1 %vm159_vm0, %v1708_v48 }
  0x56   :  { %329 = vmatprep.mubr.bf16.mxu1 %v2741_v49  ;;  %442 = vmatprep.mubr.bf16.mxu0 %v2741_v49 }
  0x5d   :  { %1516 = vmatmul.mubr.msk.bf16.vlgmr.msra.gmra.mxu1 %vm159_vm0, %v1695_v59  ;;  %1524 = vmatmul.mubr.msk.bf16.vlgmr.msra.gmra.mxu0 %vm159_vm0, %v1695_v59  ;;  %v2146_v59 = vld [vmem:[%s2550_s3] sm:$0x3f]  ;;  %s2275_s3 = smov 0  }
  0x5e   :  { %339 = vmatprep.mubr.bf16.mxu1 %v2741_v49  ;;  %452 = vmatprep.mubr.bf16.mxu0 %v2741_v49 }
  0x65   :  { %1517 = vmatmul.mubr.msk.bf16.gmra.mxu1 %vm159_vm0, %v1703_v51  ;;  %1525 = vmatmul.mubr.msk.bf16.gmra.mxu0 %vm159_vm0, %v1703_v51 }
  0x66   :  { %349 = vmatprep.mubr.bf16.mxu1 %v2741_v49  ;;  %462 = vmatprep.mubr.bf16.mxu0 %v2741_v49 }
  0x6d   :  { %1518 = vmatmul.mubr.msk.bf16.gmra.mxu1 %vm159_vm0, %v1705_v52  ;;  %1526 = vmatmul.mubr.msk.bf16.gmra.mxu0 %vm159_vm0, %v1705_v52 }
  0x6e   :  { %359 = vmatprep.mubr.bf16.mxu1 %v2741_v49  ;;  %472 = vmatprep.mubr.bf16.mxu0 %v2741_v49 }
  0x75   :  { %1519 = vmatmul.mubr.msk.bf16.gmra.mxu1 %vm159_vm0, %v1707_v62  ;;  %1527 = vmatmul.mubr.msk.bf16.gmra.mxu0 %vm159_vm0, %v1707_v62 }
  0x76   :  { %369 = vmatprep.mubr.bf16.mxu1 %v2741_v49  ;;  %482 = vmatprep.mubr.bf16.mxu0 %v2741_v49 }
  0x7d   :  { %1520 = vmatmul.mubr.msk.bf16.gmra.mxu1 %vm159_vm0, %v1696_v42  ;;  %1528 = vmatmul.mubr.msk.bf16.gmra.mxu0 %vm159_vm0, %v1696_v42  ;;  %v59_v42 = vlaneseq }
  0x7e   :  { %379 = vmatprep.mubr.bf16.mxu1 %v2741_v49  ;;  %492 = vmatprep.mubr.bf16.mxu0 %v2741_v49 }
  0x7f   :  { %v2140_v51 = vshrl.u32 %v59_v42, 7 }
  0x81   :  { %v65_v52 = vsub.s32 1, %v2140_v51 }
  0x85   :  { %1521 = vmatmul.mubr.msk.bf16.gmra.mxu1 %vm159_vm0, %v1704_v55  ;;  %1529 = vmatmul.mubr.msk.bf16.gmra.mxu0 %vm159_vm0, %v1704_v55  ;;  %v61_v55 = vsub.s32 0, %v2140_v51 }
  0x86   :  { %389 = vmatprep.mubr.bf16.mxu1 %v2741_v49  ;;  %502 = vmatprep.mubr.bf16.mxu0 %v2741_v49 }
  0x8d   :  { %1522 = vmatmul.mubr.msk.bf16.gmra.mxu1 %vm159_vm0, %v1706_v53  ;;  %1530 = vmatmul.mubr.msk.bf16.gmra.mxu0 %vm159_vm0, %v1706_v53  ;;  %v2150_v53 = vrot.slane %v2146_v59, %v61_v55 }
  0x8e   :  { %399 = vmatprep.mubr.bf16.mxu1 %v2741_v49  ;;  %512 = vmatprep.mubr.bf16.mxu0 %v2741_v49  ;;  %v2153_v49 = vrot.slane %v2146_v59, %v65_v52 }
  0x95   :  { %1523 = vmatmul.mubr.msk.bf16.gmra.mxu1 %vm159_vm0, %v1708_v48  ;;  %1531 = vmatmul.mubr.msk.bf16.gmra.mxu0 %vm159_vm0, %v1708_v48 }
  0xfd   :  { %v218_v62 = vpop.f32.mrf.mxu0  ;;  %v258_v48 = vpop.f32.mrf.mxu1 }
  0xfe   :  { %v219_v42 = vadd.f32 %v218_v62, %v2150_v53  ;;  %v259_v58 = vadd.f32 %v258_v48, %v2150_v53 }
  0xff   :  { %v220_v57 = vpop.f32.mrf.mxu0  ;;  %v260_v60 = vpop.f32.mrf.mxu1 }
 0x100   :  { %523 = vst [vmem:[#allocation2] sm:$0xff] %v219_v42  ;;  %571 = vst [vmem:[#allocation2 + $0x180] sm:$0xff] %v259_v58  ;;  %v221_v61 = vadd.f32 %v220_v57, %v2153_v49  ;;  %v261_v0 = vadd.f32 %v260_v60, %v2153_v49 }
 0x101   :  { %v222_v63 = vpop.f32.mrf.mxu0  ;;  %v262_v55 = vpop.f32.mrf.mxu1 }
 0x102   :  { %524 = vst [vmem:[#allocation2 + $0x8] sm:$0xff] %v221_v61  ;;  %572 = vst [vmem:[#allocation2 + $0x188] sm:$0xff] %v261_v0  ;;  %v223_v52 = vadd.f32 %v222_v63, %v2150_v53  ;;  %v263_v54 = vadd.f32 %v262_v55, %v2150_v53 }
 0x103   :  { %v224_v3 = vpop.f32.mrf.mxu0  ;;  %v264_v62 = vpop.f32.mrf.mxu1 }
 0x104   :  { %529 = vst [vmem:[#allocation2 + $0x30] sm:$0xff] %v223_v52  ;;  %577 = vst [vmem:[#allocation2 + $0x1b0] sm:$0xff] %v263_v54  ;;  %v225_v48 = vadd.f32 %v224_v3, %v2153_v49  ;;  %v265_v58 = vadd.f32 %v264_v62, %v2153_v49 }
 0x105   :  { %v228_v42 = vpop.f32.mrf.mxu0  ;;  %v268_v57 = vpop.f32.mrf.mxu1 }
 0x106   :  { %530 = vst [vmem:[#allocation2 + $0x38] sm:$0xff] %v225_v48  ;;  %578 = vst [vmem:[#allocation2 + $0x1b8] sm:$0xff] %v265_v58  ;;  %v229_v60 = vadd.f32 %v228_v42, %v2150_v53  ;;  %v269_v0 = vadd.f32 %v268_v57, %v2150_v53 }
 0x107   :  { %v230_v61 = vpop.f32.mrf.mxu0  ;;  %v270_v63 = vpop.f32.mrf.mxu1 }
 0x108   :  { %535 = vst [vmem:[#allocation2 + $0x60] sm:$0xff] %v229_v60  ;;  %583 = vst [vmem:[#allocation2 + $0x1e0] sm:$0xff] %v269_v0  ;;  %v231_v55 = vadd.f32 %v230_v61, %v2153_v49  ;;  %v271_v54 = vadd.f32 %v270_v63, %v2153_v49 }
 0x109   :  { %v232_v52 = vpop.f32.mrf.mxu0  ;;  %v272_v3 = vpop.f32.mrf.mxu1 }
 0x10a   :  { %536 = vst [vmem:[#allocation2 + $0x68] sm:$0xff] %v231_v55  ;;  %584 = vst [vmem:[#allocation2 + $0x1e8] sm:$0xff] %v271_v54  ;;  %v233_v62 = vadd.f32 %v232_v52, %v2150_v53  ;;  %v273_v48 = vadd.f32 %v272_v3, %v2150_v53 }
 0x10b   :  { %v234_v58 = vpop.f32.mrf.mxu0  ;;  %v274_v42 = vpop.f32.mrf.mxu1 }
 0x10c   :  { %541 = vst [vmem:[#allocation2 + $0x90] sm:$0xff] %v233_v62  ;;  %589 = vst [vmem:[#allocation2 + $0x210] sm:$0xff] %v273_v48  ;;  %v235_v57 = vadd.f32 %v234_v58, %v2153_v49  ;;  %v275_v60 = vadd.f32 %v274_v42, %v2153_v49 }
 0x10d   :  { %v238_v0 = vpop.f32.mrf.mxu0  ;;  %v278_v61 = vpop.f32.mrf.mxu1 }
 0x10e   :  { %542 = vst [vmem:[#allocation2 + $0x98] sm:$0xff] %v235_v57  ;;  %590 = vst [vmem:[#allocation2 + $0x218] sm:$0xff] %v275_v60  ;;  %v239_v63 = vadd.f32 %v238_v0, %v2150_v53  ;;  %v279_v55 = vadd.f32 %v278_v61, %v2150_v53 }
 0x10f   :  { %v240_v54 = vpop.f32.mrf.mxu0  ;;  %v280_v52 = vpop.f32.mrf.mxu1 }
 0x110   :  { %547 = vst [vmem:[#allocation2 + $0xc0] sm:$0xff] %v239_v63  ;;  %595 = vst [vmem:[#allocation2 + $0x240] sm:$0xff] %v279_v55  ;;  %v241_v3 = vadd.f32 %v240_v54, %v2153_v49  ;;  %v281_v62 = vadd.f32 %v280_v52, %v2153_v49 }
 0x111   :  { %v242_v48 = vpop.f32.mrf.mxu0  ;;  %v282_v58 = vpop.f32.mrf.mxu1 }
 0x112   :  { %548 = vst [vmem:[#allocation2 + $0xc8] sm:$0xff] %v241_v3  ;;  %596 = vst [vmem:[#allocation2 + $0x248] sm:$0xff] %v281_v62  ;;  %v243_v42 = vadd.f32 %v242_v48, %v2150_v53  ;;  %v283_v57 = vadd.f32 %v282_v58, %v2150_v53  ;;  %v69_v62 = vsub.s32 2, %v2140_v51  ;;  %v77_v48 = vsub.s32 4, %v2140_v51 }
 0x113   :  { %v244_v60 = vpop.f32.mrf.mxu0  ;;  %v284_v0 = vpop.f32.mrf.mxu1 }
 0x114   :  { %553 = vst [vmem:[#allocation2 + $0xf0] sm:$0xff] %v243_v42  ;;  %601 = vst [vmem:[#allocation2 + $0x270] sm:$0xff] %v283_v57  ;;  %v245_v61 = vadd.f32 %v244_v60, %v2153_v49  ;;  %v285_v63 = vadd.f32 %v284_v0, %v2153_v49  ;;  %v73_v60 = vsub.s32 3, %v2140_v51  ;;  %v81_v0 = vsub.s32 5, %v2140_v51 }
 0x115   :  { %v248_v55 = vpop.f32.mrf.mxu0  ;;  %v288_v54 = vpop.f32.mrf.mxu1  ;;  %v2190_v6 = vrot.slane %v2146_v59, %v69_v62 }
 0x116   :  { %554 = vst [vmem:[#allocation2 + $0xf8] sm:$0xff] %v245_v61  ;;  %602 = vst [vmem:[#allocation2 + $0x278] sm:$0xff] %v285_v63  ;;  %v249_v52 = vadd.f32 %v248_v55, %v2150_v53  ;;  %v289_v3 = vadd.f32 %v288_v54, %v2150_v53 }
 0x117   :  { %v250_v58 = vpop.f32.mrf.mxu0  ;;  %v290_v9 = vpop.f32.mrf.mxu1 }
 0x118   :  { %559 = vst [vmem:[#allocation2 + $0x120] sm:$0xff] %v249_v52  ;;  %607 = vst [vmem:[#allocation2 + $0x2a0] sm:$0xff] %v289_v3  ;;  %v251_v42 = vadd.f32 %v250_v58, %v2153_v49  ;;  %v291_v57 = vadd.f32 %v290_v9, %v2153_v49  ;;  %v2193_v52 = vrot.slane %v2146_v59, %v77_v48 }
 0x119   :  { %v252_v61 = vpop.f32.mrf.mxu0  ;;  %v292_v63 = vpop.f32.mrf.mxu1 }
 0x11a   :  { %560 = vst [vmem:[#allocation2 + $0x128] sm:$0xff] %v251_v42  ;;  %608 = vst [vmem:[#allocation2 + $0x2a8] sm:$0xff] %v291_v57  ;;  %v253_v55 = vadd.f32 %v252_v61, %v2150_v53  ;;  %v293_v54 = vadd.f32 %v292_v63, %v2150_v53  ;;  %v2198_v42 = vrot.slane %v2146_v59, %v73_v60 }
 0x11b   :  { %v254_v3 = vpop.f32.mrf.mxu0  ;;  %v294_v9 = vpop.f32.mrf.mxu1  ;;  %v2201_v57 = vrot.slane %v2146_v59, %v81_v0 }
 0x11c   :  { %565 = vst [vmem:[#allocation2 + $0x150] sm:$0xff] %v253_v55  ;;  %613 = vst [vmem:[#allocation2 + $0x2d0] sm:$0xff] %v293_v54  ;;  %v255_v51 = vadd.f32 %v254_v3, %v2153_v49  ;;  %v295_v58 = vadd.f32 %v294_v9, %v2153_v49 }
 0x11d   :  { %v331_v53 = vpop.f32.mrf.mxu1  ;;  %v444_v62 = vpop.f32.mrf.mxu0 }
 0x11e   :  { %566 = vst [vmem:[#allocation2 + $0x158] sm:$0xff] %v255_v51  ;;  %614 = vst [vmem:[#allocation2 + $0x2d8] sm:$0xff] %v295_v58  ;;  %v332_v48 = vadd.f32 %v331_v53, %v2190_v6  ;;  %v445_v61 = vadd.f32 %v444_v62, %v2193_v52 }
 0x11f   :  { %v333_v63 = vpop.f32.mrf.mxu1  ;;  %v446_v55 = vpop.f32.mrf.mxu0 }
 0x120   :  { %525 = vst [vmem:[#allocation2 + $0x10] sm:$0xff] %v332_v48  ;;  %527 = vst [vmem:[#allocation2 + $0x20] sm:$0xff] %v445_v61  ;;  %v334_v49 = vadd.f32 %v333_v63, %v2198_v42  ;;  %v447_v60 = vadd.f32 %v446_v55, %v2201_v57 }
 0x121   :  { %v335_v54 = vpop.f32.mrf.mxu1  ;;  %v448_v3 = vpop.f32.mrf.mxu0 }
 0x122   :  { %526 = vst [vmem:[#allocation2 + $0x18] sm:$0xff] %v334_v49  ;;  %528 = vst [vmem:[#allocation2 + $0x28] sm:$0xff] %v447_v60  ;;  %v336_v59 = vadd.f32 %v335_v54, %v2190_v6  ;;  %v449_v0 = vadd.f32 %v448_v3, %v2193_v52 }
 0x123   :  { %v337_v9 = vpop.f32.mrf.mxu1  ;;  %v450_v51 = vpop.f32.mrf.mxu0 }
 0x124   :  { %531 = vst [vmem:[#allocation2 + $0x40] sm:$0xff] %v336_v59  ;;  %533 = vst [vmem:[#allocation2 + $0x50] sm:$0xff] %v449_v0  ;;  %v338_v58 = vadd.f32 %v337_v9, %v2198_v42  ;;  %v451_v53 = vadd.f32 %v450_v51, %v2201_v57 }
 0x125   :  { %v341_v62 = vpop.f32.mrf.mxu1  ;;  %v454_v48 = vpop.f32.mrf.mxu0 }
 0x126   :  { %532 = vst [vmem:[#allocation2 + $0x48] sm:$0xff] %v338_v58  ;;  %534 = vst [vmem:[#allocation2 + $0x58] sm:$0xff] %v451_v53  ;;  %v342_v61 = vadd.f32 %v341_v62, %v2190_v6  ;;  %v455_v63 = vadd.f32 %v454_v48, %v2193_v52 }
 0x127   :  { %v343_v55 = vpop.f32.mrf.mxu1  ;;  %v456_v49 = vpop.f32.mrf.mxu0 }
 0x128   :  { %537 = vst [vmem:[#allocation2 + $0x70] sm:$0xff] %v342_v61  ;;  %539 = vst [vmem:[#allocation2 + $0x80] sm:$0xff] %v455_v63  ;;  %v344_v60 = vadd.f32 %v343_v55, %v2198_v42  ;;  %v457_v54 = vadd.f32 %v456_v49, %v2201_v57 }
 0x129   :  { %v345_v3 = vpop.f32.mrf.mxu1  ;;  %v458_v59 = vpop.f32.mrf.mxu0 }
 0x12a   :  { %538 = vst [vmem:[#allocation2 + $0x78] sm:$0xff] %v344_v60  ;;  %540 = vst [vmem:[#allocation2 + $0x88] sm:$0xff] %v457_v54  ;;  %v346_v0 = vadd.f32 %v345_v3, %v2190_v6  ;;  %v459_v9 = vadd.f32 %v458_v59, %v2193_v52 }
 0x12b   :  { %v347_v51 = vpop.f32.mrf.mxu1  ;;  %v460_v58 = vpop.f32.mrf.mxu0 }
 0x12c   :  { %543 = vst [vmem:[#allocation2 + $0xa0] sm:$0xff] %v346_v0  ;;  %545 = vst [vmem:[#allocation2 + $0xb0] sm:$0xff] %v459_v9  ;;  %v348_v53 = vadd.f32 %v347_v51, %v2198_v42  ;;  %v461_v62 = vadd.f32 %v460_v58, %v2201_v57 }
 0x12d   :  { %v351_v48 = vpop.f32.mrf.mxu1  ;;  %v464_v61 = vpop.f32.mrf.mxu0 }
 0x12e   :  { %544 = vst [vmem:[#allocation2 + $0xa8] sm:$0xff] %v348_v53  ;;  %546 = vst [vmem:[#allocation2 + $0xb8] sm:$0xff] %v461_v62  ;;  %v352_v63 = vadd.f32 %v351_v48, %v2190_v6  ;;  %v465_v55 = vadd.f32 %v464_v61, %v2193_v52 }
 0x12f   :  { %v353_v49 = vpop.f32.mrf.mxu1  ;;  %v466_v60 = vpop.f32.mrf.mxu0 }
 0x130   :  { %549 = vst [vmem:[#allocation2 + $0xd0] sm:$0xff] %v352_v63  ;;  %551 = vst [vmem:[#allocation2 + $0xe0] sm:$0xff] %v465_v55  ;;  %v354_v54 = vadd.f32 %v353_v49, %v2198_v42  ;;  %v467_v3 = vadd.f32 %v466_v60, %v2201_v57 }
 0x131   :  { %v355_v59 = vpop.f32.mrf.mxu1  ;;  %v468_v0 = vpop.f32.mrf.mxu0 }
 0x132   :  { %550 = vst [vmem:[#allocation2 + $0xd8] sm:$0xff] %v354_v54  ;;  %552 = vst [vmem:[#allocation2 + $0xe8] sm:$0xff] %v467_v3  ;;  %v356_v9 = vadd.f32 %v355_v59, %v2190_v6  ;;  %v469_v51 = vadd.f32 %v468_v0, %v2193_v52 }
 0x133   :  { %v357_v58 = vpop.f32.mrf.mxu1  ;;  %v470_v53 = vpop.f32.mrf.mxu0 }
 0x134   :  { %555 = vst [vmem:[#allocation2 + $0x100] sm:$0xff] %v356_v9  ;;  %557 = vst [vmem:[#allocation2 + $0x110] sm:$0xff] %v469_v51  ;;  %v358_v62 = vadd.f32 %v357_v58, %v2198_v42  ;;  %v471_v48 = vadd.f32 %v470_v53, %v2201_v57 }
 0x135   :  { %v361_v61 = vpop.f32.mrf.mxu1  ;;  %v474_v63 = vpop.f32.mrf.mxu0 }
 0x136   :  { %556 = vst [vmem:[#allocation2 + $0x108] sm:$0xff] %v358_v62  ;;  %558 = vst [vmem:[#allocation2 + $0x118] sm:$0xff] %v471_v48  ;;  %v362_v55 = vadd.f32 %v361_v61, %v2190_v6  ;;  %v475_v49 = vadd.f32 %v474_v63, %v2193_v52 }
 0x137   :  { %v363_v60 = vpop.f32.mrf.mxu1  ;;  %v476_v54 = vpop.f32.mrf.mxu0 }
 0x138   :  { %561 = vst [vmem:[#allocation2 + $0x130] sm:$0xff] %v362_v55  ;;  %563 = vst [vmem:[#allocation2 + $0x140] sm:$0xff] %v475_v49  ;;  %v364_v3 = vadd.f32 %v363_v60, %v2198_v42  ;;  %v477_v59 = vadd.f32 %v476_v54, %v2201_v57 }
 0x139   :  { %v365_v0 = vpop.f32.mrf.mxu1  ;;  %v478_v9 = vpop.f32.mrf.mxu0 }
 0x13a   :  { %562 = vst [vmem:[#allocation2 + $0x138] sm:$0xff] %v364_v3  ;;  %564 = vst [vmem:[#allocation2 + $0x148] sm:$0xff] %v477_v59  ;;  %v366_v51 = vadd.f32 %v365_v0, %v2190_v6  ;;  %v479_v58 = vadd.f32 %v478_v9, %v2193_v52 }
 0x13b   :  { %v367_v53 = vpop.f32.mrf.mxu1  ;;  %v480_v62 = vpop.f32.mrf.mxu0 }
 0x13c   :  { %567 = vst [vmem:[#allocation2 + $0x160] sm:$0xff] %v366_v51  ;;  %569 = vst [vmem:[#allocation2 + $0x170] sm:$0xff] %v479_v58  ;;  %v368_v48 = vadd.f32 %v367_v53, %v2198_v42  ;;  %v481_v61 = vadd.f32 %v480_v62, %v2201_v57 }
 0x13d   :  { %v371_v63 = vpop.f32.mrf.mxu1  ;;  %v484_v55 = vpop.f32.mrf.mxu0 }
 0x13e   :  { %568 = vst [vmem:[#allocation2 + $0x168] sm:$0xff] %v368_v48  ;;  %570 = vst [vmem:[#allocation2 + $0x178] sm:$0xff] %v481_v61  ;;  %v372_v49 = vadd.f32 %v371_v63, %v2190_v6  ;;  %v485_v60 = vadd.f32 %v484_v55, %v2193_v52 }
 0x13f   :  { %v373_v54 = vpop.f32.mrf.mxu1  ;;  %v486_v3 = vpop.f32.mrf.mxu0 }
 0x140   :  { %573 = vst [vmem:[#allocation2 + $0x190] sm:$0xff] %v372_v49  ;;  %575 = vst [vmem:[#allocation2 + $0x1a0] sm:$0xff] %v485_v60  ;;  %v374_v59 = vadd.f32 %v373_v54, %v2198_v42  ;;  %v487_v0 = vadd.f32 %v486_v3, %v2201_v57 }
 0x141   :  { %v375_v9 = vpop.f32.mrf.mxu1  ;;  %v488_v51 = vpop.f32.mrf.mxu0 }
 0x142   :  { %574 = vst [vmem:[#allocation2 + $0x198] sm:$0xff] %v374_v59  ;;  %576 = vst [vmem:[#allocation2 + $0x1a8] sm:$0xff] %v487_v0  ;;  %v376_v58 = vadd.f32 %v375_v9, %v2190_v6  ;;  %v489_v53 = vadd.f32 %v488_v51, %v2193_v52 }
 0x143   :  { %v377_v62 = vpop.f32.mrf.mxu1  ;;  %v490_v48 = vpop.f32.mrf.mxu0 }
 0x144   :  { %579 = vst [vmem:[#allocation2 + $0x1c0] sm:$0xff] %v376_v58  ;;  %581 = vst [vmem:[#allocation2 + $0x1d0] sm:$0xff] %v489_v53  ;;  %v378_v61 = vadd.f32 %v377_v62, %v2198_v42  ;;  %v491_v63 = vadd.f32 %v490_v48, %v2201_v57 }
 0x145   :  { %v381_v55 = vpop.f32.mrf.mxu1  ;;  %v494_v49 = vpop.f32.mrf.mxu0 }
 0x146   :  { %580 = vst [vmem:[#allocation2 + $0x1c8] sm:$0xff] %v378_v61  ;;  %582 = vst [vmem:[#allocation2 + $0x1d8] sm:$0xff] %v491_v63  ;;  %v382_v60 = vadd.f32 %v381_v55, %v2190_v6  ;;  %v495_v54 = vadd.f32 %v494_v49, %v2193_v52 }
 0x147   :  { %v383_v3 = vpop.f32.mrf.mxu1  ;;  %v496_v59 = vpop.f32.mrf.mxu0 }
 0x148   :  { %585 = vst [vmem:[#allocation2 + $0x1f0] sm:$0xff] %v382_v60  ;;  %587 = vst [vmem:[#allocation2 + $0x200] sm:$0xff] %v495_v54  ;;  %v384_v0 = vadd.f32 %v383_v3, %v2198_v42  ;;  %v497_v9 = vadd.f32 %v496_v59, %v2201_v57 }
 0x149   :  { %v385_v51 = vpop.f32.mrf.mxu1  ;;  %v498_v58 = vpop.f32.mrf.mxu0 }
 0x14a   :  { %586 = vst [vmem:[#allocation2 + $0x1f8] sm:$0xff] %v384_v0  ;;  %588 = vst [vmem:[#allocation2 + $0x208] sm:$0xff] %v497_v9  ;;  %v386_v53 = vadd.f32 %v385_v51, %v2190_v6  ;;  %v499_v62 = vadd.f32 %v498_v58, %v2193_v52 }
 0x14b   :  { %v387_v48 = vpop.f32.mrf.mxu1  ;;  %v500_v61 = vpop.f32.mrf.mxu0 }
 0x14c   :  { %591 = vst [vmem:[#allocation2 + $0x220] sm:$0xff] %v386_v53  ;;  %593 = vst [vmem:[#allocation2 + $0x230] sm:$0xff] %v499_v62  ;;  %v388_v63 = vadd.f32 %v387_v48, %v2198_v42  ;;  %v501_v55 = vadd.f32 %v500_v61, %v2201_v57 }
 0x14d   :  { %v391_v49 = vpop.f32.mrf.mxu1  ;;  %v504_v60 = vpop.f32.mrf.mxu0 }
 0x14e   :  { %592 = vst [vmem:[#allocation2 + $0x228] sm:$0xff] %v388_v63  ;;  %594 = vst [vmem:[#allocation2 + $0x238] sm:$0xff] %v501_v55  ;;  %v392_v54 = vadd.f32 %v391_v49, %v2190_v6  ;;  %v505_v3 = vadd.f32 %v504_v60, %v2193_v52 }
 0x14f   :  { %v393_v59 = vpop.f32.mrf.mxu1  ;;  %v506_v0 = vpop.f32.mrf.mxu0 }
 0x150   :  { %597 = vst [vmem:[#allocation2 + $0x250] sm:$0xff] %v392_v54  ;;  %599 = vst [vmem:[#allocation2 + $0x260] sm:$0xff] %v505_v3  ;;  %v394_v9 = vadd.f32 %v393_v59, %v2198_v42  ;;  %v507_v51 = vadd.f32 %v506_v0, %v2201_v57 }
 0x151   :  { %v395_v58 = vpop.f32.mrf.mxu1  ;;  %v508_v53 = vpop.f32.mrf.mxu0 }
 0x152   :  { %598 = vst [vmem:[#allocation2 + $0x258] sm:$0xff] %v394_v9  ;;  %600 = vst [vmem:[#allocation2 + $0x268] sm:$0xff] %v507_v51  ;;  %v396_v62 = vadd.f32 %v395_v58, %v2190_v6  ;;  %v509_v48 = vadd.f32 %v508_v53, %v2193_v52 }
 0x153   :  { %v397_v61 = vpop.f32.mrf.mxu1  ;;  %v510_v63 = vpop.f32.mrf.mxu0 }
 0x154   :  { %603 = vst [vmem:[#allocation2 + $0x280] sm:$0xff] %v396_v62  ;;  %605 = vst [vmem:[#allocation2 + $0x290] sm:$0xff] %v509_v48  ;;  %v398_v55 = vadd.f32 %v397_v61, %v2198_v42  ;;  %v511_v49 = vadd.f32 %v510_v63, %v2201_v57 }
 0x155   :  { %v401_v60 = vpop.f32.mrf.mxu1  ;;  %v514_v54 = vpop.f32.mrf.mxu0 }
 0x156   :  { %604 = vst [vmem:[#allocation2 + $0x288] sm:$0xff] %v398_v55  ;;  %606 = vst [vmem:[#allocation2 + $0x298] sm:$0xff] %v511_v49  ;;  %v402_v3 = vadd.f32 %v401_v60, %v2190_v6  ;;  %v515_v59 = vadd.f32 %v514_v54, %v2193_v52  ;;  %v2267_v54 = vmov 0.0  }
 0x157   :  { %v403_v0 = vpop.f32.mrf.mxu1  ;;  %v516_v9 = vpop.f32.mrf.mxu0 }
 0x158   :  { %609 = vst [vmem:[#allocation2 + $0x2b0] sm:$0xff] %v402_v3  ;;  %611 = vst [vmem:[#allocation2 + $0x2c0] sm:$0xff] %v515_v59  ;;  %v404_v51 = vadd.f32 %v403_v0, %v2198_v42  ;;  %v517_v58 = vadd.f32 %v516_v9, %v2201_v57  ;;  %v2269_v3 = vmov 0.0   ;;  %v2271_v59 = vmov 0.0  }
 0x159   :  { %v405_v53 = vpop.f32.mrf.mxu1  ;;  %v518_v62 = vpop.f32.mrf.mxu0  ;;  %v2273_v0 = vmov 0.0  }
 0x15a   :  { %610 = vst [vmem:[#allocation2 + $0x2b8] sm:$0xff] %v404_v51  ;;  %612 = vst [vmem:[#allocation2 + $0x2c8] sm:$0xff] %v517_v58  ;;  %v406_v48 = vadd.f32 %v405_v53, %v2190_v6  ;;  %v519_v61 = vadd.f32 %v518_v62, %v2193_v52 }
 0x15b   :  { %v407_v63 = vpop.f32.mrf.mxu1  ;;  %v520_v55 = vpop.f32.mrf.mxu0 }
 0x15c   :  { %615 = vst [vmem:[#allocation2 + $0x2e0] sm:$0xff] %v406_v48  ;;  %617 = vst [vmem:[#allocation2 + $0x2f0] sm:$0xff] %v519_v61  ;;  %v408_v49 = vadd.f32 %v407_v63, %v2198_v42  ;;  %v521_v60 = vadd.f32 %v520_v55, %v2201_v57 }
 0x15e   :  { %616 = vst [vmem:[#allocation2 + $0x2e8] sm:$0xff] %v408_v49  ;;  %618 = vst [vmem:[#allocation2 + $0x2f8] sm:$0xff] %v521_v60 }
 0x15f LB: > { %v2742_v24 = vld [vmem:[#allocation74_spill] sm:$0xff]  ;;  %v2743_v23 = vld [vmem:[#allocation28_spill] sm:$0xff]  ;;  %v2744_v22 = vld [vmem:[#allocation27_spill] sm:$0xff]  ;;  %v1577_v6 = vcombine.high %v1934_v43, %v1940_v46  ;;  %v1576_v52 = vcombine.low %v1934_v43, %v1940_v46  ;;  %v1571_v42 = vcombine.high %v1922_v37, %v1928_v40  ;;  %v1570_v57 = vcombine.low %v1922_v37, %v1928_v40  ;;  %s1630_s29 = sshll.u32 %s1809_s3, 4  ;;  %s1351_s8 = ssub.s32 7, %s1809_s3  ;;  %v1793_v54 = vphi %v2267_v54, %v2817_v54   ;;  %s1809_s3 = sphi %s2275_s3, %s734_s3   ;;  %v1805_v0 = vphi %v2273_v0, %v2820_v0   ;;  %v1801_v59 = vphi %v2271_v59, %v2819_v59   ;;  %v1797_v3 = vphi %v2269_v3, %v2818_v3  }
 0x160   : > { %v2745_v21 = vld [vmem:[#allocation65_spill] sm:$0xff]  ;;  %v2747_v19 = vld [vmem:[#allocation24_spill] sm:$0xff]  ;;  %v2749_v17 = vld [vmem:[#allocation22_spill] sm:$0xff]  ;;  %v1565_v9 = vcombine.high %v1910_v31, %v1916_v34  ;;  %v1579_v51 = vcombine.high %v1936_v44, %v1942_v47  ;;  %v1578_v58 = vcombine.low %v1936_v44, %v1942_v47  ;;  %v1573_v53 = vcombine.high %v1924_v38, %v1930_v41  ;;  %s1353_s30 = sshra.s32 %s1630_s29, 3  ;;  %s1631_s9 = sshll.u32 %s1351_s8, 4 }
 0x161   : > { %v2746_v20 = vld [vmem:[#allocation25_spill] sm:$0xff]  ;;  %v2748_v18 = vld [vmem:[#allocation72_spill] sm:$0xff]  ;;  %v2751_v15 = vld [vmem:[#allocation62_spill] sm:$0xff]  ;;  %1221 = vmatprep.subr.bf16.mxu0 %v1577_v6  ;;  %v1564_v62 = vcombine.low %v1910_v31, %v1916_v34  ;;  %v1572_v48 = vcombine.low %v1924_v38, %v1930_v41  ;;  %v1559_v61 = vcombine.high %v1898_v25, %v1904_v28  ;;  %v1567_v63 = vcombine.high %v1912_v32, %v1918_v35  ;;  %s1644_s6 = smul.u32 48, %s1353_s30  ;;  %s1364_s10 = sshra.s32 %s1631_s9, 3 }
 0x162   : > { %v2750_v16 = vld [vmem:[#allocation21_spill] sm:$0xff]  ;;  %v2752_v14 = vld [vmem:[#allocation19_spill] sm:$0xff]  ;;  %v2753_v13 = vld [vmem:[#allocation18_spill] sm:$0xff]  ;;  %1222 = vmatpush1.bf16.msra.mxu0 %v1576_v52  ;;  %1264 = vmatprep.subr.bf16.mxu1 %v1579_v51  ;;  %v1558_v55 = vcombine.low %v1898_v25, %v1904_v28  ;;  %v1566_v49 = vcombine.low %v1912_v32, %v1918_v35  ;;  %v1553_v60 = vcombine.high %v2747_v19, %v2744_v22  ;;  %s1645_s4 = smul.u32 48, %s1364_s10  ;;  %s734_s3 = sadd.s32 1, %s1809_s3  }
 0x163   : > { %v2754_v12 = vld [vmem:[#allocation70_spill] sm:$0xff]  ;;  %v2755_v11 = vld [vmem:[#allocation16_spill] sm:$0xff]  ;;  %v2756_v10 = vld [vmem:[#allocation15_spill] sm:$0xff]  ;;  %1223 = vmatprep.subr.bf16.mxu0 %v1571_v42  ;;  %1265 = vmatpush1.bf16.msra.mxu1 %v1578_v58  ;;  %v1561_v6 = vcombine.high %v1900_v26, %v1906_v29  ;;  %v2326_v52 = vpack.c.bf16 %v1793_v54, %v1801_v59  ;;  %v1552_v42 = vcombine.low %v2747_v19, %v2744_v22  ;;  %s2499_s7 = scalar_lea.vmem [#allocation2], %s1644_s6  ;;  %p731_p5 = scmp.ge.s32.totalorder %s734_s3, 8  }
 0x164   : > { %v2757_v8 = vld [vmem:[#allocation13_spill] sm:$0xff]  ;;  %v2758_v7 = vld [vmem:[#allocation12_spill] sm:$0xff]  ;;  %v2759_v5 = vld [vmem:[#allocation10_spill] sm:$0xff]  ;;  %1266 = vmatprep.subr.bf16.mxu1 %v1573_v53  ;;  %v1555_v51 = vcombine.high %v2746_v20, %v2743_v23  ;;  %v1546_v58 = vcombine.low %v2753_v13, %v2750_v16  ;;  %v1554_v53 = vcombine.low %v2746_v20, %v2743_v23  ;;  %s2507_s11 = scalar_lea.vmem [#allocation2], %s1645_s4 }
 0x165   : > { %v2760_v4 = vld [vmem:[#allocation9_spill] sm:$0xff]  ;;  %v2761_v2 = vld [vmem:[#allocation7_spill] sm:$0xff]  ;;  %v2762_v1 = vld [vmem:[#allocation6_spill] sm:$0xff]  ;;  %1253 = vmatprep.mubr.bf16.mxu0 %v2326_v52  ;;  %1296 = vmatprep.mubr.bf16.mxu1 %v2326_v52 }
 0x166   : > { %1224 = vmatpush1.bf16.msra.mxu0 %v1570_v57  ;;  %v1560_v57 = vcombine.low %v1900_v26, %v1906_v29  ;;  %v1363_v20 = vld [vmem:[%s2499_s7 + $0x40] sm:$0xff] }
 0x167   : > { %1225 = vmatprep.subr.bf16.mxu0 %v1565_v9  ;;  %1267 = vmatpush1.bf16.msra.mxu1 %v1572_v48  ;;  %v1547_v9 = vcombine.high %v2753_v13, %v2750_v16  ;;  %v1549_v48 = vcombine.high %v2752_v14, %v2749_v17 }
 0x168   : > { %1268 = vmatprep.subr.bf16.mxu1 %v1567_v63  ;;  %v1548_v63 = vcombine.low %v2752_v14, %v2749_v17  ;;  %v2805_v14 = vld [vmem:[#allocation64_spill] sm:$0xff] }
 0x16a   : > { %1226 = vmatpush1.bf16.msra.mxu0 %v1564_v62  ;;  %v1541_v62 = vcombine.high %v2758_v7, %v2756_v10 }
 0x16b   : > { %1227 = vmatprep.subr.bf16.mxu0 %v1559_v61  ;;  %1269 = vmatpush1.bf16.msra.mxu1 %v1566_v49  ;;  %v1540_v61 = vcombine.low %v2758_v7, %v2756_v10  ;;  %v1543_v49 = vcombine.high %v2757_v8, %v2755_v11 }
 0x16c   : > { %1270 = vmatprep.subr.bf16.mxu1 %v1561_v6  ;;  %v1542_v6 = vcombine.low %v2757_v8, %v2755_v11  ;;  %v2775_v8 = vld [vmem:[#allocation51_spill] sm:$0xff]  ;;  %v2779_v11 = vld [vmem:[#allocation45_spill] sm:$0xff] }
 0x16e   : > { %1228 = vmatpush1.bf16.msra.mxu0 %v1558_v55  ;;  %v1535_v55 = vcombine.high %v2762_v1, %v2760_v4 }
 0x16f   : > { %1229 = vmatprep.subr.bf16.mxu0 %v1553_v60  ;;  %1271 = vmatpush1.bf16.msra.mxu1 %v1560_v57  ;;  %v1534_v60 = vcombine.low %v2762_v1, %v2760_v4  ;;  %v1537_v57 = vcombine.high %v2761_v2, %v2759_v5  ;;  %v2769_v1 = vld [vmem:[#allocation50_spill] sm:$0xff]  ;;  %v2771_v4 = vld [vmem:[#allocation57_spill] sm:$0xff] }
 0x170   : > { %1272 = vmatprep.subr.bf16.mxu1 %v1555_v51  ;;  %v1536_v51 = vcombine.low %v2761_v2, %v2759_v5 }
 0x172   : > { %1230 = vmatpush1.bf16.msra.mxu0 %v1552_v42  ;;  %v1625_v42 = vcombine.high %v2030_v45, %v2036_v56 }
 0x173   : > { %1231 = vmatprep.subr.bf16.mxu0 %v1547_v9  ;;  %1273 = vmatpush1.bf16.msra.mxu1 %v1554_v53  ;;  %v1624_v9 = vcombine.low %v2030_v45, %v2036_v56  ;;  %v1627_v53 = vcombine.high %v2032_v30, %v2038_v36 }
 0x174   : > { %1274 = vmatprep.subr.bf16.mxu1 %v1549_v48  ;;  %v1626_v48 = vcombine.low %v2032_v30, %v2038_v36 }
 0x176   : > { %1232 = vmatpush1.bf16.msra.mxu0 %v1546_v58  ;;  %v1619_v58 = vcombine.high %v2018_v39, %v2024_v50 }
 0x177   : > { %1233 = vmatprep.subr.bf16.mxu0 %v1541_v62  ;;  %1275 = vmatpush1.bf16.msra.mxu1 %v1548_v63  ;;  %v1618_v62 = vcombine.low %v2018_v39, %v2024_v50  ;;  %v1621_v63 = vcombine.high %v2748_v18, %v2742_v24 }
 0x178   : > { %1276 = vmatprep.subr.bf16.mxu1 %v1543_v49  ;;  %v1620_v49 = vcombine.low %v2748_v18, %v2742_v24 }
 0x17a   : > { %1234 = vmatpush1.bf16.msra.mxu0 %v1540_v61  ;;  %v1613_v61 = vcombine.high %v2006_v27, %v2012_v33 }
 0x17b   : > { %1235 = vmatprep.subr.bf16.mxu0 %v1535_v55  ;;  %1277 = vmatpush1.bf16.msra.mxu1 %v1542_v6  ;;  %v1612_v55 = vcombine.low %v2006_v27, %v2012_v33  ;;  %v2763_v6 = vld [vmem:[#allocation68_spill] sm:$0xff] }
 0x17c   : > { %1278 = vmatprep.subr.bf16.mxu1 %v1537_v57  ;;  %v1606_v57 = vcombine.low %v2751_v15, %v2745_v21 }
 0x17e   : > { %1236 = vmatpush1.bf16.msra.mxu0 %v1534_v60  ;;  %v1607_v60 = vcombine.high %v2751_v15, %v2745_v21  ;;  %v2807_v15 = vld [vmem:[#allocation58_spill] sm:$0xff] }
 0x17f   : > { %1237 = vmatprep.subr.bf16.mxu0 %v1625_v42  ;;  %1279 = vmatpush1.bf16.msra.mxu1 %v1536_v51  ;;  %v1615_v42 = vcombine.high %v2763_v6, %v2754_v12  ;;  %v2764_v51 = vld [vmem:[#allocation59_spill] sm:$0xff] }
 0x180   : > { %1280 = vmatprep.subr.bf16.mxu1 %v1627_v53 }
 0x182   : > { %1238 = vmatpush2.bf16.msra.mxu0 %v1624_v9  ;;  %v1614_v9 = vcombine.low %v2763_v6, %v2754_v12  ;;  %v2773_v6 = vld [vmem:[#allocation44_spill] sm:$0xff] }
 0x183   : > { %1239 = vmatprep.subr.bf16.mxu0 %v1619_v58  ;;  %1281 = vmatpush2.bf16.msra.mxu1 %v1626_v48  ;;  %v2765_v58 = vld [vmem:[#allocation56_spill] sm:$0xff]  ;;  %v2767_v48 = vld [vmem:[#allocation63_spill] sm:$0xff] }
 0x184   : > { %1282 = vmatprep.subr.bf16.mxu1 %v1621_v63  ;;  %v1601_v53 = vcombine.high %v2765_v58, %v2764_v51  ;;  %v1600_v63 = vcombine.low %v2765_v58, %v2764_v51 }
 0x186   : > { %1240 = vmatpush2.bf16.msra.mxu0 %v1618_v62  ;;  %v2766_v62 = vld [vmem:[#allocation66_spill] sm:$0xff] }
 0x187   : > { %1241 = vmatprep.subr.bf16.mxu0 %v1613_v61  ;;  %1283 = vmatpush2.bf16.msra.mxu1 %v1620_v49  ;;  %v1609_v61 = vcombine.high %v2767_v48, %v2766_v62  ;;  %v2768_v49 = vld [vmem:[#allocation53_spill] sm:$0xff] }
 0x188   : > { %1284 = vmatprep.subr.bf16.mxu1 %v1615_v42  ;;  %v1595_v2 = vcombine.high %v2769_v1, %v2768_v49  ;;  %v1594_v42 = vcombine.low %v2769_v1, %v2768_v49  ;;  %v2777_v1 = vld [vmem:[#allocation38_spill] sm:$0xff] }
 0x18a   : > { %1242 = vmatpush2.bf16.msra.mxu0 %v1612_v55  ;;  %v1608_v55 = vcombine.low %v2767_v48, %v2766_v62 }
 0x18b   : > { %1243 = vmatprep.subr.bf16.mxu0 %v1607_v60  ;;  %1285 = vmatpush2.bf16.msra.mxu1 %v1614_v9  ;;  %v2770_v60 = vld [vmem:[#allocation60_spill] sm:$0xff]  ;;  %v2772_v9 = vld [vmem:[#allocation47_spill] sm:$0xff] }
 0x18c   : > { %1286 = vmatprep.subr.bf16.mxu1 %v1609_v61  ;;  %v1603_v5 = vcombine.high %v2771_v4, %v2770_v60  ;;  %v1589_v7 = vcombine.high %v2773_v6, %v2772_v9  ;;  %v1588_v61 = vcombine.low %v2773_v6, %v2772_v9  ;;  %v2781_v6 = vld [vmem:[#allocation36_spill] sm:$0xff]  ;;  %v2783_v9 = vld [vmem:[#allocation39_spill] sm:$0xff] }
 0x18e   : > { %1244 = vmatpush2.bf16.msra.mxu0 %v1606_v57  ;;  %v1602_v57 = vcombine.low %v2771_v4, %v2770_v60 }
 0x18f   : > { %1245 = vmatprep.subr.bf16.mxu0 %v1601_v53  ;;  %1287 = vmatpush2.bf16.msra.mxu1 %v1608_v55  ;;  %v2774_v53 = vld [vmem:[#allocation54_spill] sm:$0xff]  ;;  %v2776_v55 = vld [vmem:[#allocation41_spill] sm:$0xff] }
 0x190   : > { %1288 = vmatprep.subr.bf16.mxu1 %v1603_v5  ;;  %v1597_v10 = vcombine.high %v2775_v8, %v2774_v53  ;;  %v1583_v4 = vcombine.high %v2777_v1, %v2776_v55  ;;  %v1582_v5 = vcombine.low %v2777_v1, %v2776_v55  ;;  %v2785_v1 = vld [vmem:[#allocation34_spill] sm:$0xff] }
 0x192   : > { %1246 = vmatpush2.bf16.msra.mxu0 %v1600_v63  ;;  %v1596_v63 = vcombine.low %v2775_v8, %v2774_v53 }
 0x193   : > { %1247 = vmatprep.subr.bf16.mxu0 %v1595_v2  ;;  %1289 = vmatpush2.bf16.msra.mxu1 %v1602_v57  ;;  %v2778_v2 = vld [vmem:[#allocation48_spill] sm:$0xff]  ;;  %v2780_v57 = vld [vmem:[#allocation37_spill] sm:$0xff] }
 0x194   : > { %1290 = vmatprep.subr.bf16.mxu1 %v1597_v10  ;;  %v1591_v12 = vcombine.high %v2779_v11, %v2778_v2  ;;  %v1581_v8 = vcombine.high %v2781_v6, %v2780_v57  ;;  %v2428_v10 = vpack.c.bf16 %v1797_v3, %v1805_v0 }
 0x196   : > { %1248 = vmatpush2.bf16.msra.mxu0 %v1594_v42  ;;  %v1590_v42 = vcombine.low %v2779_v11, %v2778_v2  ;;  %v2787_v11 = vld [vmem:[#allocation32_spill] sm:$0xff] }
 0x197   : > { %1249 = vmatprep.subr.bf16.mxu0 %v1589_v7  ;;  %1291 = vmatpush2.bf16.msra.mxu1 %v1596_v63  ;;  %v2782_v7 = vld [vmem:[#allocation42_spill] sm:$0xff] }
 0x198   : > { %1292 = vmatprep.subr.bf16.mxu1 %v1591_v12  ;;  %v1585_v13 = vcombine.high %v2783_v9, %v2782_v7  ;;  %v1584_v63 = vcombine.low %v2783_v9, %v2782_v7  ;;  %v2793_v7 = vld [vmem:[#allocation20_spill] sm:$0xff]  ;;  %v2795_v9 = vld [vmem:[#allocation14_spill] sm:$0xff] }
 0x19a   : > { %1250 = vmatpush2.bf16.msra.mxu0 %v1588_v61  ;;  %v1580_v61 = vcombine.low %v2781_v6, %v2780_v57 }
 0x19b   : > { %1251 = vmatprep.subr.bf16.mxu0 %v1583_v4  ;;  %1293 = vmatpush2.bf16.msra.mxu1 %v1590_v42  ;;  %v2784_v4 = vld [vmem:[#allocation35_spill] sm:$0xff]  ;;  %v2789_v42 = vld [vmem:[#allocation30_spill] sm:$0xff] }
 0x19c   : > { %v1575_v2 = vcombine.high %v2785_v1, %v2784_v4  ;;  %1294 = vmatprep.subr.bf16.mxu1 %v1585_v13  ;;  %v1574_v12 = vcombine.low %v2785_v1, %v2784_v4  ;;  %v2788_v13 = vld [vmem:[#allocation31_spill] sm:$0xff]  ;;  %v2791_v1 = vld [vmem:[#allocation26_spill] sm:$0xff] }
 0x19e   : > { %1252 = vmatpush2.bf16.msra.mxu0 %v1582_v5  ;;  %v2786_v5 = vld [vmem:[#allocation33_spill] sm:$0xff] }
 0x19f   : > { %1307 = vmatprep.subr.bf16.mxu0 %v1581_v8  ;;  %1295 = vmatpush2.bf16.msra.mxu1 %v1584_v63  ;;  %v1569_v6 = vcombine.high %v2787_v11, %v2786_v5  ;;  %v1568_v8 = vcombine.low %v2787_v11, %v2786_v5  ;;  %v1562_v63 = vcombine.low %v2789_v42, %v2788_v13 }
 0x1a1   : > { %1254 = vmatmul.mubr.bf16.vlgmr.msra.gmra.mxu0 %v2428_v10 }
 0x1a2   : > { %1308 = vmatpush1.bf16.msra.mxu0 %v1580_v61  ;;  %1339 = vmatprep.mubr.bf16.mxu0 %v2326_v52  ;;  %v1563_v61 = vcombine.high %v2789_v42, %v2788_v13  ;;  %v2797_v13 = vld [vmem:[#allocation8_spill] sm:$0xff] }
 0x1a3   : > { %1309 = vmatprep.subr.bf16.mxu0 %v1575_v2  ;;  %1297 = vmatmul.mubr.bf16.vlgmr.msra.gmra.mxu1 %v2428_v10  ;;  %v2790_v2 = vld [vmem:[#allocation29_spill] sm:$0xff] }
 0x1a4   : > { %v1557_v4 = vcombine.high %v2791_v1, %v2790_v2  ;;  %v1556_v52 = vcombine.low %v2791_v1, %v2790_v2  ;;  %v2799_v2 = vld [vmem:[#allocation76_spill] sm:$0xff] }
 0x1a6   : > { %1310 = vmatpush1.bf16.msra.mxu0 %v1574_v12  ;;  %v2792_v12 = vld [vmem:[#allocation23_spill] sm:$0xff] }
 0x1a7   : > { %1311 = vmatprep.subr.bf16.mxu0 %v1569_v6  ;;  %v1551_v5 = vcombine.high %v2793_v7, %v2792_v12  ;;  %v1550_v6 = vcombine.low %v2793_v7, %v2792_v12  ;;  %v2801_v12 = vld [vmem:[#allocation73_spill] sm:$0xff] }
 0x1aa   : > { %1312 = vmatpush1.bf16.msra.mxu0 %v1568_v8  ;;  %v2794_v8 = vld [vmem:[#allocation17_spill] sm:$0xff] }
 0x1ab   : > { %1313 = vmatprep.subr.bf16.mxu0 %v1563_v61  ;;  %v1545_v11 = vcombine.high %v2795_v9, %v2794_v8  ;;  %v1544_v61 = vcombine.low %v2795_v9, %v2794_v8  ;;  %v2803_v9 = vld [vmem:[#allocation69_spill] sm:$0xff] }
 0x1ae   : > { %1314 = vmatpush1.bf16.msra.mxu0 %v1562_v63  ;;  %v2796_v63 = vld [vmem:[#allocation11_spill] sm:$0xff] }
 0x1af   : > { %1315 = vmatprep.subr.bf16.mxu0 %v1557_v4  ;;  %v1539_v1 = vcombine.high %v2797_v13, %v2796_v63  ;;  %v1538_v4 = vcombine.low %v2797_v13, %v2796_v63 }
 0x1b2   : > { %1316 = vmatpush1.bf16.msra.mxu0 %v1556_v52  ;;  %v2798_v52 = vld [vmem:[#allocation77_spill] sm:$0xff] }
 0x1b3   : > { %1317 = vmatprep.subr.bf16.mxu0 %v1551_v5  ;;  %v1629_v7 = vcombine.high %v2799_v2, %v2798_v52  ;;  %v1628_v5 = vcombine.low %v2799_v2, %v2798_v52 }
 0x1b6   : > { %1318 = vmatpush1.bf16.msra.mxu0 %v1550_v6  ;;  %v2800_v6 = vld [vmem:[#allocation75_spill] sm:$0xff] }
 0x1b7   : > { %1319 = vmatprep.subr.bf16.mxu0 %v1545_v11  ;;  %v1623_v8 = vcombine.high %v2801_v12, %v2800_v6  ;;  %v1622_v11 = vcombine.low %v2801_v12, %v2800_v6  ;;  %v2810_v12 = vld [vmem:[#allocation49_spill] sm:$0xff] }
 0x1ba   : > { %1320 = vmatpush1.bf16.msra.mxu0 %v1544_v61  ;;  %v2802_v61 = vld [vmem:[#allocation71_spill] sm:$0xff] }
 0x1bb   : > { %1321 = vmatprep.subr.bf16.mxu0 %v1539_v1  ;;  %v1617_v13 = vcombine.high %v2803_v9, %v2802_v61  ;;  %v1616_v1 = vcombine.low %v2803_v9, %v2802_v61  ;;  %v2809_v9 = vld [vmem:[#allocation52_spill] sm:$0xff] }
 0x1be   : > { %1322 = vmatpush1.bf16.msra.mxu0 %v1538_v4  ;;  %v2804_v4 = vld [vmem:[#allocation67_spill] sm:$0xff] }
 0x1bf   : > { %1323 = vmatprep.subr.bf16.mxu0 %v1629_v7  ;;  %v1611_v2 = vcombine.high %v2805_v14, %v2804_v4  ;;  %v1610_v7 = vcombine.low %v2805_v14, %v2804_v4  ;;  %v2811_v4 = vld [vmem:[#allocation46_spill] sm:$0xff]  ;;  %v2812_v14 = vld [vmem:[#allocation43_spill] sm:$0xff] }
 0x1c2   : > { %1324 = vmatpush2.bf16.msra.mxu0 %v1628_v5  ;;  %v2806_v5 = vld [vmem:[#allocation61_spill] sm:$0xff] }
 0x1c3   : > { %1325 = vmatprep.subr.bf16.mxu0 %v1623_v8  ;;  %v1605_v6 = vcombine.high %v2807_v15, %v2806_v5  ;;  %v1604_v8 = vcombine.low %v2807_v15, %v2806_v5  ;;  %v2813_v5 = vld [vmem:[#allocation40_spill] sm:$0xff] }
 0x1c4   : > { %v1587_v15 = vcombine.high %v2813_v5, %v2812_v14 }
 0x1c6   : > { %1326 = vmatpush2.bf16.msra.mxu0 %v1622_v11  ;;  %v2808_v11 = vld [vmem:[#allocation55_spill] sm:$0xff] }
 0x1c7   : > { %1327 = vmatprep.subr.bf16.mxu0 %v1617_v13  ;;  %v1599_v13 = vcombine.high %v2809_v9, %v2808_v11 }
 0x1ca   : > { %1328 = vmatpush2.bf16.msra.mxu0 %v1616_v1  ;;  %v1598_v1 = vcombine.low %v2809_v9, %v2808_v11 }
 0x1cb   : > { %1329 = vmatprep.subr.bf16.mxu0 %v1611_v2  ;;  %v1593_v2 = vcombine.high %v2811_v4, %v2810_v12 }
 0x1ce   : > { %1330 = vmatpush2.bf16.msra.mxu0 %v1610_v7  ;;  %v1592_v7 = vcombine.low %v2811_v4, %v2810_v12  ;;  %v1362_v12 = vld [vmem:[%s2499_s7 + $0x38] sm:$0xff] }
 0x1cf   : > { %1331 = vmatprep.subr.bf16.mxu0 %v1605_v6  ;;  %v1586_v6 = vcombine.low %v2813_v5, %v2812_v14 }
 0x1d2   : > { %1332 = vmatpush2.bf16.msra.mxu0 %v1604_v8  ;;  %v1358_v8 = vld [vmem:[%s2499_s7] sm:$0xff] }
 0x1d3   : > { %1333 = vmatprep.subr.bf16.mxu0 %v1599_v13 }
 0x1d6   : > { %1334 = vmatpush2.bf16.msra.mxu0 %v1598_v1 }
 0x1d7   : > { %1335 = vmatprep.subr.bf16.mxu0 %v1593_v2 }
 0x1da   : > { %1336 = vmatpush2.bf16.msra.mxu0 %v1592_v7  ;;  %v1361_v7 = vld [vmem:[%s2499_s7 + $0x30] sm:$0xff] }
 0x1db   : > { %1337 = vmatprep.subr.bf16.mxu0 %v1587_v15  ;;  %v1359_v15 = vld [vmem:[%s2499_s7 + $0x8] sm:$0xff] }
 0x1de   : > { %1338 = vmatpush2.bf16.msra.mxu0 %v1586_v6 }
 0x1e1   : > { %1340 = vmatmul.mubr.bf16.vlgmr.msra.gmra.mxu0 %v2428_v10 }
 0x261   : > { %v1255_v13 = vpop.f32.mrf.mxu0 }
 0x262   : > { %v1375_v1 = vadd.f32 %v1358_v8, %v1255_v13 }
 0x263   : > { %v1257_v2 = vpop.f32.mrf.mxu0 }
 0x264   : > { %v1634_v4 = vmul.f32 -1.442695, %v1375_v1  ;;  %v1389_v5 = vadd.f32 %v1359_v15, %v1257_v2  ;;  %v1298_v1 = vpop.f32.mrf.mxu1  ;;  %v1360_v15 = vld [vmem:[%s2499_s7 + $0x10] sm:$0xff] }
 0x265   : > { %v1259_v6 = vpop.f32.mrf.mxu0 }
 0x266   : > { %1709 = vpow2.f32 %v1634_v4  ;;  %v1376_v10 = vadd.f32 %v1361_v7, %v1259_v6  ;;  %v1636_v16 = vmul.f32 -1.442695, %v1389_v5  ;;  %v1300_v7 = vpop.f32.mrf.mxu1  ;;  %v2814_v5 = vld [vmem:[#allocation78_spill] sm:$0xff] }
 0x267   : > { %v1261_v11 = vpop.f32.mrf.mxu0 }
 0x268   : > { %v1635_v9 = vmul.f32 -1.442695, %v1376_v10  ;;  %v1390_v14 = vadd.f32 %v1362_v12, %v1261_v11 }
 0x26a   : > { %1711 = vpow2.f32 %v1635_v9  ;;  %v1637_v17 = vmul.f32 -1.442695, %v1390_v14  ;;  %v1403_v14 = vadd.f32 %v2814_v5, %v1298_v1 }
 0x26b   : > { %1713 = vpow2.f32 %v1636_v16  ;;  %v1369_v16 = vld [vmem:[%s2507_s11 + $0x18] sm:$0xff] }
 0x26c   : > { %1715 = vpow2.f32 %v1637_v17  ;;  %v1302_v17 = vpop.f32.mrf.mxu1  ;;  %v1419_v6 = vadd.f32 %v1369_v16, %v1300_v7 }
 0x26e   : > { %v1638_v1 = vmul.f32 -1.442695, %v1419_v6 }
 0x273   : > { %v1710_v18 = vpop.eup %1709 }
 0x274   : > { %v1383_v8 = vadd.f32 1.0, %v1710_v18 }
 0x276   : > { %1717 = vrcp.f32 %v1383_v8  ;;  %v1404_v8 = vadd.f32 %v2814_v5, %v1302_v17 }
 0x277   : > { %v1712_v13 = vpop.eup %1711 }
 0x278   : > { %v1384_v4 = vadd.f32 1.0, %v1712_v13  ;;  %v1714_v2 = vpop.eup %1713 }
 0x279   : > { %v1716_v9 = vpop.eup %1715  ;;  %v1397_v12 = vadd.f32 1.0, %v1714_v2  ;;  %v1372_v2 = vld [vmem:[%s2507_s11 + $0x48] sm:$0xff] }
 0x27a   : > { %1719 = vrcp.f32 %v1384_v4  ;;  %v1398_v11 = vadd.f32 1.0, %v1716_v9  ;;  %v1304_v4 = vpop.f32.mrf.mxu1 }
 0x27b   : > { %1721 = vrcp.f32 %v1397_v12  ;;  %v1420_v22 = vadd.f32 %v1372_v2, %v1304_v4 }
 0x27c   : > { %1723 = vrcp.f32 %v1398_v11 }
 0x27d   : > { %v1639_v9 = vmul.f32 -1.442695, %v1420_v22 }
 0x283   : > { %v1718_v18 = vpop.eup %1717 }
 0x284   : > { %v1405_v10 = vmul.f32 %v1718_v18, %v1403_v14 }
 0x286   : > { %v1407_v13 = vadd.f32 %v1405_v10, %v1360_v15  ;;  %v1370_v10 = vld [vmem:[%s2507_s11 + $0x20] sm:$0xff] }
 0x287   : > { %v1720_v19 = vpop.eup %1719 }
 0x288   : > { %1725 = vtanh.f32 %v1407_v13  ;;  %v1406_v21 = vmul.f32 %v1720_v19, %v1404_v8  ;;  %v1722_v24 = vpop.eup %1721 }
 0x289   : > { %1727 = vpow2.f32 %v1638_v1  ;;  %v1724_v7 = vpop.eup %1723  ;;  %v1411_v12 = vsub.f32 1.0, %v1722_v24  ;;  %v1415_v16 = vmul.f32 %v1805_v0, %v1722_v24  ;;  %v1373_v24 = vld [vmem:[%s2507_s11 + $0x50] sm:$0xff] }
 0x28a   : > { %v1408_v23 = vadd.f32 %v1406_v21, %v1363_v20  ;;  %v1412_v11 = vsub.f32 1.0, %v1724_v7  ;;  %v1416_v19 = vmul.f32 %v1797_v3, %v1724_v7  ;;  %v2815_v3 = vld [vmem:[#allocation79_spill] sm:$0xff] }
 0x28b   : > { %v2816_v7 = vmov %v2815_v3 }
 0x28c   : > { %1729 = vtanh.f32 %v1408_v23 }
 0x28d   : > { %1731 = vpow2.f32 %v1639_v9 }
 0x295   : > { %v1726_v14 = vpop.eup %1725 }
 0x296   : > { %v1413_v17 = vmul.f32 %v1726_v14, %v1411_v12  ;;  %v1728_v18 = vpop.eup %1727 }
 0x297   : > { %v1427_v21 = vadd.f32 1.0, %v1728_v18 }
 0x298   : > { %v1417_v15 = vadd.f32 %v1415_v16, %v1413_v17  }
 0x299   : > { %v1730_v6 = vpop.eup %1729  ;;  %1733 = vrcp.f32 %v1427_v21 }
 0x29a   : > { %v1414_v20 = vmul.f32 %v1730_v6, %v1412_v11  ;;  %v1732_v22 = vpop.eup %1731  ;;  %v1371_v11 = vld [vmem:[%s2507_s11 + $0x28] sm:$0xff]  ;;  %1463 = vst [vmem:[%s2552_s5] sm:$0xff] (%p731_p5), %v1417_v15 }
 0x29b   : > { %v1428_v8 = vadd.f32 1.0, %v1732_v22 }
 0x29c   : > { %v1418_v23 = vadd.f32 %v1416_v19, %v1414_v20  }
 0x29d   : > { %1735 = vrcp.f32 %v1428_v8  ;;  %v1374_v8 = vld [vmem:[%s2507_s11 + $0x58] sm:$0xff] }
 0x29e   :  { %1464 = vst [vmem:[%s2552_s5 + $0x8] sm:$0xff] (%p731_p5), %v1418_v23 }
 0x2a1   : > { %v1341_v13 = vpop.f32.mrf.mxu0 }
 0x2a2   : > { %v1433_v4 = vadd.f32 %v1370_v10, %v1341_v13 }
 0x2a3   : > { %v1343_v2 = vpop.f32.mrf.mxu0 }
 0x2a4   : > { %v1640_v0 = vmul.f32 -1.442695, %v1433_v4  ;;  %v1447_v14 = vadd.f32 %v2815_v3, %v1343_v2 }
 0x2a5   : > { %v1345_v1 = vpop.f32.mrf.mxu0 }
 0x2a6   : > { %1737 = vpow2.f32 %v1640_v0  ;;  %v1434_v9 = vadd.f32 %v1373_v24, %v1345_v1  ;;  %v1734_v16 = vpop.eup %1733 }
 0x2a7   : > { %v1347_v17 = vpop.f32.mrf.mxu0  ;;  %v1449_v18 = vmul.f32 %v1734_v16, %v1447_v14 }
 0x2a8   : > { %v1641_v12 = vmul.f32 -1.442695, %v1434_v9  ;;  %v1448_v6 = vadd.f32 %v2816_v7, %v1347_v17 }
 0x2a9   : > { %v1451_v22 = vadd.f32 %v1449_v18, %v1371_v11 }
 0x2aa   : > { %1739 = vpow2.f32 %v1641_v12  ;;  %v1736_v19 = vpop.eup %1735 }
 0x2ab   : > { %v1450_v10 = vmul.f32 %v1736_v19, %v1448_v6 }
 0x2ad   : > { %v1452_v24 = vadd.f32 %v1450_v10, %v1374_v8 }
 0x2b3   : > { %v1738_v20 = vpop.eup %1737 }
 0x2b4   : > { %v1441_v21 = vadd.f32 1.0, %v1738_v20 }
 0x2b6   : > { %1741 = vrcp.f32 %v1441_v21 }
 0x2b7   : > { %v1740_v13 = vpop.eup %1739  ;;  %1743 = vtanh.f32 %v1451_v22 }
 0x2b8   : > { %v1442_v4 = vadd.f32 1.0, %v1740_v13 }
 0x2ba   : > { %1745 = vrcp.f32 %v1442_v4 }
 0x2bb   : > { %1747 = vtanh.f32 %v1452_v24 }
 0x2c3   : > { %v1742_v2 = vpop.eup %1741 }
 0x2c4   : > { %v1455_v0 = vsub.f32 1.0, %v1742_v2  ;;  %v1744_v1 = vpop.eup %1743  ;;  %v1459_v9 = vmul.f32 %v1801_v59, %v1742_v2 }
 0x2c6   : > { %v1457_v12 = vmul.f32 %v1744_v1, %v1455_v0  ;;  %v2820_v0 = vmov %v1417_v15 }
 0x2c7   : > { %v1746_v3 = vpop.eup %1745 }
 0x2c8   : > { %v1461_v14 = vadd.f32 %v1459_v9, %v1457_v12   ;;  %v1456_v16 = vsub.f32 1.0, %v1746_v3  ;;  %v1748_v17 = vpop.eup %1747  ;;  %v1460_v18 = vmul.f32 %v1793_v54, %v1746_v3  ;;  %v2818_v3 = vmov %v1418_v23 }
 0x2ca   : > { %v1458_v11 = vmul.f32 %v1748_v17, %v1456_v16  ;;  %v2819_v59 = vmov %v1461_v14  ;;  %733 = sbr.rel (!%p731_p5) target bundleno = 351 (0x15f), region = 54  ;;  %1642 = vst [vmem:[%s2552_s5 + $0x10] sm:$0xff] (%p731_p5), %v1461_v14 }
 0x2cc   : > { %v1462_v6 = vadd.f32 %v1460_v18, %v1458_v11  }
 0x2ce   : > { %v2817_v54 = vmov %v1462_v6  ;;  %1643 = vst [vmem:[%s2552_s5 + $0x18] sm:$0xff] (%p731_p5), %v1462_v6 }
 0x2cf   :  { %1472 = vsyncpa [#allocation4], 1 }

// kernel: mil_answer_trigger_forward.3
= control target key start
LH: loop header
LB: loop body
LE: loop exit
PB: predicated region body
PF: predicated region fallthrough
CT: control target
= control target key end

     0   :  { %v1771_v1 = vmov 0   ;;  %vm145_vm0 = vcmask 130048   ;;  %v45_v63 = vlaneseq  ;;  %s2789_s1 = inlined_call_operand.vmem [shape: bf16[16,768], index: 1, kind: input, shape index: {}]   ;;  %s2790_s5 = inlined_call_operand.vmem [shape: f32[2,16,128], index: 5, kind: output, shape index: {}]   ;;  %s2791_s0 = inlined_call_operand.vmem [shape: bf16[8,16,16], index: 0, kind: input, shape index: {}]   ;;  %s2792_s2 = inlined_call_operand.vmem [shape: bf16[256,768], index: 2, kind: input, shape index: {}]   ;;  %s2793_s3 = inlined_call_operand.vmem [shape: f32[1,768], index: 3, kind: input, shape index: {}]   ;;  %s2794_s4 = inlined_call_operand.vmem [shape: f32[1,256], index: 4, kind: input, shape index: {}]  }
   0x1   :  { %v1674_v0 = vld [vmem:[%s2789_s1 + $0x4] ss:$24 sps:$4 sm:$0xff]   ;;  %202 = vmatprep.mubr.bf16.mxu0 %v1771_v1  ;;  %242 = vmatprep.mubr.bf16.mxu1 %v1771_v1  ;;  %v1676_v2 = vld [vmem:[%s2789_s1] ss:$24 sps:$4 sm:$0xff]   ;;  %v1682_v7 = vld [vmem:[%s2789_s1 + $0x10] ss:$24 sps:$4 sm:$0xff]  }
   0x2   :  { %184 = vmatprep.subr.bf16.mxu0 %v1674_v0  ;;  %1631 = vmatprep.subr.bf16.mxu1 %v1674_v0  ;;  %v1677_v3 = vld [vmem:[%s2791_s0] sm:$0xff]   ;;  %v1684_v8 = vld [vmem:[%s2789_s1 + $0x14] ss:$24 sps:$4 sm:$0xff]   ;;  %v1689_v13 = vld [vmem:[%s2791_s0 + $0x18] sm:$0xff]  }
   0x3   :  { %185 = vmatpush1.bf16.msra.mxu0 %v1676_v2  ;;  %1632 = vmatpush1.bf16.msra.mxu1 %v1676_v2  ;;  %v1678_v4 = vld [vmem:[%s2791_s0 + $0x20] sm:$0xff]   ;;  %v1685_v9 = vld [vmem:[%s2791_s0 + $0x8] sm:$0xff]   ;;  %v1687_v11 = vld [vmem:[%s2791_s0 + $0x10] sm:$0xff]  }
   0x4   :  { %v1679_v5 = vld [vmem:[%s2789_s1 + $0x8] ss:$24 sps:$4 sm:$0xff]   ;;  %v1681_v6 = vld [vmem:[%s2789_s1 + $0xc] ss:$24 sps:$4 sm:$0xff]   ;;  %410 = vmatprep.subr.bf16.mxu0 %v1684_v8  ;;  %v1688_v12 = vld [vmem:[%s2791_s0 + $0x30] sm:$0xff]  }
   0x5   :  { %297 = vmatprep.subr.bf16.mxu1 %v1681_v6  ;;  %v1686_v10 = vld [vmem:[%s2791_s0 + $0x28] sm:$0xff]   ;;  %v1690_v14 = vld [vmem:[%s2791_s0 + $0x38] sm:$0xff]   ;;  %v1895_v15 = vld [vmem:[%s2792_s2] sm:$0xff] }
   0x6   :  { %1493 = vmatmul.mubr.msk.bf16.vlgmr.msra.gmra.mxu0 %vm145_vm0, %v1677_v3  ;;  %1497 = vmatmul.mubr.msk.bf16.vlgmr.msra.gmra.mxu1 %vm145_vm0, %v1678_v4  ;;  %2907 = vst [vmem:[#allocation3_spill] sm:$0xff] %v1895_v15  ;;  %v1900_v16 = vld [vmem:[%s2792_s2 + $0x8] sm:$0xff]  ;;  %v1905_v17 = vld [vmem:[%s2792_s2 + $0x10] sm:$0xff]  ;;  %v1910_v18 = vld [vmem:[%s2792_s2 + $0x18] sm:$0xff] }
   0x7   :  { %298 = vmatpush1.bf16.msra.mxu1 %v1679_v5  ;;  %411 = vmatpush1.bf16.msra.mxu0 %v1682_v7  ;;  %2908 = vst [vmem:[#allocation4_spill] sm:$0xff] %v1900_v16  ;;  %2909 = vst [vmem:[#allocation5_spill] sm:$0xff] %v1905_v17  ;;  %v1915_v19 = vld [vmem:[%s2792_s2 + $0x20] sm:$0xff]  ;;  %v1920_v20 = vld [vmem:[%s2792_s2 + $0x28] sm:$0xff] }
   0x8   :  { %212 = vmatprep.mubr.bf16.mxu0 %v1771_v1  ;;  %252 = vmatprep.mubr.bf16.mxu1 %v1771_v1  ;;  %2910 = vst [vmem:[#allocation6_spill] sm:$0xff] %v1910_v18  ;;  %2911 = vst [vmem:[#allocation7_spill] sm:$0xff] %v1915_v19  ;;  %v1925_v21 = vld [vmem:[%s2792_s2 + $0x30] sm:$0xff]  ;;  %v1930_v22 = vld [vmem:[%s2792_s2 + $0x38] sm:$0xff] }
   0x9   :  { %2912 = vst [vmem:[#allocation8_spill] sm:$0xff] %v1920_v20  ;;  %2913 = vst [vmem:[#allocation9_spill] sm:$0xff] %v1925_v21  ;;  %v1935_v23 = vld [vmem:[%s2792_s2 + $0x40] sm:$0xff]  ;;  %v1940_v24 = vld [vmem:[%s2792_s2 + $0x48] sm:$0xff] }
   0xa   :  { %2914 = vst [vmem:[#allocation10_spill] sm:$0xff] %v1930_v22  ;;  %2915 = vst [vmem:[#allocation11_spill] sm:$0xff] %v1935_v23  ;;  %v1945_v25 = vld [vmem:[%s2792_s2 + $0x50] sm:$0xff]  ;;  %v1950_v26 = vld [vmem:[%s2792_s2 + $0x58] sm:$0xff] }
   0xb   :  { %2916 = vst [vmem:[#allocation12_spill] sm:$0xff] %v1940_v24  ;;  %2917 = vst [vmem:[#allocation13_spill] sm:$0xff] %v1950_v26  ;;  %v1955_v27 = vld [vmem:[%s2792_s2 + $0x60] sm:$0xff]  ;;  %v1960_v28 = vld [vmem:[%s2792_s2 + $0x68] sm:$0xff] }
   0xc   :  { %v1965_v29 = vld [vmem:[%s2792_s2 + $0x70] sm:$0xff]  ;;  %v1970_v30 = vld [vmem:[%s2792_s2 + $0x78] sm:$0xff]  ;;  %v1975_v31 = vld [vmem:[%s2792_s2 + $0x80] sm:$0xff] }
   0xd   :  { %2918 = vst [vmem:[#allocation14_spill] sm:$0xff] %v1965_v29  ;;  %v1980_v32 = vld [vmem:[%s2792_s2 + $0x88] sm:$0xff]  ;;  %v1985_v33 = vld [vmem:[%s2792_s2 + $0x90] sm:$0xff]  ;;  %v1990_v34 = vld [vmem:[%s2792_s2 + $0x98] sm:$0xff] }
   0xe   :  { %1494 = vmatmul.mubr.msk.bf16.gmra.mxu0 %vm145_vm0, %v1685_v9  ;;  %1498 = vmatmul.mubr.msk.bf16.gmra.mxu1 %vm145_vm0, %v1686_v10  ;;  %2919 = vst [vmem:[#allocation15_spill] sm:$0xff] %v1980_v32  ;;  %v1995_v35 = vld [vmem:[%s2792_s2 + $0xa0] sm:$0xff]  ;;  %v2000_v36 = vld [vmem:[%s2792_s2 + $0xa8] sm:$0xff]  ;;  %v2005_v37 = vld [vmem:[%s2792_s2 + $0xb0] sm:$0xff] }
   0xf   :  { %222 = vmatprep.mubr.bf16.mxu0 %v1771_v1  ;;  %262 = vmatprep.mubr.bf16.mxu1 %v1771_v1  ;;  %2920 = vst [vmem:[#allocation16_spill] sm:$0xff] %v1995_v35  ;;  %v2010_v38 = vld [vmem:[%s2792_s2 + $0xb8] sm:$0xff]  ;;  %v2015_v39 = vld [vmem:[%s2792_s2 + $0xc0] sm:$0xff]  ;;  %v2020_v40 = vld [vmem:[%s2792_s2 + $0xc8] sm:$0xff] }
  0x10   :  { %2921 = vst [vmem:[#allocation17_spill] sm:$0xff] %v2010_v38  ;;  %v2025_v41 = vld [vmem:[%s2792_s2 + $0xd0] sm:$0xff]  ;;  %v2030_v42 = vld [vmem:[%s2792_s2 + $0xd8] sm:$0xff]  ;;  %v2035_v43 = vld [vmem:[%s2792_s2 + $0xe0] sm:$0xff] }
  0x11   :  { %2922 = vst [vmem:[#allocation18_spill] sm:$0xff] %v2025_v41  ;;  %v2040_v44 = vld [vmem:[%s2792_s2 + $0xe8] sm:$0xff]  ;;  %v2045_v45 = vld [vmem:[%s2792_s2 + $0xf0] sm:$0xff]  ;;  %v2050_v46 = vld [vmem:[%s2792_s2 + $0xf8] sm:$0xff] }
  0x12   :  { %2923 = vst [vmem:[#allocation19_spill] sm:$0xff] %v2040_v44  ;;  %v2055_v47 = vld [vmem:[%s2792_s2 + $0x100] sm:$0xff]  ;;  %v2060_v48 = vld [vmem:[%s2792_s2 + $0x108] sm:$0xff]  ;;  %v2065_v49 = vld [vmem:[%s2792_s2 + $0x110] sm:$0xff] }
  0x13   :  { %2924 = vst [vmem:[#allocation20_spill] sm:$0xff] %v2055_v47  ;;  %v2070_v50 = vld [vmem:[%s2792_s2 + $0x118] sm:$0xff]  ;;  %v2075_v51 = vld [vmem:[%s2792_s2 + $0x120] sm:$0xff]  ;;  %v2080_v52 = vld [vmem:[%s2792_s2 + $0x128] sm:$0xff] }
  0x14   :  { %2925 = vst [vmem:[#allocation21_spill] sm:$0xff] %v2070_v50  ;;  %v2085_v53 = vld [vmem:[%s2792_s2 + $0x130] sm:$0xff]  ;;  %v2090_v54 = vld [vmem:[%s2792_s2 + $0x138] sm:$0xff]  ;;  %v2095_v55 = vld [vmem:[%s2792_s2 + $0x140] sm:$0xff] }
  0x15   :  { %2926 = vst [vmem:[#allocation22_spill] sm:$0xff] %v2085_v53  ;;  %v2100_v56 = vld [vmem:[%s2792_s2 + $0x148] sm:$0xff]  ;;  %v2105_v57 = vld [vmem:[%s2792_s2 + $0x150] sm:$0xff]  ;;  %v2110_v58 = vld [vmem:[%s2792_s2 + $0x158] sm:$0xff] }
  0x16   :  { %1495 = vmatmul.mubr.msk.bf16.gmra.mxu0 %vm145_vm0, %v1687_v11  ;;  %1499 = vmatmul.mubr.msk.bf16.gmra.mxu1 %vm145_vm0, %v1688_v12  ;;  %2927 = vst [vmem:[#allocation23_spill] sm:$0xff] %v2100_v56  ;;  %v2115_v59 = vld [vmem:[%s2792_s2 + $0x160] sm:$0xff]  ;;  %v2120_v60 = vld [vmem:[%s2792_s2 + $0x168] sm:$0xff]  ;;  %v2125_v61 = vld [vmem:[%s2792_s2 + $0x170] sm:$0xff] }
  0x17   :  { %232 = vmatprep.mubr.bf16.mxu0 %v1771_v1  ;;  %272 = vmatprep.mubr.bf16.mxu1 %v1771_v1  ;;  %2928 = vst [vmem:[#allocation24_spill] sm:$0xff] %v2115_v59  ;;  %v2130_v62 = vld [vmem:[%s2792_s2 + $0x178] sm:$0xff]  ;;  %v2135_v0 = vld [vmem:[%s2792_s2 + $0x180] sm:$0xff]  ;;  %v2145_v2 = vld [vmem:[%s2792_s2 + $0x190] sm:$0xff] }
  0x18   :  { %2929 = vst [vmem:[#allocation25_spill] sm:$0xff] %v2130_v62  ;;  %2930 = vst [vmem:[#allocation26_spill] sm:$0xff] %v2135_v0  ;;  %v2160_v5 = vld [vmem:[%s2792_s2 + $0x1a8] sm:$0xff]  ;;  %v2165_v6 = vld [vmem:[%s2792_s2 + $0x1b0] sm:$0xff] }
  0x19   :  { %2932 = vst [vmem:[#allocation28_spill] sm:$0xff] %v2145_v2  ;;  %2935 = vst [vmem:[#allocation31_spill] sm:$0xff] %v2160_v5  ;;  %v2170_v7 = vld [vmem:[%s2792_s2 + $0x1b8] sm:$0xff]  ;;  %v2175_v8 = vld [vmem:[%s2792_s2 + $0x1c0] sm:$0xff] }
  0x1a   :  { %2936 = vst [vmem:[#allocation32_spill] sm:$0xff] %v2165_v6  ;;  %2937 = vst [vmem:[#allocation33_spill] sm:$0xff] %v2170_v7  ;;  %v2207_v2 = vld [vmem:[%s2792_s2 + $0x1f0] sm:$0xff]  ;;  %v2217_v5 = vld [vmem:[%s2792_s2 + $0x200] sm:$0xff] }
  0x1b   :  { %2938 = vst [vmem:[#allocation34_spill] sm:$0xff] %v2175_v8  ;;  %2944 = vst [vmem:[#allocation40_spill] sm:$0xff] %v2207_v2  ;;  %v2222_v8 = vld [vmem:[%s2792_s2 + $0x208] sm:$0xff]  ;;  %v2232_v2 = vld [vmem:[%s2792_s2 + $0x218] sm:$0xff] }
  0x1c   :  { %2946 = vst [vmem:[#allocation42_spill] sm:$0xff] %v2217_v5  ;;  %2947 = vst [vmem:[#allocation43_spill] sm:$0xff] %v2222_v8  ;;  %v2237_v17 = vld [vmem:[%s2792_s2 + $0x220] sm:$0xff]  ;;  %v2247_v8 = vld [vmem:[%s2792_s2 + $0x228] sm:$0xff] }
  0x1d   :  { %2949 = vst [vmem:[#allocation45_spill] sm:$0xff] %v2232_v2  ;;  %2950 = vst [vmem:[#allocation46_spill] sm:$0xff] %v2237_v17  ;;  %v2242_v20 = vld [vmem:[%s2793_s3] sm:$0x3f]  ;;  %v2252_v23 = vld [vmem:[%s2792_s2 + $0x230] sm:$0xff] }
  0x1e   :  { %1496 = vmatmul.mubr.msk.bf16.gmra.mxu0 %vm145_vm0, %v1689_v13  ;;  %1500 = vmatmul.mubr.msk.bf16.gmra.mxu1 %vm145_vm0, %v1690_v14  ;;  %2951 = vst [vmem:[#allocation47_spill] sm:$0xff] %v2247_v8  ;;  %2952 = vst [vmem:[#allocation48_spill] sm:$0xff] %v2252_v23  ;;  %v2257_v26 = vld [vmem:[%s2792_s2 + $0x238] sm:$0xff]  ;;  %v2263_v29 = vld [vmem:[%s2792_s2 + $0x240] sm:$0xff] }
  0x1f   :  { %315 = vmatprep.mubr.bf16.mxu1 %v1771_v1  ;;  %428 = vmatprep.mubr.bf16.mxu0 %v1771_v1  ;;  %2953 = vst [vmem:[#allocation49_spill] sm:$0xff] %v2257_v26  ;;  %v2268_v32 = vld [vmem:[%s2792_s2 + $0x248] sm:$0xff]  ;;  %v2273_v35 = vld [vmem:[%s2792_s2 + $0x250] sm:$0xff]  ;;  %v2278_v26 = vld [vmem:[%s2792_s2 + $0x258] sm:$0xff] }
  0x20   :  { %2954 = vst [vmem:[#allocation50_spill] sm:$0xff] %v2268_v32  ;;  %2955 = vst [vmem:[#allocation51_spill] sm:$0xff] %v2273_v35  ;;  %v2283_v38 = vld [vmem:[%s2792_s2 + $0x260] sm:$0xff]  ;;  %v2288_v41 = vld [vmem:[%s2792_s2 + $0x268] sm:$0xff] }
  0x21   :  { %2956 = vst [vmem:[#allocation52_spill] sm:$0xff] %v2283_v38  ;;  %2957 = vst [vmem:[#allocation53_spill] sm:$0xff] %v2288_v41  ;;  %v2294_v35 = vld [vmem:[%s2792_s2 + $0x270] sm:$0xff]  ;;  %v2299_v47 = vld [vmem:[%s2792_s2 + $0x278] sm:$0xff] }
  0x22   :  { %2958 = vst [vmem:[#allocation54_spill] sm:$0xff] %v2299_v47  ;;  %v2304_v50 = vld [vmem:[%s2792_s2 + $0x280] sm:$0xff]  ;;  %v2309_v41 = vld [vmem:[%s2792_s2 + $0x288] sm:$0xff]  ;;  %v2314_v53 = vld [vmem:[%s2792_s2 + $0x290] sm:$0xff] }
  0x23   :  { %2959 = vst [vmem:[#allocation55_spill] sm:$0xff] %v2304_v50  ;;  %v2319_v56 = vld [vmem:[%s2792_s2 + $0x298] sm:$0xff]  ;;  %v2327_v50 = vld [vmem:[%s2792_s2 + $0x2a0] sm:$0xff]  ;;  %v2337_v59 = vld [vmem:[%s2792_s2 + $0x2b0] sm:$0xff] }
  0x24   :  { %2960 = vst [vmem:[#allocation56_spill] sm:$0xff] %v2319_v56  ;;  %2962 = vst [vmem:[#allocation58_spill] sm:$0xff] %v2337_v59  ;;  %v2347_v56 = vld [vmem:[%s2792_s2 + $0x2c0] sm:$0xff]  ;;  %v2352_v62 = vld [vmem:[%s2792_s2 + $0x2c8] sm:$0xff] }
  0x25   :  { %2964 = vst [vmem:[#allocation60_spill] sm:$0xff] %v2352_v62  ;;  %v2360_v59 = vld [vmem:[%s2792_s2 + $0x2d0] sm:$0xff]  ;;  %v2370_v0 = vld [vmem:[%s2792_s2 + $0x2e0] sm:$0xff]  ;;  %v2385_v5 = vld [vmem:[%s2792_s2 + $0x2f8] sm:$0xff] }
  0x26   :  { %1501 = vmatmul.mubr.msk.bf16.vlgmr.msra.gmra.mxu1 %vm145_vm0, %v1677_v3  ;;  %1509 = vmatmul.mubr.msk.bf16.vlgmr.msra.gmra.mxu0 %vm145_vm0, %v1677_v3  ;;  %v2150_v3 = vld [vmem:[%s2792_s2 + $0x198] sm:$0xff]  ;;  %2966 = vst [vmem:[#allocation62_spill] sm:$0xff] %v2370_v0  ;;  %2968 = vst [vmem:[#allocation64_spill] sm:$0xff] %v2385_v5  ;;  %v2397_v2 = vld [vmem:[%s2794_s4 + $0x1] ss:$0 sm:$0xff] }
  0x27   :  { %325 = vmatprep.mubr.bf16.mxu1 %v1771_v1  ;;  %438 = vmatprep.mubr.bf16.mxu0 %v1771_v1  ;;  %2933 = vst [vmem:[#allocation29_spill] sm:$0xff] %v2150_v3  ;;  %2970 = vst [vmem:[#allocation66_spill] sm:$0xff] %v2397_v2 }
  0x2e   :  { %1502 = vmatmul.mubr.msk.bf16.gmra.mxu1 %vm145_vm0, %v1685_v9  ;;  %1510 = vmatmul.mubr.msk.bf16.gmra.mxu0 %vm145_vm0, %v1685_v9  ;;  %v2180_v9 = vld [vmem:[%s2792_s2 + $0x1c8] sm:$0xff] }
  0x2f   :  { %335 = vmatprep.mubr.bf16.mxu1 %v1771_v1  ;;  %448 = vmatprep.mubr.bf16.mxu0 %v1771_v1  ;;  %2939 = vst [vmem:[#allocation35_spill] sm:$0xff] %v2180_v9  ;;  %v2392_v9 = vld [vmem:[%s2794_s4] ss:$0 sm:$0xff] }
  0x30   :  { %2969 = vst [vmem:[#allocation65_spill] sm:$0xff] %v2392_v9 }
  0x36   :  { %1503 = vmatmul.mubr.msk.bf16.gmra.mxu1 %vm145_vm0, %v1687_v11  ;;  %1511 = vmatmul.mubr.msk.bf16.gmra.mxu0 %vm145_vm0, %v1687_v11  ;;  %v2190_v11 = vld [vmem:[%s2792_s2 + $0x1d8] sm:$0xff] }
  0x37   :  { %345 = vmatprep.mubr.bf16.mxu1 %v1771_v1  ;;  %458 = vmatprep.mubr.bf16.mxu0 %v1771_v1  ;;  %2941 = vst [vmem:[#allocation37_spill] sm:$0xff] %v2190_v11  ;;  %v2227_v11 = vld [vmem:[%s2792_s2 + $0x210] sm:$0xff] }
  0x38   :  { %2948 = vst [vmem:[#allocation44_spill] sm:$0xff] %v2227_v11 }
  0x3e   :  { %1504 = vmatmul.mubr.msk.bf16.gmra.mxu1 %vm145_vm0, %v1689_v13  ;;  %1512 = vmatmul.mubr.msk.bf16.gmra.mxu0 %vm145_vm0, %v1689_v13  ;;  %v2197_v13 = vld [vmem:[%s2792_s2 + $0x1e0] sm:$0xff] }
  0x3f   :  { %355 = vmatprep.mubr.bf16.mxu1 %v1771_v1  ;;  %468 = vmatprep.mubr.bf16.mxu0 %v1771_v1  ;;  %2942 = vst [vmem:[#allocation38_spill] sm:$0xff] %v2197_v13 }
  0x46   :  { %1505 = vmatmul.mubr.msk.bf16.gmra.mxu1 %vm145_vm0, %v1678_v4  ;;  %1513 = vmatmul.mubr.msk.bf16.gmra.mxu0 %vm145_vm0, %v1678_v4  ;;  %v2155_v4 = vld [vmem:[%s2792_s2 + $0x1a0] sm:$0xff] }
  0x47   :  { %365 = vmatprep.mubr.bf16.mxu1 %v1771_v1  ;;  %478 = vmatprep.mubr.bf16.mxu0 %v1771_v1  ;;  %2934 = vst [vmem:[#allocation30_spill] sm:$0xff] %v2155_v4  ;;  %v2332_v4 = vld [vmem:[%s2792_s2 + $0x2a8] sm:$0xff] }
  0x48   :  { %2961 = vst [vmem:[#allocation57_spill] sm:$0xff] %v2332_v4 }
  0x4e   :  { %1506 = vmatmul.mubr.msk.bf16.gmra.mxu1 %vm145_vm0, %v1686_v10  ;;  %1514 = vmatmul.mubr.msk.bf16.gmra.mxu0 %vm145_vm0, %v1686_v10  ;;  %v2185_v10 = vld [vmem:[%s2792_s2 + $0x1d0] sm:$0xff] }
  0x4f   :  { %375 = vmatprep.mubr.bf16.mxu1 %v1771_v1  ;;  %488 = vmatprep.mubr.bf16.mxu0 %v1771_v1  ;;  %2940 = vst [vmem:[#allocation36_spill] sm:$0xff] %v2185_v10  ;;  %v2365_v10 = vld [vmem:[%s2792_s2 + $0x2d8] sm:$0xff] }
  0x50   :  { %2965 = vst [vmem:[#allocation61_spill] sm:$0xff] %v2365_v10 }
  0x56   :  { %1507 = vmatmul.mubr.msk.bf16.gmra.mxu1 %vm145_vm0, %v1688_v12  ;;  %1515 = vmatmul.mubr.msk.bf16.gmra.mxu0 %vm145_vm0, %v1688_v12  ;;  %v2192_v12 = vshrl.u32 %v45_v63, 7  ;;  %v2212_v63 = vld [vmem:[%s2792_s2 + $0x1f8] sm:$0xff] }
  0x57   :  { %385 = vmatprep.mubr.bf16.mxu1 %v1771_v1  ;;  %498 = vmatprep.mubr.bf16.mxu0 %v1771_v1  ;;  %v2140_v1 = vld [vmem:[%s2792_s2 + $0x188] sm:$0xff]  ;;  %2945 = vst [vmem:[#allocation41_spill] sm:$0xff] %v2212_v63 }
  0x58   :  { %2931 = vst [vmem:[#allocation27_spill] sm:$0xff] %v2140_v1  ;;  %v47_v17 = vsub.s32 0, %v2192_v12  ;;  %v51_v44 = vsub.s32 1, %v2192_v12 }
  0x5a   :  { %v2322_v1 = vrot.slane %v2242_v20, %v47_v17  ;;  %v2342_v17 = vld [vmem:[%s2792_s2 + $0x2b8] sm:$0xff]  ;;  %v2355_v7 = vrot.slane %v2242_v20, %v51_v44  ;;  %v2375_v44 = vld [vmem:[%s2792_s2 + $0x2e8] sm:$0xff] }
  0x5b   :  { %2963 = vst [vmem:[#allocation59_spill] sm:$0xff] %v2342_v17 }
  0x5e   :  { %1508 = vmatmul.mubr.msk.bf16.gmra.mxu1 %vm145_vm0, %v1690_v14  ;;  %1516 = vmatmul.mubr.msk.bf16.gmra.mxu0 %vm145_vm0, %v1690_v14  ;;  %v2202_v14 = vld [vmem:[%s2792_s2 + $0x1e8] sm:$0xff] }
  0x5f   :  { %2943 = vst [vmem:[#allocation39_spill] sm:$0xff] %v2202_v14  ;;  %v2380_v14 = vld [vmem:[%s2792_s2 + $0x2f0] sm:$0xff]  ;;  %s2517_s2 = smov 0  }
  0x60   :  { %2967 = vst [vmem:[#allocation63_spill] sm:$0xff] %v2380_v14 }
  0xc6   :  { %v204_v3 = vpop.f32.mrf.mxu0  ;;  %v244_v62 = vpop.f32.mrf.mxu1 }
  0xc7   :  { %v205_v6 = vadd.f32 %v204_v3, %v2322_v1  ;;  %v245_v0 = vadd.f32 %v244_v62, %v2322_v1 }
  0xc8   :  { %v206_v23 = vpop.f32.mrf.mxu0  ;;  %v246_v13 = vpop.f32.mrf.mxu1 }
  0xc9   :  { %509 = vst [vmem:[#allocation2] sm:$0xff] %v205_v6  ;;  %557 = vst [vmem:[#allocation2 + $0x180] sm:$0xff] %v245_v0  ;;  %v207_v5 = vadd.f32 %v206_v23, %v2355_v7  ;;  %v247_v3 = vadd.f32 %v246_v13, %v2355_v7 }
  0xca   :  { %v208_v63 = vpop.f32.mrf.mxu0  ;;  %v248_v62 = vpop.f32.mrf.mxu1 }
  0xcb   :  { %510 = vst [vmem:[#allocation2 + $0x8] sm:$0xff] %v207_v5  ;;  %558 = vst [vmem:[#allocation2 + $0x188] sm:$0xff] %v247_v3  ;;  %v209_v32 = vadd.f32 %v208_v63, %v2322_v1  ;;  %v249_v9 = vadd.f32 %v248_v62, %v2322_v1 }
  0xcc   :  { %v210_v38 = vpop.f32.mrf.mxu0  ;;  %v250_v11 = vpop.f32.mrf.mxu1 }
  0xcd   :  { %515 = vst [vmem:[#allocation2 + $0x30] sm:$0xff] %v209_v32  ;;  %563 = vst [vmem:[#allocation2 + $0x1b0] sm:$0xff] %v249_v9  ;;  %v211_v2 = vadd.f32 %v210_v38, %v2355_v7  ;;  %v251_v0 = vadd.f32 %v250_v11, %v2355_v7 }
  0xce   :  { %v214_v6 = vpop.f32.mrf.mxu0  ;;  %v254_v23 = vpop.f32.mrf.mxu1 }
  0xcf   :  { %516 = vst [vmem:[#allocation2 + $0x38] sm:$0xff] %v211_v2  ;;  %564 = vst [vmem:[#allocation2 + $0x1b8] sm:$0xff] %v251_v0  ;;  %v215_v13 = vadd.f32 %v214_v6, %v2322_v1  ;;  %v255_v5 = vadd.f32 %v254_v23, %v2322_v1 }
  0xd0   :  { %v216_v3 = vpop.f32.mrf.mxu0  ;;  %v256_v63 = vpop.f32.mrf.mxu1 }
  0xd1   :  { %521 = vst [vmem:[#allocation2 + $0x60] sm:$0xff] %v215_v13  ;;  %569 = vst [vmem:[#allocation2 + $0x1e0] sm:$0xff] %v255_v5  ;;  %v217_v62 = vadd.f32 %v216_v3, %v2355_v7  ;;  %v257_v32 = vadd.f32 %v256_v63, %v2355_v7 }
  0xd2   :  { %v218_v9 = vpop.f32.mrf.mxu0  ;;  %v258_v38 = vpop.f32.mrf.mxu1 }
  0xd3   :  { %522 = vst [vmem:[#allocation2 + $0x68] sm:$0xff] %v217_v62  ;;  %570 = vst [vmem:[#allocation2 + $0x1e8] sm:$0xff] %v257_v32  ;;  %v219_v11 = vadd.f32 %v218_v9, %v2322_v1  ;;  %v259_v2 = vadd.f32 %v258_v38, %v2322_v1 }
  0xd4   :  { %v220_v0 = vpop.f32.mrf.mxu0  ;;  %v260_v6 = vpop.f32.mrf.mxu1 }
  0xd5   :  { %527 = vst [vmem:[#allocation2 + $0x90] sm:$0xff] %v219_v11  ;;  %575 = vst [vmem:[#allocation2 + $0x210] sm:$0xff] %v259_v2  ;;  %v221_v23 = vadd.f32 %v220_v0, %v2355_v7  ;;  %v261_v13 = vadd.f32 %v260_v6, %v2355_v7 }
  0xd6   :  { %v224_v5 = vpop.f32.mrf.mxu0  ;;  %v264_v3 = vpop.f32.mrf.mxu1 }
  0xd7   :  { %528 = vst [vmem:[#allocation2 + $0x98] sm:$0xff] %v221_v23  ;;  %576 = vst [vmem:[#allocation2 + $0x218] sm:$0xff] %v261_v13  ;;  %v225_v63 = vadd.f32 %v224_v5, %v2322_v1  ;;  %v265_v62 = vadd.f32 %v264_v3, %v2322_v1 }
  0xd8   :  { %v226_v32 = vpop.f32.mrf.mxu0  ;;  %v266_v9 = vpop.f32.mrf.mxu1 }
  0xd9   :  { %533 = vst [vmem:[#allocation2 + $0xc0] sm:$0xff] %v225_v63  ;;  %581 = vst [vmem:[#allocation2 + $0x240] sm:$0xff] %v265_v62  ;;  %v227_v38 = vadd.f32 %v226_v32, %v2355_v7  ;;  %v267_v11 = vadd.f32 %v266_v9, %v2355_v7 }
  0xda   :  { %v228_v2 = vpop.f32.mrf.mxu0  ;;  %v268_v0 = vpop.f32.mrf.mxu1 }
  0xdb   :  { %534 = vst [vmem:[#allocation2 + $0xc8] sm:$0xff] %v227_v38  ;;  %582 = vst [vmem:[#allocation2 + $0x248] sm:$0xff] %v267_v11  ;;  %v229_v6 = vadd.f32 %v228_v2, %v2322_v1  ;;  %v269_v23 = vadd.f32 %v268_v0, %v2322_v1  ;;  %v55_v11 = vsub.s32 2, %v2192_v12  ;;  %v63_v2 = vsub.s32 4, %v2192_v12 }
  0xdc   :  { %v230_v13 = vpop.f32.mrf.mxu0  ;;  %v270_v5 = vpop.f32.mrf.mxu1 }
  0xdd   :  { %539 = vst [vmem:[#allocation2 + $0xf0] sm:$0xff] %v229_v6  ;;  %587 = vst [vmem:[#allocation2 + $0x270] sm:$0xff] %v269_v23  ;;  %v231_v3 = vadd.f32 %v230_v13, %v2355_v7  ;;  %v271_v63 = vadd.f32 %v270_v5, %v2355_v7  ;;  %v59_v13 = vsub.s32 3, %v2192_v12  ;;  %v67_v5 = vsub.s32 5, %v2192_v12 }
  0xde   :  { %v234_v62 = vpop.f32.mrf.mxu0  ;;  %v274_v32 = vpop.f32.mrf.mxu1  ;;  %v2432_v47 = vrot.slane %v2242_v20, %v55_v11 }
  0xdf   :  { %540 = vst [vmem:[#allocation2 + $0xf8] sm:$0xff] %v231_v3  ;;  %588 = vst [vmem:[#allocation2 + $0x278] sm:$0xff] %v271_v63  ;;  %v235_v9 = vadd.f32 %v234_v62, %v2322_v1  ;;  %v275_v38 = vadd.f32 %v274_v32, %v2322_v1 }
  0xe0   :  { %v236_v0 = vpop.f32.mrf.mxu0  ;;  %v276_v8 = vpop.f32.mrf.mxu1 }
  0xe1   :  { %545 = vst [vmem:[#allocation2 + $0x120] sm:$0xff] %v235_v9  ;;  %593 = vst [vmem:[#allocation2 + $0x2a0] sm:$0xff] %v275_v38  ;;  %v237_v6 = vadd.f32 %v236_v0, %v2355_v7  ;;  %v277_v23 = vadd.f32 %v276_v8, %v2355_v7  ;;  %v2435_v9 = vrot.slane %v2242_v20, %v63_v2 }
  0xe2   :  { %v238_v3 = vpop.f32.mrf.mxu0  ;;  %v278_v63 = vpop.f32.mrf.mxu1 }
  0xe3   :  { %546 = vst [vmem:[#allocation2 + $0x128] sm:$0xff] %v237_v6  ;;  %594 = vst [vmem:[#allocation2 + $0x2a8] sm:$0xff] %v277_v23  ;;  %v239_v62 = vadd.f32 %v238_v3, %v2322_v1  ;;  %v279_v32 = vadd.f32 %v278_v63, %v2322_v1  ;;  %v2440_v6 = vrot.slane %v2242_v20, %v59_v13 }
  0xe4   :  { %v240_v38 = vpop.f32.mrf.mxu0  ;;  %v280_v8 = vpop.f32.mrf.mxu1  ;;  %v2443_v23 = vrot.slane %v2242_v20, %v67_v5 }
  0xe5   :  { %551 = vst [vmem:[#allocation2 + $0x150] sm:$0xff] %v239_v62  ;;  %599 = vst [vmem:[#allocation2 + $0x2d0] sm:$0xff] %v279_v32  ;;  %v241_v12 = vadd.f32 %v240_v38, %v2355_v7  ;;  %v281_v0 = vadd.f32 %v280_v8, %v2355_v7 }
  0xe6   :  { %v317_v1 = vpop.f32.mrf.mxu1  ;;  %v430_v11 = vpop.f32.mrf.mxu0 }
  0xe7   :  { %552 = vst [vmem:[#allocation2 + $0x158] sm:$0xff] %v241_v12  ;;  %600 = vst [vmem:[#allocation2 + $0x2d8] sm:$0xff] %v281_v0  ;;  %v318_v2 = vadd.f32 %v317_v1, %v2432_v47  ;;  %v431_v3 = vadd.f32 %v430_v11, %v2435_v9 }
  0xe8   :  { %v319_v63 = vpop.f32.mrf.mxu1  ;;  %v432_v62 = vpop.f32.mrf.mxu0 }
  0xe9   :  { %511 = vst [vmem:[#allocation2 + $0x10] sm:$0xff] %v318_v2  ;;  %513 = vst [vmem:[#allocation2 + $0x20] sm:$0xff] %v431_v3  ;;  %v320_v7 = vadd.f32 %v319_v63, %v2440_v6  ;;  %v433_v13 = vadd.f32 %v432_v62, %v2443_v23 }
  0xea   :  { %v321_v32 = vpop.f32.mrf.mxu1  ;;  %v434_v38 = vpop.f32.mrf.mxu0 }
  0xeb   :  { %512 = vst [vmem:[#allocation2 + $0x18] sm:$0xff] %v320_v7  ;;  %514 = vst [vmem:[#allocation2 + $0x28] sm:$0xff] %v433_v13  ;;  %v322_v20 = vadd.f32 %v321_v32, %v2432_v47  ;;  %v435_v5 = vadd.f32 %v434_v38, %v2435_v9 }
  0xec   :  { %v323_v8 = vpop.f32.mrf.mxu1  ;;  %v436_v12 = vpop.f32.mrf.mxu0 }
  0xed   :  { %517 = vst [vmem:[#allocation2 + $0x40] sm:$0xff] %v322_v20  ;;  %519 = vst [vmem:[#allocation2 + $0x50] sm:$0xff] %v435_v5  ;;  %v324_v0 = vadd.f32 %v323_v8, %v2440_v6  ;;  %v437_v1 = vadd.f32 %v436_v12, %v2443_v23 }
  0xee   :  { %v327_v11 = vpop.f32.mrf.mxu1  ;;  %v440_v2 = vpop.f32.mrf.mxu0 }
  0xef   :  { %518 = vst [vmem:[#allocation2 + $0x48] sm:$0xff] %v324_v0  ;;  %520 = vst [vmem:[#allocation2 + $0x58] sm:$0xff] %v437_v1  ;;  %v328_v3 = vadd.f32 %v327_v11, %v2432_v47  ;;  %v441_v63 = vadd.f32 %v440_v2, %v2435_v9 }
  0xf0   :  { %v329_v62 = vpop.f32.mrf.mxu1  ;;  %v442_v7 = vpop.f32.mrf.mxu0 }
  0xf1   :  { %523 = vst [vmem:[#allocation2 + $0x70] sm:$0xff] %v328_v3  ;;  %525 = vst [vmem:[#allocation2 + $0x80] sm:$0xff] %v441_v63  ;;  %v330_v13 = vadd.f32 %v329_v62, %v2440_v6  ;;  %v443_v32 = vadd.f32 %v442_v7, %v2443_v23 }
  0xf2   :  { %v331_v38 = vpop.f32.mrf.mxu1  ;;  %v444_v20 = vpop.f32.mrf.mxu0 }
  0xf3   :  { %524 = vst [vmem:[#allocation2 + $0x78] sm:$0xff] %v330_v13  ;;  %526 = vst [vmem:[#allocation2 + $0x88] sm:$0xff] %v443_v32  ;;  %v332_v5 = vadd.f32 %v331_v38, %v2432_v47  ;;  %v445_v8 = vadd.f32 %v444_v20, %v2435_v9 }
  0xf4   :  { %v333_v12 = vpop.f32.mrf.mxu1  ;;  %v446_v0 = vpop.f32.mrf.mxu0 }
  0xf5   :  { %529 = vst [vmem:[#allocation2 + $0xa0] sm:$0xff] %v332_v5  ;;  %531 = vst [vmem:[#allocation2 + $0xb0] sm:$0xff] %v445_v8  ;;  %v334_v1 = vadd.f32 %v333_v12, %v2440_v6  ;;  %v447_v11 = vadd.f32 %v446_v0, %v2443_v23 }
  0xf6   :  { %v337_v2 = vpop.f32.mrf.mxu1  ;;  %v450_v3 = vpop.f32.mrf.mxu0 }
  0xf7   :  { %530 = vst [vmem:[#allocation2 + $0xa8] sm:$0xff] %v334_v1  ;;  %532 = vst [vmem:[#allocation2 + $0xb8] sm:$0xff] %v447_v11  ;;  %v338_v63 = vadd.f32 %v337_v2, %v2432_v47  ;;  %v451_v62 = vadd.f32 %v450_v3, %v2435_v9 }
  0xf8   :  { %v339_v7 = vpop.f32.mrf.mxu1  ;;  %v452_v13 = vpop.f32.mrf.mxu0 }
  0xf9   :  { %535 = vst [vmem:[#allocation2 + $0xd0] sm:$0xff] %v338_v63  ;;  %537 = vst [vmem:[#allocation2 + $0xe0] sm:$0xff] %v451_v62  ;;  %v340_v32 = vadd.f32 %v339_v7, %v2440_v6  ;;  %v453_v38 = vadd.f32 %v452_v13, %v2443_v23 }
  0xfa   :  { %v341_v20 = vpop.f32.mrf.mxu1  ;;  %v454_v5 = vpop.f32.mrf.mxu0 }
  0xfb   :  { %536 = vst [vmem:[#allocation2 + $0xd8] sm:$0xff] %v340_v32  ;;  %538 = vst [vmem:[#allocation2 + $0xe8] sm:$0xff] %v453_v38  ;;  %v342_v8 = vadd.f32 %v341_v20, %v2432_v47  ;;  %v455_v12 = vadd.f32 %v454_v5, %v2435_v9 }
  0xfc   :  { %v343_v0 = vpop.f32.mrf.mxu1  ;;  %v456_v1 = vpop.f32.mrf.mxu0 }
  0xfd   :  { %541 = vst [vmem:[#allocation2 + $0x100] sm:$0xff] %v342_v8  ;;  %543 = vst [vmem:[#allocation2 + $0x110] sm:$0xff] %v455_v12  ;;  %v344_v11 = vadd.f32 %v343_v0, %v2440_v6  ;;  %v457_v2 = vadd.f32 %v456_v1, %v2443_v23 }
  0xfe   :  { %v347_v3 = vpop.f32.mrf.mxu1  ;;  %v460_v63 = vpop.f32.mrf.mxu0 }
  0xff   :  { %542 = vst [vmem:[#allocation2 + $0x108] sm:$0xff] %v344_v11  ;;  %544 = vst [vmem:[#allocation2 + $0x118] sm:$0xff] %v457_v2  ;;  %v348_v62 = vadd.f32 %v347_v3, %v2432_v47  ;;  %v461_v7 = vadd.f32 %v460_v63, %v2435_v9 }
 0x100   :  { %v349_v13 = vpop.f32.mrf.mxu1  ;;  %v462_v32 = vpop.f32.mrf.mxu0 }
 0x101   :  { %547 = vst [vmem:[#allocation2 + $0x130] sm:$0xff] %v348_v62  ;;  %549 = vst [vmem:[#allocation2 + $0x140] sm:$0xff] %v461_v7  ;;  %v350_v38 = vadd.f32 %v349_v13, %v2440_v6  ;;  %v463_v20 = vadd.f32 %v462_v32, %v2443_v23 }
 0x102   :  { %v351_v5 = vpop.f32.mrf.mxu1  ;;  %v464_v8 = vpop.f32.mrf.mxu0 }
 0x103   :  { %548 = vst [vmem:[#allocation2 + $0x138] sm:$0xff] %v350_v38  ;;  %550 = vst [vmem:[#allocation2 + $0x148] sm:$0xff] %v463_v20  ;;  %v352_v12 = vadd.f32 %v351_v5, %v2432_v47  ;;  %v465_v0 = vadd.f32 %v464_v8, %v2435_v9 }
 0x104   :  { %v353_v1 = vpop.f32.mrf.mxu1  ;;  %v466_v11 = vpop.f32.mrf.mxu0 }
 0x105   :  { %553 = vst [vmem:[#allocation2 + $0x160] sm:$0xff] %v352_v12  ;;  %555 = vst [vmem:[#allocation2 + $0x170] sm:$0xff] %v465_v0  ;;  %v354_v2 = vadd.f32 %v353_v1, %v2440_v6  ;;  %v467_v3 = vadd.f32 %v466_v11, %v2443_v23 }
 0x106   :  { %v357_v63 = vpop.f32.mrf.mxu1  ;;  %v470_v62 = vpop.f32.mrf.mxu0 }
 0x107   :  { %554 = vst [vmem:[#allocation2 + $0x168] sm:$0xff] %v354_v2  ;;  %556 = vst [vmem:[#allocation2 + $0x178] sm:$0xff] %v467_v3  ;;  %v358_v7 = vadd.f32 %v357_v63, %v2432_v47  ;;  %v471_v13 = vadd.f32 %v470_v62, %v2435_v9 }
 0x108   :  { %v359_v32 = vpop.f32.mrf.mxu1  ;;  %v472_v38 = vpop.f32.mrf.mxu0 }
 0x109   :  { %559 = vst [vmem:[#allocation2 + $0x190] sm:$0xff] %v358_v7  ;;  %561 = vst [vmem:[#allocation2 + $0x1a0] sm:$0xff] %v471_v13  ;;  %v360_v20 = vadd.f32 %v359_v32, %v2440_v6  ;;  %v473_v5 = vadd.f32 %v472_v38, %v2443_v23 }
 0x10a   :  { %v361_v8 = vpop.f32.mrf.mxu1  ;;  %v474_v12 = vpop.f32.mrf.mxu0 }
 0x10b   :  { %560 = vst [vmem:[#allocation2 + $0x198] sm:$0xff] %v360_v20  ;;  %562 = vst [vmem:[#allocation2 + $0x1a8] sm:$0xff] %v473_v5  ;;  %v362_v0 = vadd.f32 %v361_v8, %v2432_v47  ;;  %v475_v1 = vadd.f32 %v474_v12, %v2435_v9 }
 0x10c   :  { %v363_v11 = vpop.f32.mrf.mxu1  ;;  %v476_v2 = vpop.f32.mrf.mxu0 }
 0x10d   :  { %565 = vst [vmem:[#allocation2 + $0x1c0] sm:$0xff] %v362_v0  ;;  %567 = vst [vmem:[#allocation2 + $0x1d0] sm:$0xff] %v475_v1  ;;  %v364_v3 = vadd.f32 %v363_v11, %v2440_v6  ;;  %v477_v63 = vadd.f32 %v476_v2, %v2443_v23 }
 0x10e   :  { %v367_v62 = vpop.f32.mrf.mxu1  ;;  %v480_v7 = vpop.f32.mrf.mxu0 }
 0x10f   :  { %566 = vst [vmem:[#allocation2 + $0x1c8] sm:$0xff] %v364_v3  ;;  %568 = vst [vmem:[#allocation2 + $0x1d8] sm:$0xff] %v477_v63  ;;  %v368_v13 = vadd.f32 %v367_v62, %v2432_v47  ;;  %v481_v32 = vadd.f32 %v480_v7, %v2435_v9 }
 0x110   :  { %v369_v38 = vpop.f32.mrf.mxu1  ;;  %v482_v20 = vpop.f32.mrf.mxu0 }
 0x111   :  { %571 = vst [vmem:[#allocation2 + $0x1f0] sm:$0xff] %v368_v13  ;;  %573 = vst [vmem:[#allocation2 + $0x200] sm:$0xff] %v481_v32  ;;  %v370_v5 = vadd.f32 %v369_v38, %v2440_v6  ;;  %v483_v8 = vadd.f32 %v482_v20, %v2443_v23 }
 0x112   :  { %v371_v12 = vpop.f32.mrf.mxu1  ;;  %v484_v0 = vpop.f32.mrf.mxu0 }
 0x113   :  { %572 = vst [vmem:[#allocation2 + $0x1f8] sm:$0xff] %v370_v5  ;;  %574 = vst [vmem:[#allocation2 + $0x208] sm:$0xff] %v483_v8  ;;  %v372_v1 = vadd.f32 %v371_v12, %v2432_v47  ;;  %v485_v11 = vadd.f32 %v484_v0, %v2435_v9 }
 0x114   :  { %v373_v2 = vpop.f32.mrf.mxu1  ;;  %v486_v3 = vpop.f32.mrf.mxu0 }
 0x115   :  { %577 = vst [vmem:[#allocation2 + $0x220] sm:$0xff] %v372_v1  ;;  %579 = vst [vmem:[#allocation2 + $0x230] sm:$0xff] %v485_v11  ;;  %v374_v63 = vadd.f32 %v373_v2, %v2440_v6  ;;  %v487_v62 = vadd.f32 %v486_v3, %v2443_v23 }
 0x116   :  { %v377_v7 = vpop.f32.mrf.mxu1  ;;  %v490_v13 = vpop.f32.mrf.mxu0 }
 0x117   :  { %578 = vst [vmem:[#allocation2 + $0x228] sm:$0xff] %v374_v63  ;;  %580 = vst [vmem:[#allocation2 + $0x238] sm:$0xff] %v487_v62  ;;  %v378_v32 = vadd.f32 %v377_v7, %v2432_v47  ;;  %v491_v38 = vadd.f32 %v490_v13, %v2435_v9 }
 0x118   :  { %v379_v20 = vpop.f32.mrf.mxu1  ;;  %v492_v5 = vpop.f32.mrf.mxu0 }
 0x119   :  { %583 = vst [vmem:[#allocation2 + $0x250] sm:$0xff] %v378_v32  ;;  %585 = vst [vmem:[#allocation2 + $0x260] sm:$0xff] %v491_v38  ;;  %v380_v8 = vadd.f32 %v379_v20, %v2440_v6  ;;  %v493_v12 = vadd.f32 %v492_v5, %v2443_v23 }
 0x11a   :  { %v381_v0 = vpop.f32.mrf.mxu1  ;;  %v494_v1 = vpop.f32.mrf.mxu0 }
 0x11b   :  { %584 = vst [vmem:[#allocation2 + $0x258] sm:$0xff] %v380_v8  ;;  %586 = vst [vmem:[#allocation2 + $0x268] sm:$0xff] %v493_v12  ;;  %v382_v11 = vadd.f32 %v381_v0, %v2432_v47  ;;  %v495_v2 = vadd.f32 %v494_v1, %v2435_v9 }
 0x11c   :  { %v383_v3 = vpop.f32.mrf.mxu1  ;;  %v496_v63 = vpop.f32.mrf.mxu0 }
 0x11d   :  { %589 = vst [vmem:[#allocation2 + $0x280] sm:$0xff] %v382_v11  ;;  %591 = vst [vmem:[#allocation2 + $0x290] sm:$0xff] %v495_v2  ;;  %v384_v62 = vadd.f32 %v383_v3, %v2440_v6  ;;  %v497_v7 = vadd.f32 %v496_v63, %v2443_v23 }
 0x11e   :  { %v387_v13 = vpop.f32.mrf.mxu1  ;;  %v500_v32 = vpop.f32.mrf.mxu0 }
 0x11f   :  { %590 = vst [vmem:[#allocation2 + $0x288] sm:$0xff] %v384_v62  ;;  %592 = vst [vmem:[#allocation2 + $0x298] sm:$0xff] %v497_v7  ;;  %v388_v38 = vadd.f32 %v387_v13, %v2432_v47  ;;  %v501_v20 = vadd.f32 %v500_v32, %v2435_v9  ;;  %v2509_v32 = vmov 0.0  }
 0x120   :  { %v389_v5 = vpop.f32.mrf.mxu1  ;;  %v502_v8 = vpop.f32.mrf.mxu0 }
 0x121   :  { %595 = vst [vmem:[#allocation2 + $0x2b0] sm:$0xff] %v388_v38  ;;  %597 = vst [vmem:[#allocation2 + $0x2c0] sm:$0xff] %v501_v20  ;;  %v390_v12 = vadd.f32 %v389_v5, %v2440_v6  ;;  %v503_v0 = vadd.f32 %v502_v8, %v2443_v23  ;;  %v2511_v38 = vmov 0.0   ;;  %v2513_v20 = vmov 0.0  }
 0x122   :  { %v391_v1 = vpop.f32.mrf.mxu1  ;;  %v504_v11 = vpop.f32.mrf.mxu0  ;;  %v2515_v5 = vmov 0.0  }
 0x123   :  { %596 = vst [vmem:[#allocation2 + $0x2b8] sm:$0xff] %v390_v12  ;;  %598 = vst [vmem:[#allocation2 + $0x2c8] sm:$0xff] %v503_v0  ;;  %v392_v2 = vadd.f32 %v391_v1, %v2432_v47  ;;  %v505_v3 = vadd.f32 %v504_v11, %v2435_v9 }
 0x124   :  { %v393_v63 = vpop.f32.mrf.mxu1  ;;  %v506_v62 = vpop.f32.mrf.mxu0 }
 0x125   :  { %601 = vst [vmem:[#allocation2 + $0x2e0] sm:$0xff] %v392_v2  ;;  %603 = vst [vmem:[#allocation2 + $0x2f0] sm:$0xff] %v505_v3  ;;  %v394_v7 = vadd.f32 %v393_v63, %v2440_v6  ;;  %v507_v13 = vadd.f32 %v506_v62, %v2443_v23 }
 0x127   :  { %602 = vst [vmem:[#allocation2 + $0x2e8] sm:$0xff] %v394_v7  ;;  %604 = vst [vmem:[#allocation2 + $0x2f8] sm:$0xff] %v507_v13 }
 0x128 LB: > { %v2971_v24 = vld [vmem:[#allocation12_spill] sm:$0xff]  ;;  %v2972_v22 = vld [vmem:[#allocation10_spill] sm:$0xff]  ;;  %v2973_v21 = vld [vmem:[#allocation9_spill] sm:$0xff]  ;;  %v1562_v47 = vcombine.high %v2105_v57, %v2120_v60  ;;  %v1561_v9 = vcombine.low %v2105_v57, %v2120_v60  ;;  %v1556_v6 = vcombine.high %v2075_v51, %v2090_v54  ;;  %v1555_v23 = vcombine.low %v2075_v51, %v2090_v54  ;;  %s1615_s4 = sshll.u32 %s1769_s2, 4  ;;  %s1337_s29 = ssub.s32 7, %s1769_s2  ;;  %v1753_v32 = vphi %v2509_v32, %v3036_v32   ;;  %s1769_s2 = sphi %s2517_s2, %s720_s2   ;;  %v1765_v5 = vphi %v2515_v5, %v3039_v5   ;;  %v1761_v20 = vphi %v2513_v20, %v3038_v20   ;;  %v1757_v38 = vphi %v2511_v38, %v3037_v38  }
 0x129   : > { %v2974_v19 = vld [vmem:[#allocation7_spill] sm:$0xff]  ;;  %v2975_v18 = vld [vmem:[#allocation6_spill] sm:$0xff]  ;;  %v2977_v16 = vld [vmem:[#allocation4_spill] sm:$0xff]  ;;  %v1550_v8 = vcombine.high %v2045_v45, %v2060_v48  ;;  %v1564_v12 = vcombine.high %v2110_v58, %v2125_v61  ;;  %v1563_v0 = vcombine.low %v2110_v58, %v2125_v61  ;;  %v1558_v1 = vcombine.high %v2080_v52, %v2095_v55  ;;  %s1339_s26 = sshra.s32 %s1615_s4, 3  ;;  %s1616_s30 = sshll.u32 %s1337_s29, 4 }
 0x12a   : > { %v2976_v17 = vld [vmem:[#allocation59_spill] sm:$0xff]  ;;  %v2980_v10 = vld [vmem:[#allocation61_spill] sm:$0xff]  ;;  %1207 = vmatprep.subr.bf16.mxu0 %v1562_v47  ;;  %v1549_v11 = vcombine.low %v2045_v45, %v2060_v48  ;;  %v1557_v2 = vcombine.low %v2080_v52, %v2095_v55  ;;  %v1544_v3 = vcombine.high %v2015_v39, %v2030_v42  ;;  %v1552_v63 = vcombine.high %v2050_v46, %v2065_v49  ;;  %s1629_s27 = smul.u32 48, %s1339_s26  ;;  %s1350_s3 = sshra.s32 %s1616_s30, 3 }
 0x12b   : > { %v2978_v15 = vld [vmem:[#allocation3_spill] sm:$0xff]  ;;  %v2981_v4 = vld [vmem:[#allocation57_spill] sm:$0xff]  ;;  %1208 = vmatpush1.bf16.msra.mxu0 %v1561_v9  ;;  %1250 = vmatprep.subr.bf16.mxu1 %v1564_v12  ;;  %v1543_v62 = vcombine.low %v2015_v39, %v2030_v42  ;;  %v1551_v7 = vcombine.low %v2050_v46, %v2065_v49  ;;  %v1538_v13 = vcombine.high %v1985_v33, %v2000_v36  ;;  %s1630_s6 = smul.u32 48, %s1350_s3  ;;  %s720_s2 = sadd.s32 1, %s1769_s2  }
 0x12c   : > { %v2979_v14 = vld [vmem:[#allocation63_spill] sm:$0xff]  ;;  %1209 = vmatprep.subr.bf16.mxu0 %v1556_v6  ;;  %1251 = vmatpush1.bf16.msra.mxu1 %v1563_v0  ;;  %v1546_v47 = vcombine.high %v2020_v40, %v2035_v43  ;;  %v2568_v9 = vpack.c.bf16 %v1753_v32, %v1761_v20  ;;  %v1537_v6 = vcombine.low %v1985_v33, %v2000_v36  ;;  %s2741_s28 = scalar_lea.vmem [#allocation2], %s1629_s27  ;;  %p717_p0 = scmp.ge.s32.totalorder %s720_s2, 8  }
 0x12d   : > { %1252 = vmatprep.subr.bf16.mxu1 %v1558_v1  ;;  %v1540_v12 = vcombine.high %v1990_v34, %v2005_v37  ;;  %v1531_v0 = vcombine.low %v1955_v27, %v1970_v30  ;;  %v1539_v1 = vcombine.low %v1990_v34, %v2005_v37  ;;  %s2749_s7 = scalar_lea.vmem [#allocation2], %s1630_s6 }
 0x12e   : > { %1239 = vmatprep.mubr.bf16.mxu0 %v2568_v9  ;;  %1282 = vmatprep.mubr.bf16.mxu1 %v2568_v9 }
 0x12f   : > { %1210 = vmatpush1.bf16.msra.mxu0 %v1555_v23  ;;  %v1545_v23 = vcombine.low %v2020_v40, %v2035_v43 }
 0x130   : > { %1211 = vmatprep.subr.bf16.mxu0 %v1550_v8  ;;  %1253 = vmatpush1.bf16.msra.mxu1 %v1557_v2  ;;  %v1532_v8 = vcombine.high %v1955_v27, %v1970_v30  ;;  %v1534_v2 = vcombine.high %v1960_v28, %v1975_v31 }
 0x131   : > { %1254 = vmatprep.subr.bf16.mxu1 %v1552_v63  ;;  %v1533_v63 = vcombine.low %v1960_v28, %v1975_v31 }
 0x133   : > { %1212 = vmatpush1.bf16.msra.mxu0 %v1549_v11  ;;  %v1526_v11 = vcombine.high %v2973_v21, %v2971_v24 }
 0x134   : > { %1213 = vmatprep.subr.bf16.mxu0 %v1544_v3  ;;  %1255 = vmatpush1.bf16.msra.mxu1 %v1551_v7  ;;  %v1525_v3 = vcombine.low %v2973_v21, %v2971_v24  ;;  %v1528_v7 = vcombine.high %v2972_v22, %v1945_v25 }
 0x135   : > { %1256 = vmatprep.subr.bf16.mxu1 %v1546_v47  ;;  %v1527_v47 = vcombine.low %v2972_v22, %v1945_v25 }
 0x137   : > { %1214 = vmatpush1.bf16.msra.mxu0 %v1543_v62  ;;  %v1520_v62 = vcombine.high %v2978_v15, %v2975_v18 }
 0x138   : > { %1215 = vmatprep.subr.bf16.mxu0 %v1538_v13  ;;  %1257 = vmatpush1.bf16.msra.mxu1 %v1545_v23  ;;  %v1519_v13 = vcombine.low %v2978_v15, %v2975_v18  ;;  %v1522_v23 = vcombine.high %v2977_v16, %v2974_v19 }
 0x139   : > { %1258 = vmatprep.subr.bf16.mxu1 %v1540_v12  ;;  %v1521_v12 = vcombine.low %v2977_v16, %v2974_v19  ;;  %v1349_v19 = vld [vmem:[%s2741_s28 + $0x40] sm:$0xff] }
 0x13b   : > { %1216 = vmatpush1.bf16.msra.mxu0 %v1537_v6  ;;  %v1610_v6 = vcombine.high %v2360_v59, %v2375_v44 }
 0x13c   : > { %1217 = vmatprep.subr.bf16.mxu0 %v1532_v8  ;;  %1259 = vmatpush1.bf16.msra.mxu1 %v1539_v1  ;;  %v1609_v8 = vcombine.low %v2360_v59, %v2375_v44  ;;  %v1612_v1 = vcombine.high %v2980_v10, %v2979_v14 }
 0x13d   : > { %1260 = vmatprep.subr.bf16.mxu1 %v1534_v2  ;;  %v1611_v2 = vcombine.low %v2980_v10, %v2979_v14  ;;  %v2990_v14 = vld [vmem:[#allocation45_spill] sm:$0xff] }
 0x13f   : > { %1218 = vmatpush1.bf16.msra.mxu0 %v1531_v0  ;;  %v1604_v0 = vcombine.high %v2327_v50, %v2976_v17 }
 0x140   : > { %1219 = vmatprep.subr.bf16.mxu0 %v1526_v11  ;;  %1261 = vmatpush1.bf16.msra.mxu1 %v1533_v63  ;;  %v1603_v11 = vcombine.low %v2327_v50, %v2976_v17  ;;  %v1606_v63 = vcombine.high %v2981_v4, %v2347_v56 }
 0x141   : > { %1262 = vmatprep.subr.bf16.mxu1 %v1528_v7  ;;  %v1605_v7 = vcombine.low %v2981_v4, %v2347_v56  ;;  %v2988_v4 = vld [vmem:[#allocation38_spill] sm:$0xff] }
 0x143   : > { %1220 = vmatpush1.bf16.msra.mxu0 %v1525_v3  ;;  %v1598_v3 = vcombine.high %v2294_v35, %v2309_v41 }
 0x144   : > { %1221 = vmatprep.subr.bf16.mxu0 %v1520_v62  ;;  %1263 = vmatpush1.bf16.msra.mxu1 %v1527_v47  ;;  %v1597_v62 = vcombine.low %v2294_v35, %v2309_v41  ;;  %v2982_v47 = vld [vmem:[#allocation54_spill] sm:$0xff] }
 0x145   : > { %1264 = vmatprep.subr.bf16.mxu1 %v1522_v23  ;;  %v1591_v23 = vcombine.low %v2263_v29, %v2278_v26 }
 0x147   : > { %1222 = vmatpush1.bf16.msra.mxu0 %v1519_v13  ;;  %v1592_v13 = vcombine.high %v2263_v29, %v2278_v26 }
 0x148   : > { %1223 = vmatprep.subr.bf16.mxu0 %v1610_v6  ;;  %1265 = vmatpush1.bf16.msra.mxu1 %v1521_v12  ;;  %v1600_v6 = vcombine.high %v2982_v47, %v2314_v53  ;;  %v2983_v12 = vld [vmem:[#allocation47_spill] sm:$0xff] }
 0x149   : > { %1266 = vmatprep.subr.bf16.mxu1 %v1612_v1 }
 0x14b   : > { %1224 = vmatpush2.bf16.msra.mxu0 %v1609_v8  ;;  %v1599_v8 = vcombine.low %v2982_v47, %v2314_v53 }
 0x14c   : > { %1225 = vmatprep.subr.bf16.mxu0 %v1604_v0  ;;  %1267 = vmatpush2.bf16.msra.mxu1 %v1611_v2  ;;  %v2984_v0 = vld [vmem:[#allocation44_spill] sm:$0xff]  ;;  %v2986_v2 = vld [vmem:[#allocation50_spill] sm:$0xff] }
 0x14d   : > { %1268 = vmatprep.subr.bf16.mxu1 %v1606_v63  ;;  %v1586_v1 = vcombine.high %v2984_v0, %v2983_v12  ;;  %v1585_v63 = vcombine.low %v2984_v0, %v2983_v12  ;;  %v2992_v0 = vld [vmem:[#allocation32_spill] sm:$0xff] }
 0x14f   : > { %1226 = vmatpush2.bf16.msra.mxu0 %v1603_v11  ;;  %v2985_v11 = vld [vmem:[#allocation52_spill] sm:$0xff] }
 0x150   : > { %1227 = vmatprep.subr.bf16.mxu0 %v1598_v3  ;;  %1269 = vmatpush2.bf16.msra.mxu1 %v1605_v7  ;;  %v1594_v3 = vcombine.high %v2986_v2, %v2985_v11  ;;  %v2987_v7 = vld [vmem:[#allocation41_spill] sm:$0xff] }
 0x151   : > { %1270 = vmatprep.subr.bf16.mxu1 %v1600_v6  ;;  %v1580_v10 = vcombine.high %v2988_v4, %v2987_v7  ;;  %v1579_v6 = vcombine.low %v2988_v4, %v2987_v7  ;;  %v2996_v4 = vld [vmem:[#allocation26_spill] sm:$0xff] }
 0x153   : > { %1228 = vmatpush2.bf16.msra.mxu0 %v1597_v62  ;;  %v1593_v62 = vcombine.low %v2986_v2, %v2985_v11  ;;  %v2994_v11 = vld [vmem:[#allocation39_spill] sm:$0xff] }
 0x154   : > { %1229 = vmatprep.subr.bf16.mxu0 %v1592_v13  ;;  %1271 = vmatpush2.bf16.msra.mxu1 %v1599_v8  ;;  %v2989_v13 = vld [vmem:[#allocation48_spill] sm:$0xff]  ;;  %v2991_v8 = vld [vmem:[#allocation35_spill] sm:$0xff] }
 0x155   : > { %1272 = vmatprep.subr.bf16.mxu1 %v1594_v3  ;;  %v1588_v15 = vcombine.high %v2990_v14, %v2989_v13  ;;  %v1574_v2 = vcombine.high %v2992_v0, %v2991_v8  ;;  %v1573_v3 = vcombine.low %v2992_v0, %v2991_v8  ;;  %v3000_v0 = vld [vmem:[#allocation24_spill] sm:$0xff]  ;;  %v3002_v8 = vld [vmem:[#allocation27_spill] sm:$0xff] }
 0x157   : > { %1230 = vmatpush2.bf16.msra.mxu0 %v1591_v23  ;;  %v1587_v23 = vcombine.low %v2990_v14, %v2989_v13  ;;  %v2998_v13 = vld [vmem:[#allocation33_spill] sm:$0xff] }
 0x158   : > { %1231 = vmatprep.subr.bf16.mxu0 %v1586_v1  ;;  %1273 = vmatpush2.bf16.msra.mxu1 %v1593_v62  ;;  %v2993_v1 = vld [vmem:[#allocation42_spill] sm:$0xff]  ;;  %v2995_v62 = vld [vmem:[#allocation29_spill] sm:$0xff] }
 0x159   : > { %1274 = vmatprep.subr.bf16.mxu1 %v1588_v15  ;;  %v1582_v12 = vcombine.high %v2994_v11, %v2993_v1  ;;  %v1568_v7 = vcombine.high %v2996_v4, %v2995_v62  ;;  %v1567_v15 = vcombine.low %v2996_v4, %v2995_v62  ;;  %v3004_v4 = vld [vmem:[#allocation22_spill] sm:$0xff] }
 0x15b   : > { %1232 = vmatpush2.bf16.msra.mxu0 %v1585_v63  ;;  %v1581_v63 = vcombine.low %v2994_v11, %v2993_v1 }
 0x15c   : > { %1233 = vmatprep.subr.bf16.mxu0 %v1580_v10  ;;  %1275 = vmatpush2.bf16.msra.mxu1 %v1587_v23  ;;  %v2997_v10 = vld [vmem:[#allocation36_spill] sm:$0xff]  ;;  %v2999_v23 = vld [vmem:[#allocation25_spill] sm:$0xff] }
 0x15d   : > { %1276 = vmatprep.subr.bf16.mxu1 %v1582_v12  ;;  %v1576_v14 = vcombine.high %v2998_v13, %v2997_v10  ;;  %v1566_v1 = vcombine.high %v3000_v0, %v2999_v23  ;;  %v2670_v12 = vpack.c.bf16 %v1757_v38, %v1765_v5 }
 0x15f   : > { %1234 = vmatpush2.bf16.msra.mxu0 %v1579_v6  ;;  %v1575_v6 = vcombine.low %v2998_v13, %v2997_v10  ;;  %v3006_v13 = vld [vmem:[#allocation20_spill] sm:$0xff] }
 0x160   : > { %1235 = vmatprep.subr.bf16.mxu0 %v1574_v2  ;;  %1277 = vmatpush2.bf16.msra.mxu1 %v1581_v63  ;;  %v3001_v2 = vld [vmem:[#allocation30_spill] sm:$0xff] }
 0x161   : > { %1278 = vmatprep.subr.bf16.mxu1 %v1576_v14  ;;  %v1570_v11 = vcombine.high %v3002_v8, %v3001_v2  ;;  %v1569_v63 = vcombine.low %v3002_v8, %v3001_v2  ;;  %v3010_v2 = vld [vmem:[#allocation16_spill] sm:$0xff] }
 0x163   : > { %1236 = vmatpush2.bf16.msra.mxu0 %v1573_v3  ;;  %v1565_v3 = vcombine.low %v3000_v0, %v2999_v23 }
 0x164   : > { %1237 = vmatprep.subr.bf16.mxu0 %v1568_v7  ;;  %1279 = vmatpush2.bf16.msra.mxu1 %v1575_v6  ;;  %v3003_v7 = vld [vmem:[#allocation23_spill] sm:$0xff]  ;;  %v3008_v6 = vld [vmem:[#allocation18_spill] sm:$0xff] }
 0x165   : > { %v1560_v10 = vcombine.high %v3004_v4, %v3003_v7  ;;  %1280 = vmatprep.subr.bf16.mxu1 %v1570_v11  ;;  %v1559_v14 = vcombine.low %v3004_v4, %v3003_v7  ;;  %v3007_v11 = vld [vmem:[#allocation19_spill] sm:$0xff]  ;;  %v3012_v7 = vld [vmem:[#allocation14_spill] sm:$0xff] }
 0x167   : > { %1238 = vmatpush2.bf16.msra.mxu0 %v1567_v15  ;;  %v3005_v15 = vld [vmem:[#allocation21_spill] sm:$0xff] }
 0x168   : > { %1293 = vmatprep.subr.bf16.mxu0 %v1566_v1  ;;  %1281 = vmatpush2.bf16.msra.mxu1 %v1569_v63  ;;  %v1554_v0 = vcombine.high %v3006_v13, %v3005_v15  ;;  %v1553_v1 = vcombine.low %v3006_v13, %v3005_v15  ;;  %v1547_v63 = vcombine.low %v3008_v6, %v3007_v11  ;;  %v3014_v13 = vld [vmem:[#allocation11_spill] sm:$0xff] }
 0x169   : > { %v3024_v15 = vld [vmem:[#allocation51_spill] sm:$0xff] }
 0x16a   : > { %1240 = vmatmul.mubr.bf16.vlgmr.msra.gmra.mxu0 %v2670_v12 }
 0x16b   : > { %1294 = vmatpush1.bf16.msra.mxu0 %v1565_v3  ;;  %1325 = vmatprep.mubr.bf16.mxu0 %v2568_v9  ;;  %v1548_v3 = vcombine.high %v3008_v6, %v3007_v11  ;;  %v3016_v11 = vld [vmem:[#allocation5_spill] sm:$0xff] }
 0x16c   : > { %1295 = vmatprep.subr.bf16.mxu0 %v1560_v10  ;;  %1283 = vmatmul.mubr.bf16.vlgmr.msra.gmra.mxu1 %v2670_v12  ;;  %v3009_v10 = vld [vmem:[#allocation17_spill] sm:$0xff] }
 0x16d   : > { %v1542_v4 = vcombine.high %v3010_v2, %v3009_v10  ;;  %v1541_v9 = vcombine.low %v3010_v2, %v3009_v10  ;;  %v3018_v10 = vld [vmem:[#allocation62_spill] sm:$0xff] }
 0x16f   : > { %1296 = vmatpush1.bf16.msra.mxu0 %v1559_v14  ;;  %v3011_v14 = vld [vmem:[#allocation15_spill] sm:$0xff] }
 0x170   : > { %1297 = vmatprep.subr.bf16.mxu0 %v1554_v0  ;;  %v1536_v8 = vcombine.high %v3012_v7, %v3011_v14  ;;  %v1535_v0 = vcombine.low %v3012_v7, %v3011_v14  ;;  %v3020_v14 = vld [vmem:[#allocation58_spill] sm:$0xff] }
 0x173   : > { %1298 = vmatpush1.bf16.msra.mxu0 %v1553_v1  ;;  %v3013_v1 = vld [vmem:[#allocation13_spill] sm:$0xff] }
 0x174   : > { %1299 = vmatprep.subr.bf16.mxu0 %v1548_v3  ;;  %v1530_v6 = vcombine.high %v3014_v13, %v3013_v1  ;;  %v1529_v3 = vcombine.low %v3014_v13, %v3013_v1  ;;  %v3022_v13 = vld [vmem:[#allocation55_spill] sm:$0xff] }
 0x177   : > { %1300 = vmatpush1.bf16.msra.mxu0 %v1547_v63  ;;  %v3015_v63 = vld [vmem:[#allocation8_spill] sm:$0xff] }
 0x178   : > { %1301 = vmatprep.subr.bf16.mxu0 %v1542_v4  ;;  %v1524_v2 = vcombine.high %v3016_v11, %v3015_v63  ;;  %v1523_v4 = vcombine.low %v3016_v11, %v3015_v63 }
 0x17b   : > { %1302 = vmatpush1.bf16.msra.mxu0 %v1541_v9  ;;  %v3017_v9 = vld [vmem:[#allocation64_spill] sm:$0xff] }
 0x17c   : > { %1303 = vmatprep.subr.bf16.mxu0 %v1536_v8  ;;  %v1614_v7 = vcombine.high %v3018_v10, %v3017_v9  ;;  %v1613_v8 = vcombine.low %v3018_v10, %v3017_v9  ;;  %v3026_v10 = vld [vmem:[#allocation46_spill] sm:$0xff] }
 0x17f   : > { %1304 = vmatpush1.bf16.msra.mxu0 %v1535_v0  ;;  %v3019_v0 = vld [vmem:[#allocation60_spill] sm:$0xff] }
 0x180   : > { %1305 = vmatprep.subr.bf16.mxu0 %v1530_v6  ;;  %v1608_v1 = vcombine.high %v3020_v14, %v3019_v0  ;;  %v1607_v6 = vcombine.low %v3020_v14, %v3019_v0  ;;  %v3031_v14 = vld [vmem:[#allocation31_spill] sm:$0xff] }
 0x183   : > { %1306 = vmatpush1.bf16.msra.mxu0 %v1529_v3  ;;  %v3021_v3 = vld [vmem:[#allocation56_spill] sm:$0xff] }
 0x184   : > { %1307 = vmatprep.subr.bf16.mxu0 %v1524_v2  ;;  %v1602_v11 = vcombine.high %v3022_v13, %v3021_v3  ;;  %v1601_v2 = vcombine.low %v3022_v13, %v3021_v3  ;;  %v3028_v3 = vld [vmem:[#allocation40_spill] sm:$0xff]  ;;  %v3029_v13 = vld [vmem:[#allocation37_spill] sm:$0xff] }
 0x187   : > { %1308 = vmatpush1.bf16.msra.mxu0 %v1523_v4  ;;  %v3023_v4 = vld [vmem:[#allocation53_spill] sm:$0xff] }
 0x188   : > { %1309 = vmatprep.subr.bf16.mxu0 %v1614_v7  ;;  %v1596_v9 = vcombine.high %v3024_v15, %v3023_v4  ;;  %v1595_v7 = vcombine.low %v3024_v15, %v3023_v4  ;;  %v3030_v4 = vld [vmem:[#allocation34_spill] sm:$0xff] }
 0x18b   : > { %1310 = vmatpush2.bf16.msra.mxu0 %v1613_v8  ;;  %v3025_v8 = vld [vmem:[#allocation49_spill] sm:$0xff] }
 0x18c   : > { %1311 = vmatprep.subr.bf16.mxu0 %v1608_v1  ;;  %v1590_v0 = vcombine.high %v3026_v10, %v3025_v8  ;;  %v1589_v1 = vcombine.low %v3026_v10, %v3025_v8  ;;  %v3032_v8 = vld [vmem:[#allocation28_spill] sm:$0xff] }
 0x18d   : > { %v1572_v10 = vcombine.high %v3032_v8, %v3031_v14 }
 0x18f   : > { %1312 = vmatpush2.bf16.msra.mxu0 %v1607_v6  ;;  %v3027_v6 = vld [vmem:[#allocation43_spill] sm:$0xff] }
 0x190   : > { %1313 = vmatprep.subr.bf16.mxu0 %v1602_v11  ;;  %v1584_v11 = vcombine.high %v3028_v3, %v3027_v6 }
 0x193   : > { %1314 = vmatpush2.bf16.msra.mxu0 %v1601_v2  ;;  %v1583_v2 = vcombine.low %v3028_v3, %v3027_v6 }
 0x194   : > { %1315 = vmatprep.subr.bf16.mxu0 %v1596_v9  ;;  %v1578_v9 = vcombine.high %v3030_v4, %v3029_v13 }
 0x197   : > { %1316 = vmatpush2.bf16.msra.mxu0 %v1595_v7  ;;  %v1577_v7 = vcombine.low %v3030_v4, %v3029_v13  ;;  %v1348_v13 = vld [vmem:[%s2741_s28 + $0x38] sm:$0xff] }
 0x198   : > { %1317 = vmatprep.subr.bf16.mxu0 %v1590_v0  ;;  %v1571_v0 = vcombine.low %v3032_v8, %v3031_v14 }
 0x19b   : > { %1318 = vmatpush2.bf16.msra.mxu0 %v1589_v1  ;;  %v1344_v1 = vld [vmem:[%s2741_s28] sm:$0xff] }
 0x19c   : > { %1319 = vmatprep.subr.bf16.mxu0 %v1584_v11 }
 0x19f   : > { %1320 = vmatpush2.bf16.msra.mxu0 %v1583_v2 }
 0x1a0   : > { %1321 = vmatprep.subr.bf16.mxu0 %v1578_v9 }
 0x1a3   : > { %1322 = vmatpush2.bf16.msra.mxu0 %v1577_v7  ;;  %v1347_v7 = vld [vmem:[%s2741_s28 + $0x30] sm:$0xff] }
 0x1a4   : > { %1323 = vmatprep.subr.bf16.mxu0 %v1572_v10  ;;  %v1345_v10 = vld [vmem:[%s2741_s28 + $0x8] sm:$0xff] }
 0x1a7   : > { %1324 = vmatpush2.bf16.msra.mxu0 %v1571_v0 }
 0x1aa   : > { %1326 = vmatmul.mubr.bf16.vlgmr.msra.gmra.mxu0 %v2670_v12 }
 0x22a   : > { %v1241_v11 = vpop.f32.mrf.mxu0 }
 0x22b   : > { %v1361_v2 = vadd.f32 %v1344_v1, %v1241_v11 }
 0x22c   : > { %v1243_v9 = vpop.f32.mrf.mxu0 }
 0x22d   : > { %v1619_v3 = vmul.f32 -1.442695, %v1361_v2  ;;  %v1375_v4 = vadd.f32 %v1345_v10, %v1243_v9  ;;  %v1284_v2 = vpop.f32.mrf.mxu1  ;;  %v1346_v10 = vld [vmem:[%s2741_s28 + $0x10] sm:$0xff] }
 0x22e   : > { %v1245_v0 = vpop.f32.mrf.mxu0 }
 0x22f   : > { %1691 = vpow2.f32 %v1619_v3  ;;  %v1362_v12 = vadd.f32 %v1347_v7, %v1245_v0  ;;  %v1621_v15 = vmul.f32 -1.442695, %v1375_v4  ;;  %v1286_v7 = vpop.f32.mrf.mxu1  ;;  %v3033_v4 = vld [vmem:[#allocation65_spill] sm:$0xff] }
 0x230   : > { %v1247_v8 = vpop.f32.mrf.mxu0 }
 0x231   : > { %v1620_v6 = vmul.f32 -1.442695, %v1362_v12  ;;  %v1376_v14 = vadd.f32 %v1348_v13, %v1247_v8 }
 0x233   : > { %1693 = vpow2.f32 %v1620_v6  ;;  %v1622_v16 = vmul.f32 -1.442695, %v1376_v14  ;;  %v1389_v14 = vadd.f32 %v3033_v4, %v1284_v2 }
 0x234   : > { %1695 = vpow2.f32 %v1621_v15 }
 0x235   : > { %1697 = vpow2.f32 %v1622_v16  ;;  %v1355_v16 = vld [vmem:[%s2749_s7 + $0x18] sm:$0xff] }
 0x236   : > { %v1405_v0 = vadd.f32 %v1355_v16, %v1286_v7 }
 0x238   : > { %v1623_v2 = vmul.f32 -1.442695, %v1405_v0 }
 0x23c   : > { %v1692_v17 = vpop.eup %1691 }
 0x23d   : > { %v1369_v1 = vadd.f32 1.0, %v1692_v17  ;;  %v1288_v17 = vpop.f32.mrf.mxu1 }
 0x23f   : > { %1699 = vrcp.f32 %v1369_v1  ;;  %v1390_v1 = vadd.f32 %v3033_v4, %v1288_v17 }
 0x240   : > { %v1694_v11 = vpop.eup %1693 }
 0x241   : > { %v1370_v3 = vadd.f32 1.0, %v1694_v11  ;;  %v1696_v9 = vpop.eup %1695 }
 0x242   : > { %v1698_v6 = vpop.eup %1697  ;;  %v1383_v13 = vadd.f32 1.0, %v1696_v9  ;;  %v1358_v9 = vld [vmem:[%s2749_s7 + $0x48] sm:$0xff] }
 0x243   : > { %1701 = vrcp.f32 %v1370_v3  ;;  %v1384_v8 = vadd.f32 1.0, %v1698_v6  ;;  %v1290_v3 = vpop.f32.mrf.mxu1 }
 0x244   : > { %1703 = vrcp.f32 %v1383_v13  ;;  %v1406_v22 = vadd.f32 %v1358_v9, %v1290_v3 }
 0x245   : > { %1705 = vrcp.f32 %v1384_v8 }
 0x246   : > { %v1624_v6 = vmul.f32 -1.442695, %v1406_v22 }
 0x24c   : > { %v1700_v15 = vpop.eup %1699 }
 0x24d   : > { %v1391_v12 = vmul.f32 %v1700_v15, %v1389_v14 }
 0x24f   : > { %v1393_v11 = vadd.f32 %v1391_v12, %v1346_v10  ;;  %v1356_v12 = vld [vmem:[%s2749_s7 + $0x20] sm:$0xff] }
 0x250   : > { %v1702_v18 = vpop.eup %1701 }
 0x251   : > { %1707 = vtanh.f32 %v1393_v11  ;;  %v1392_v21 = vmul.f32 %v1702_v18, %v1390_v1  ;;  %v1704_v24 = vpop.eup %1703 }
 0x252   : > { %1709 = vpow2.f32 %v1623_v2  ;;  %v1706_v7 = vpop.eup %1705  ;;  %v1397_v13 = vsub.f32 1.0, %v1704_v24  ;;  %v1401_v16 = vmul.f32 %v1765_v5, %v1704_v24  ;;  %v1359_v24 = vld [vmem:[%s2749_s7 + $0x50] sm:$0xff] }
 0x253   : > { %v1394_v23 = vadd.f32 %v1392_v21, %v1349_v19  ;;  %v1398_v8 = vsub.f32 1.0, %v1706_v7  ;;  %v1402_v18 = vmul.f32 %v1757_v38, %v1706_v7  ;;  %v3034_v38 = vld [vmem:[#allocation66_spill] sm:$0xff] }
 0x254   : > { %v3035_v7 = vmov %v3034_v38 }
 0x255   : > { %1711 = vtanh.f32 %v1394_v23 }
 0x256   : > { %1713 = vpow2.f32 %v1624_v6 }
 0x25e   : > { %v1708_v14 = vpop.eup %1707 }
 0x25f   : > { %v1399_v17 = vmul.f32 %v1708_v14, %v1397_v13  ;;  %v1710_v15 = vpop.eup %1709 }
 0x260   : > { %v1413_v21 = vadd.f32 1.0, %v1710_v15 }
 0x261   : > { %v1403_v10 = vadd.f32 %v1401_v16, %v1399_v17  }
 0x262   : > { %v1712_v0 = vpop.eup %1711  ;;  %1715 = vrcp.f32 %v1413_v21 }
 0x263   : > { %v1400_v19 = vmul.f32 %v1712_v0, %v1398_v8  ;;  %v1714_v22 = vpop.eup %1713  ;;  %v1357_v8 = vld [vmem:[%s2749_s7 + $0x28] sm:$0xff]  ;;  %1449 = vst [vmem:[%s2790_s5] sm:$0xff] (%p717_p0), %v1403_v10 }
 0x264   : > { %v1414_v1 = vadd.f32 1.0, %v1714_v22 }
 0x265   : > { %v1404_v23 = vadd.f32 %v1402_v18, %v1400_v19  }
 0x266   : > { %1717 = vrcp.f32 %v1414_v1  ;;  %v1360_v1 = vld [vmem:[%s2749_s7 + $0x58] sm:$0xff] }
 0x267   :  { %1450 = vst [vmem:[%s2790_s5 + $0x8] sm:$0xff] (%p717_p0), %v1404_v23 }
 0x26a   : > { %v1327_v11 = vpop.f32.mrf.mxu0 }
 0x26b   : > { %v1419_v3 = vadd.f32 %v1356_v12, %v1327_v11 }
 0x26c   : > { %v1329_v9 = vpop.f32.mrf.mxu0 }
 0x26d   : > { %v1625_v5 = vmul.f32 -1.442695, %v1419_v3  ;;  %v1433_v14 = vadd.f32 %v3034_v38, %v1329_v9 }
 0x26e   : > { %v1331_v2 = vpop.f32.mrf.mxu0 }
 0x26f   : > { %1719 = vpow2.f32 %v1625_v5  ;;  %v1420_v6 = vadd.f32 %v1359_v24, %v1331_v2  ;;  %v1716_v16 = vpop.eup %1715 }
 0x270   : > { %v1333_v17 = vpop.f32.mrf.mxu0  ;;  %v1435_v15 = vmul.f32 %v1716_v16, %v1433_v14 }
 0x271   : > { %v1626_v13 = vmul.f32 -1.442695, %v1420_v6  ;;  %v1434_v0 = vadd.f32 %v3035_v7, %v1333_v17 }
 0x272   : > { %v1437_v22 = vadd.f32 %v1435_v15, %v1357_v8 }
 0x273   : > { %1721 = vpow2.f32 %v1626_v13  ;;  %v1718_v18 = vpop.eup %1717 }
 0x274   : > { %v1436_v12 = vmul.f32 %v1718_v18, %v1434_v0 }
 0x276   : > { %v1438_v24 = vadd.f32 %v1436_v12, %v1360_v1 }
 0x27c   : > { %v1720_v19 = vpop.eup %1719 }
 0x27d   : > { %v1427_v21 = vadd.f32 1.0, %v1720_v19 }
 0x27f   : > { %1723 = vrcp.f32 %v1427_v21 }
 0x280   : > { %v1722_v11 = vpop.eup %1721  ;;  %1725 = vtanh.f32 %v1437_v22 }
 0x281   : > { %v1428_v3 = vadd.f32 1.0, %v1722_v11 }
 0x283   : > { %1727 = vrcp.f32 %v1428_v3 }
 0x284   : > { %1729 = vtanh.f32 %v1438_v24 }
 0x28c   : > { %v1724_v9 = vpop.eup %1723 }
 0x28d   : > { %v1441_v5 = vsub.f32 1.0, %v1724_v9  ;;  %v1726_v2 = vpop.eup %1725  ;;  %v1445_v6 = vmul.f32 %v1761_v20, %v1724_v9 }
 0x28f   : > { %v1443_v13 = vmul.f32 %v1726_v2, %v1441_v5  ;;  %v3039_v5 = vmov %v1403_v10 }
 0x290   : > { %v1728_v38 = vpop.eup %1727 }
 0x291   : > { %v1447_v14 = vadd.f32 %v1445_v6, %v1443_v13   ;;  %v1442_v16 = vsub.f32 1.0, %v1728_v38  ;;  %v1730_v17 = vpop.eup %1729  ;;  %v1446_v15 = vmul.f32 %v1753_v32, %v1728_v38  ;;  %v3037_v38 = vmov %v1404_v23 }
 0x293   : > { %v1444_v8 = vmul.f32 %v1730_v17, %v1442_v16  ;;  %v3038_v20 = vmov %v1447_v14  ;;  %719 = sbr.rel (!%p717_p0) target bundleno = 296 (0x128), region = 50  ;;  %1627 = vst [vmem:[%s2790_s5 + $0x10] sm:$0xff] (%p717_p0), %v1447_v14 }
 0x295   : > { %v1448_v0 = vadd.f32 %v1446_v15, %v1444_v8  }
 0x297   : > { %v3036_v32 = vmov %v1448_v0  ;;  %1628 = vst [vmem:[%s2790_s5 + $0x18] sm:$0xff] (%p717_p0), %v1448_v0 }

</bundles_post_ra>
